<compile_context>
chip_gen: v6e
topology: v6e:2x2x1
jax: 0.10.0
libtpu: 0.0.40
codegen_flags: <defaults>
</compile_context>

<pallas_src>
import functools
import numpy as np
import jax
import jax.numpy as jnp
from jax.experimental import pallas as pl
from jax.experimental.pallas import tpu as pltpu

_VMEM_LIMIT = 32 * 1024 * 1024   # explicit scoped-VMEM budget, safe on v5e/v6e/v7x
_MM_ROWS = 512                   # row tile for MXU matmul kernels
_EW_ROWS = 1024                  # row tile for elementwise / BatchNorm kernels
_LANE = 128


def _round_up(n, m):
    return ((n + m - 1) // m) * m


def _row_tile(m, cap):
    return m if m <= cap else cap


def _compiler_params(semantics):
    return pltpu.CompilerParams(dimension_semantics=semantics,
                                vmem_limit_bytes=_VMEM_LIMIT)


# ----------------------------- Pallas kernels --------------------------------

def _matmul_bf16_kernel(a_ref, w_ref, o_ref):
    """bf16 x bf16 MXU matmul, f32 accumulation (downconv hot path)."""
    o_ref[...] = jnp.dot(a_ref[...], w_ref[...], preferred_element_type=jnp.float32)


def _relu_matmul_kernel(a_ref, w_ref, o_ref):
    """Fused ReLU (f32) -> bf16 cast -> MXU matmul (upconv / transpose-conv hot path)."""
    a = jnp.maximum(a_ref[...], 0.0)                       # activation in f32 (v5e VPU note)
    o_ref[...] = jnp.dot(a.astype(jnp.bfloat16), w_ref[...],
                         preferred_element_type=jnp.float32)


def _bn_stats_kernel(y_ref, sum_ref, sq_ref, *, rows_total, tm):
    """Streaming per-channel sum / sum-of-squares over a row-tiled grid (reduction axis)."""
    i = pl.program_id(0)

    @pl.when(i == 0)
    def _init():
        sum_ref[...] = jnp.zeros_like(sum_ref)
        sq_ref[...] = jnp.zeros_like(sq_ref)

    y = y_ref[...]
    row = jax.lax.broadcasted_iota(jnp.int32, y.shape, 0) + i * tm
    y = jnp.where(row < rows_total, y, 0.0)                # mask a partial trailing tile
    sum_ref[...] += jnp.sum(y, axis=0, keepdims=True)
    sq_ref[...] += jnp.sum(y * y, axis=0, keepdims=True)


def _scale_shift_kernel(y_ref, sc_ref, sh_ref, o_ref):
    """BatchNorm affine apply: y * scale + shift (per-channel)."""
    o_ref[...] = y_ref[...] * sc_ref[...] + sh_ref[...]


def _bias_tanh_kernel(y_ref, b_ref, o_ref):
    """Outermost epilogue: tanh(y + bias) (EUP)."""
    o_ref[...] = jnp.tanh(y_ref[...] + b_ref[...])


# --------------------------- tiled pallas_call wrappers -----------------------

def _tiled_matmul(kernel, a, w):
    """(M, K) @ (K, Nlanes) with row tiling; the weight block stays resident."""
    m, k = a.shape
    kw, nl = w.shape
    tm = _row_tile(m, _MM_ROWS)
    return pl.pallas_call(
        kernel,
        out_shape=jax.ShapeDtypeStruct((m, nl), jnp.float32),
        grid=(pl.cdiv(m, tm),),
        in_specs=[pl.BlockSpec((tm, k), lambda i: (i, 0)),
                  pl.BlockSpec((kw, nl), lambda i: (0, 0))],    # pinned weight
        out_specs=pl.BlockSpec((tm, nl), lambda i: (i, 0)),
        compiler_params=_compiler_params(("parallel",)),
    )(a, w)


def _pad_lanes(w2d):
    """Pad the matmul output/lane dimension to a multiple of 128 (lane-dense stores)."""
    n = w2d.shape[1]
    npad = _round_up(n, _LANE)
    if npad != n:
        w2d = jnp.pad(w2d, ((0, 0), (0, npad - n)))
    return w2d, n


def _conv_weight_to_mat(w):
    # Conv2d weight (Cout, Cin, 4, 4) -> (16*Cin, Cout), row order (ki, kj, ci)
    cout, cin = w.shape[0], w.shape[1]
    return jnp.transpose(w, (2, 3, 1, 0)).reshape(16 * cin, cout)


def _convT_weight_to_mat(w):
    # ConvTranspose2d weight (Cin, Cout, 4, 4) -> (Cin, 16*Cout), col order (ki, kj, co)
    cin, cout = w.shape[0], w.shape[1]
    return jnp.transpose(w, (0, 2, 3, 1)).reshape(cin, 16 * cout)


# ------------------------------- layer ops ------------------------------------

def conv_down_nhwc(x, w, *, leaky):
    """[LeakyReLU(0.2)] -> Conv2d(k=4, s=2, p=1, bias=False).  x: (N,H,W,Cin) f32."""
    n, h, wd, cin = x.shape
    cout = w.shape[0]
    ho, wo = h // 2, wd // 2
    if leaky:
        x = jnp.where(x >= 0, x, 0.2 * x)                   # activation in f32, pre-bf16
    xb = jnp.pad(x.astype(jnp.bfloat16), ((0, 0), (1, 1), (1, 1), (0, 0)))
    cols = []
    for ki in range(4):
        for kj in range(4):
            cols.append(xb[:, ki:ki + 2 * ho:2, kj:kj + 2 * wo:2, :])
    patches = jnp.concatenate(cols, axis=-1).reshape(n * ho * wo, 16 * cin)   # bf16
    wmat, real = _pad_lanes(_conv_weight_to_mat(w).astype(jnp.bfloat16))
    out = _tiled_matmul(_matmul_bf16_kernel, patches, wmat)
    if out.shape[1] != real:
        out = out[:, :real]
    return out.reshape(n, ho, wo, cout)


# phase -> ((row/col shift of the contribution map, kernel tap index), ...)
_SUBPIX_TAPS = {0: ((0, 1), (-1, 3)), 1: ((1, 0), (0, 2))}


def conv_up_nhwc(d, w):
    """ReLU -> ConvTranspose2d(k=4, s=2, p=1, bias=False) as a per-tap matmul plus a
    sub-pixel (phase) gather combine.  d: (N,Hi,Wi,Cin) f32 -> (N,2Hi,2Wi,Cout) f32."""
    n, hi, wi, cin = d.shape
    cout = w.shape[1]
    wmat, real = _pad_lanes(_convT_weight_to_mat(w).astype(jnp.bfloat16))
    y = _tiled_matmul(_relu_matmul_kernel, d.reshape(n * hi * wi, cin), wmat)
    if y.shape[1] != real:
        y = y[:, :real]
    y = y.reshape(n, hi, wi, 4, 4, cout)                    # per-tap contributions
    yp = jnp.pad(y, ((0, 0), (1, 1), (1, 1), (0, 0), (0, 0), (0, 0)))
    dr_rows = []
    for dr in (0, 1):
        dc_cols = []
        for dc in (0, 1):
            acc = None
            for (ar, kr) in _SUBPIX_TAPS[dr]:
                for (ac, kc) in _SUBPIX_TAPS[dc]:
                    t = yp[:, 1 + ar:1 + ar + hi, 1 + ac:1 + ac + wi, kr, kc, :]
                    acc = t if acc is None else acc + t
            dc_cols.append(acc)                             # (N, Hi, Wi, Cout)
        dr_rows.append(jnp.stack(dc_cols, axis=3))          # (N, Hi, Wi, 2_dc, Cout)
    up = jnp.stack(dr_rows, axis=3)                         # (N, Hi, Wi, 2_dr, 2_dc, Cout)
    up = jnp.transpose(up, (0, 1, 3, 2, 4, 5)).reshape(n, 2 * hi, 2 * wi, cout)
    return up


def batchnorm_nhwc(y, gamma, beta):
    """Training-mode BatchNorm2d (batch statistics, eps=1e-5), two-pass tiled kernels."""
    n, h, w, c = y.shape
    m = n * h * w
    y2 = y.reshape(m, c)
    tm = _row_tile(m, _EW_ROWS)
    s, q = pl.pallas_call(
        functools.partial(_bn_stats_kernel, rows_total=m, tm=tm),
        out_shape=(jax.ShapeDtypeStruct((1, c), jnp.float32),
                   jax.ShapeDtypeStruct((1, c), jnp.float32)),
        grid=(pl.cdiv(m, tm),),
        in_specs=[pl.BlockSpec((tm, c), lambda i: (i, 0))],
        out_specs=(pl.BlockSpec((1, c), lambda i: (0, 0)),
                   pl.BlockSpec((1, c), lambda i: (0, 0))),
        compiler_params=_compiler_params(("arbitrary",)),
    )(y2)
    mean = s / m
    var = jnp.maximum(q / m - mean * mean, 0.0)
    scale = gamma.reshape(1, c) * jax.lax.rsqrt(var + 1e-5)
    shift = beta.reshape(1, c) - mean * scale
    out = pl.pallas_call(
        _scale_shift_kernel,
        out_shape=jax.ShapeDtypeStruct((m, c), jnp.float32),
        grid=(pl.cdiv(m, tm),),
        in_specs=[pl.BlockSpec((tm, c), lambda i: (i, 0)),
                  pl.BlockSpec((1, c), lambda i: (0, 0)),
                  pl.BlockSpec((1, c), lambda i: (0, 0))],
        out_specs=pl.BlockSpec((tm, c), lambda i: (i, 0)),
        compiler_params=_compiler_params(("parallel",)),
    )(y2, scale, shift)
    return out.reshape(n, h, w, c)


def bias_tanh_nhwc(y, bias):
    """Outermost epilogue: tanh(y + bias), row-tiled."""
    n, h, w, c = y.shape
    m = n * h * w
    y2 = y.reshape(m, c)
    tm = _row_tile(m, _EW_ROWS)
    out = pl.pallas_call(
        _bias_tanh_kernel,
        out_shape=jax.ShapeDtypeStruct((m, c), jnp.float32),
        grid=(pl.cdiv(m, tm),),
        in_specs=[pl.BlockSpec((tm, c), lambda i: (i, 0)),
                  pl.BlockSpec((1, c), lambda i: (0, 0))],
        out_specs=pl.BlockSpec((tm, c), lambda i: (i, 0)),
        compiler_params=_compiler_params(("parallel",)),
    )(y2, bias.reshape(1, c))
    return out.reshape(n, h, w, c)


# ------------------------------ U-Net assembly --------------------------------

def _run_block(x, p):
    """One UnetSkipConnectionBlock in NHWC. Recurses through p['submodule']."""
    kind = p['kind']
    d = conv_down_nhwc(x, p['w_down'], leaky=(kind != 'outermost'))
    if kind == 'middle':
        d = batchnorm_nhwc(d, p['dn_gamma'], p['dn_beta'])
    mid = d if kind == 'innermost' else _run_block(d, p['submodule'])
    up = conv_up_nhwc(mid, p['w_up'])
    if kind == 'outermost':
        return bias_tanh_nhwc(up, p['b_up'])
    up = batchnorm_nhwc(up, p['up_gamma'], p['up_beta'])
    return jnp.concatenate([x, up], axis=-1)                # skip connection (channel/lane axis)


def unet_generator_forward(x_nchw, params):
    """x: (N, input_nc, H, W) NCHW f32 -> (N, output_nc, H, W) NCHW f32."""
    x = jnp.transpose(x_nchw, (0, 2, 3, 1))                 # NCHW -> NHWC once
    y = _run_block(x, params)
    return jnp.transpose(y, (0, 3, 1, 2))                   # back to NCHW (PyTorch layout)


def _init_block_params(key, kind, outer_nc, inner_nc, input_nc, submodule=None):
    ks = jax.random.split(key, 8)
    p = {'kind': kind,
         'w_down': 0.1 * jax.random.normal(ks[0], (inner_nc, input_nc, 4, 4), jnp.float32)}
    if kind == 'middle':
        p['dn_gamma'] = 1.0 + 0.1 * jax.random.normal(ks[1], (inner_nc,), jnp.float32)
        p['dn_beta'] = 0.1 * jax.random.normal(ks[2], (inner_nc,), jnp.float32)
    up_in = inner_nc if kind == 'innermost' else inner_nc * 2
    p['w_up'] = 0.1 * jax.random.normal(ks[3], (up_in, outer_nc, 4, 4), jnp.float32)
    if kind == 'outermost':
        p['b_up'] = 0.1 * jax.random.normal(ks[4], (outer_nc,), jnp.float32)
    else:
        p['up_gamma'] = 1.0 + 0.1 * jax.random.normal(ks[5], (outer_nc,), jnp.float32)
        p['up_beta'] = 0.1 * jax.random.normal(ks[6], (outer_nc,), jnp.float32)
    if submodule is not None:
        p['submodule'] = submodule
    return p


def build_unet_params(key, input_nc, output_nc, num_downs, ngf):
    """Mirrors the UnetGenerator constructor (innermost -> middles -> outermost)."""
    keys = iter(jax.random.split(key, num_downs + 2))
    blk = _init_block_params(next(keys), 'innermost', ngf * 8, ngf * 8, ngf * 8)
    for _ in range(num_downs - 5):
        blk = _init_block_params(next(keys), 'middle', ngf * 8, ngf * 8, ngf * 8, blk)
    blk = _init_block_params(next(keys), 'middle', ngf * 4, ngf * 8, ngf * 4, blk)
    blk = _init_block_params(next(keys), 'middle', ngf * 2, ngf * 4, ngf * 2, blk)
    blk = _init_block_params(next(keys), 'middle', ngf, ngf * 2, ngf, blk)
    blk = _init_block_params(next(keys), 'outermost', output_nc, ngf, input_nc, blk)
    return blk


# --------------------------- numpy reference (sanity) --------------------------

def _np_bf16(x):
    """Round-to-nearest bf16 then back to f32 (matches the kernel's MXU input rounding)."""
    return np.asarray(jnp.asarray(np.asarray(x, np.float32), jnp.bfloat16).astype(jnp.float32))


def _ref_conv2d(x, w, s=2, p=1):
    n, _, h, wd = x.shape
    cout, _, k, _ = w.shape
    ho = (h + 2 * p - k) // s + 1
    wo = (wd + 2 * p - k) // s + 1
    xp = np.pad(x, ((0, 0), (0, 0), (p, p), (p, p)))
    out = np.zeros((n, cout, ho, wo), np.float32)
    for i in range(ho):
        for j in range(wo):
            patch = xp[:, :, i * s:i * s + k, j * s:j * s + k]
            out[:, :, i, j] = np.einsum('ncij,ocij->no', patch, w)
    return out


def _ref_convT2d(x, w, s=2, p=1):
    n, _, h, wd = x.shape
    _, cout, k, _ = w.shape
    hf, wf = (h - 1) * s + k, (wd - 1) * s + k
    out = np.zeros((n, cout, hf, wf), np.float32)
    for i in range(h):
        for j in range(wd):
            out[:, :, i * s:i * s + k, j * s:j * s + k] += np.einsum(
                'nc,coij->noij', x[:, :, i, j], w)
    return out[:, :, p:hf - p, p:wf - p]


def _ref_bn(x, gamma, beta):
    mean = x.mean(axis=(0, 2, 3), keepdims=True)
    var = x.var(axis=(0, 2, 3), keepdims=True)
    xn = (x - mean) / np.sqrt(var + 1e-5)
    return (xn * np.asarray(gamma, np.float32).reshape(1, -1, 1, 1)
            + np.asarray(beta, np.float32).reshape(1, -1, 1, 1))


def _ref_block(x, p):
    kind = p['kind']
    h = x if kind == 'outermost' else np.where(x >= 0, x, np.float32(0.2) * x)
    d = _ref_conv2d(_np_bf16(h), _np_bf16(p['w_down']))
    if kind == 'middle':
        d = _ref_bn(d, p['dn_gamma'], p['dn_beta'])
    mid = d if kind == 'innermost' else _ref_block(d, p['submodule'])
    u = _ref_convT2d(_np_bf16(np.maximum(mid, 0.0)), _np_bf16(p['w_up']))
    if kind == 'outermost':
        return np.tanh(u + np.asarray(p['b_up'], np.float32).reshape(1, -1, 1, 1))
    u = _ref_bn(u, p['up_gamma'], p['up_beta'])
    return np.concatenate([x, u], axis=1)


# ----------------------------------- main --------------------------------------

if __name__ == "__main__":
    # Small UnetGenerator: input_nc=3, output_nc=3, num_downs=5, ngf=8, 32x32 input.
    N, input_nc, output_nc, ngf, num_downs, H, W = 2, 3, 3, 8, 5, 32, 32
    key = jax.random.PRNGKey(0)
    k_params, k_x = jax.random.split(key)
    params = build_unet_params(k_params, input_nc, output_nc, num_downs, ngf)
    x = jax.random.normal(k_x, (N, input_nc, H, W), jnp.float32)

    fwd = jax.jit(lambda inp: unet_generator_forward(inp, params))
    out = jax.block_until_ready(fwd(x))

    assert out.shape == (N, output_nc, H, W)
    ref = _ref_block(np.asarray(x), params)
    np.testing.assert_allclose(np.asarray(out), ref, rtol=2e-2, atol=2e-2)

    print("KERNEL_OK")
</pallas_src>

<mosaic_0001>
module attributes {stable_mosaic.version = 11 : i64} {
  func.func @_matmul_bf16_kernel(%arg0: i32, %arg1: memref<512x48xbf16, #tpu.memory_space<vmem>>, %arg2: memref<48x128xbf16, #tpu.memory_space<vmem>>, %arg3: memref<512x128xf32, #tpu.memory_space<vmem>>) attributes {dimension_semantics = [#tpu.dimension_semantics<parallel>], iteration_bounds = array<i64: 1>, scalar_prefetch = 0 : i64, scratch_operands = 0 : i64, tpu.core_type = #tpu.core_type<tc>, window_params = [{transform_indices = @transform_0, window_bounds = array<i64: 512, 48>}, {pipeline_mode = #tpu.pipeline_mode<synchronous>, transform_indices = @transform_1, window_bounds = array<i64: 48, 128>}, {transform_indices = @transform_2, window_bounds = array<i64: 512, 128>}]} {
    %c0 = arith.constant 0 : index
    %c0_0 = arith.constant 0 : index
    %0 = vector.load %arg1[%c0, %c0_0] : memref<512x48xbf16, #tpu.memory_space<vmem>>, vector<512x48xbf16>
    %c0_1 = arith.constant 0 : index
    %c0_2 = arith.constant 0 : index
    %1 = vector.load %arg2[%c0_1, %c0_2] : memref<48x128xbf16, #tpu.memory_space<vmem>>, vector<48x128xbf16>
    %cst = arith.constant dense<0.000000e+00> : vector<512x128xf32>
    %2 = tpu.matmul %0, %1, %cst {dimension_numbers = #tpu.dot_dimension_numbers<[1], [0], [0], [1], [0, 0, 1, 1], [], []>} : vector<512x48xbf16>, vector<48x128xbf16>, vector<512x128xf32> -> vector<512x128xf32>
    %c0_3 = arith.constant 0 : index
    %c0_4 = arith.constant 0 : index
    %3 = vector.load %arg3[%c0_3, %c0_4] : memref<512x128xf32, #tpu.memory_space<vmem>>, vector<512x128xf32>
    tpu.vector_store %arg3[%c0_3, %c0_4], %2 {strides = array<i32>} : memref<512x128xf32, #tpu.memory_space<vmem>>, vector<512x128xf32>,
    return
  }
  func.func @transform_0(%arg0: i32) -> (i32, i32) {
    %c0_i32 = arith.constant 0 : i32
    %c0_i32_0 = arith.constant 0 : i32
    return %arg0, %c0_i32 : i32, i32
  }
  func.func @transform_1(%arg0: i32) -> (i32, i32) {
    %c0_i32 = arith.constant 0 : i32
    %c0_i32_0 = arith.constant 0 : i32
    %c0_i32_1 = arith.constant 0 : i32
    return %c0_i32, %c0_i32_0 : i32, i32
  }
  func.func @transform_2(%arg0: i32) -> (i32, i32) {
    %c0_i32 = arith.constant 0 : i32
    %c0_i32_0 = arith.constant 0 : i32
    return %arg0, %c0_i32 : i32, i32
  }
}

module attributes {stable_mosaic.version = 11 : i64} {
  func.func @_matmul_bf16_kernel(%arg0: i32, %arg1: memref<128x128xbf16, #tpu.memory_space<vmem>>, %arg2: memref<128x128xbf16, #tpu.memory_space<vmem>>, %arg3: memref<128x128xf32, #tpu.memory_space<vmem>>) attributes {dimension_semantics = [#tpu.dimension_semantics<parallel>], iteration_bounds = array<i64: 1>, scalar_prefetch = 0 : i64, scratch_operands = 0 : i64, tpu.core_type = #tpu.core_type<tc>, window_params = [{transform_indices = @transform_0, window_bounds = array<i64: 128, 128>}, {pipeline_mode = #tpu.pipeline_mode<synchronous>, transform_indices = @transform_1, window_bounds = array<i64: 128, 128>}, {transform_indices = @transform_2, window_bounds = array<i64: 128, 128>}]} {
    %c0 = arith.constant 0 : index
    %c0_0 = arith.constant 0 : index
    %0 = vector.load %arg1[%c0, %c0_0] : memref<128x128xbf16, #tpu.memory_space<vmem>>, vector<128x128xbf16>
    %c0_1 = arith.constant 0 : index
    %c0_2 = arith.constant 0 : index
    %1 = vector.load %arg2[%c0_1, %c0_2] : memref<128x128xbf16, #tpu.memory_space<vmem>>, vector<128x128xbf16>
    %cst = arith.constant dense<0.000000e+00> : vector<128x128xf32>
    %2 = tpu.matmul %0, %1, %cst {dimension_numbers = #tpu.dot_dimension_numbers<[1], [0], [0], [1], [0, 0, 1, 1], [], []>} : vector<128x128xbf16>, vector<128x128xbf16>, vector<128x128xf32> -> vector<128x128xf32>
    %c0_3 = arith.constant 0 : index
    %c0_4 = arith.constant 0 : index
    %3 = vector.load %arg3[%c0_3, %c0_4] : memref<128x128xf32, #tpu.memory_space<vmem>>, vector<128x128xf32>
    tpu.vector_store %arg3[%c0_3, %c0_4], %2 {strides = array<i32>} : memref<128x128xf32, #tpu.memory_space<vmem>>, vector<128x128xf32>,
    return
  }
  func.func @transform_0(%arg0: i32) -> (i32, i32) {
    %c0_i32 = arith.constant 0 : i32
    %c0_i32_0 = arith.constant 0 : i32
    return %arg0, %c0_i32 : i32, i32
  }
  func.func @transform_1(%arg0: i32) -> (i32, i32) {
    %c0_i32 = arith.constant 0 : i32
    %c0_i32_0 = arith.constant 0 : i32
    %c0_i32_1 = arith.constant 0 : i32
    return %c0_i32, %c0_i32_0 : i32, i32
  }
  func.func @transform_2(%arg0: i32) -> (i32, i32) {
    %c0_i32 = arith.constant 0 : i32
    %c0_i32_0 = arith.constant 0 : i32
    return %arg0, %c0_i32 : i32, i32
  }
}

module attributes {stable_mosaic.version = 11 : i64} {
  func.func @_bn_stats_kernel(%arg0: i32, %arg1: memref<128x16xf32, #tpu.memory_space<vmem>>, %arg2: memref<1x16xf32, #tpu.memory_space<vmem>>, %arg3: memref<1x16xf32, #tpu.memory_space<vmem>>) attributes {dimension_semantics = [#tpu.dimension_semantics<arbitrary>], iteration_bounds = array<i64: 1>, scalar_prefetch = 0 : i64, scratch_operands = 0 : i64, tpu.core_type = #tpu.core_type<tc>, window_params = [{transform_indices = @transform_0, window_bounds = array<i64: 128, 16>}, {pipeline_mode = #tpu.pipeline_mode<synchronous>, transform_indices = @transform_1, window_bounds = array<i64: 1, 16>}, {pipeline_mode = #tpu.pipeline_mode<synchronous>, transform_indices = @transform_2, window_bounds = array<i64: 1, 16>}]} {
    %c0_i32 = arith.constant 0 : i32
    %0 = arith.cmpi eq, %arg0, %c0_i32 : i32
    %1 = arith.extui %0 : i1 to i32
    %c0_i32_0 = arith.constant 0 : i32
    %2 = arith.cmpi ne, %1, %c0_i32_0 : i32
    scf.if %2 {
      %cst_13 = arith.constant 0.000000e+00 : f32
      %23 = vector.broadcast %cst_13 : f32 to vector<1x16xf32>
      %c0_14 = arith.constant 0 : index
      %c0_15 = arith.constant 0 : index
      %24 = vector.load %arg2[%c0_14, %c0_15] : memref<1x16xf32, #tpu.memory_space<vmem>>, vector<1x16xf32>
      tpu.vector_store %arg2[%c0_14, %c0_15], %23 {strides = array<i32>} : memref<1x16xf32, #tpu.memory_space<vmem>>, vector<1x16xf32>,
      %cst_16 = arith.constant 0.000000e+00 : f32
      %25 = vector.broadcast %cst_16 : f32 to vector<1x16xf32>
      %c0_17 = arith.constant 0 : index
      %c0_18 = arith.constant 0 : index
      %26 = vector.load %arg3[%c0_17, %c0_18] : memref<1x16xf32, #tpu.memory_space<vmem>>, vector<1x16xf32>
      tpu.vector_store %arg3[%c0_17, %c0_18], %25 {strides = array<i32>} : memref<1x16xf32, #tpu.memory_space<vmem>>, vector<1x16xf32>,
    } else {
    }
    %c0 = arith.constant 0 : index
    %c0_1 = arith.constant 0 : index
    %3 = vector.load %arg1[%c0, %c0_1] : memref<128x16xf32, #tpu.memory_space<vmem>>, vector<128x16xf32>
    %4 = tpu.iota {dimensions = array<i32: 0>} : vector<128x16xi32>
    %c128_i32 = arith.constant 128 : i32
    %5 = arith.muli %arg0, %c128_i32 : i32
    %6 = vector.broadcast %5 : i32 to vector<128x16xi32>
    %7 = arith.addi %4, %6 : vector<128x16xi32>
    %c128_i32_2 = arith.constant 128 : i32
    %8 = vector.broadcast %c128_i32_2 : i32 to vector<128x16xi32>
    %9 = arith.cmpi slt, %7, %8 : vector<128x16xi32>
    %cst = arith.constant 0.000000e+00 : f32
    %10 = vector.broadcast %cst : f32 to vector<128x16xf32>
    %11 = arith.select %9, %3, %10 : vector<128x16xi1>, vector<128x16xf32>
    %c0_3 = arith.constant 0 : index
    %c0_4 = arith.constant 0 : index
    %12 = vector.load %arg2[%c0_3, %c0_4] : memref<1x16xf32, #tpu.memory_space<vmem>>, vector<1x16xf32>
    %cst_5 = arith.constant dense<0.000000e+00> : vector<16xf32>
    %13 = vector.multi_reduction <add>, %11, %cst_5 [0] : vector<128x16xf32> to vector<16xf32>
    %14 = vector.shape_cast %13 : vector<16xf32> to vector<1x16xf32>
    %15 = arith.addf %12, %14 : vector<1x16xf32>
    %c0_6 = arith.constant 0 : index
    %c0_7 = arith.constant 0 : index
    %16 = vector.load %arg2[%c0_6, %c0_7] : memref<1x16xf32, #tpu.memory_space<vmem>>, vector<1x16xf32>
    tpu.vector_store %arg2[%c0_6, %c0_7], %15 {strides = array<i32>} : memref<1x16xf32, #tpu.memory_space<vmem>>, vector<1x16xf32>,
    %c0_8 = arith.constant 0 : index
    %c0_9 = arith.constant 0 : index
    %17 = vector.load %arg3[%c0_8, %c0_9] : memref<1x16xf32, #tpu.memory_space<vmem>>, vector<1x16xf32>
    %18 = arith.mulf %11, %11 : vector<128x16xf32>
    %cst_10 = arith.constant dense<0.000000e+00> : vector<16xf32>
    %19 = vector.multi_reduction <add>, %18, %cst_10 [0] : vector<128x16xf32> to vector<16xf32>
    %20 = vector.shape_cast %19 : vector<16xf32> to vector<1x16xf32>
    %21 = arith.addf %17, %20 : vector<1x16xf32>
    %c0_11 = arith.constant 0 : index
    %c0_12 = arith.constant 0 : index
    %22 = vector.load %arg3[%c0_11, %c0_12] : memref<1x16xf32, #tpu.memory_space<vmem>>, vector<1x16xf32>
    tpu.vector_store %arg3[%c0_11, %c0_12], %21 {strides = array<i32>} : memref<1x16xf32, #tpu.memory_space<vmem>>, vector<1x16xf32>,
    return
  }
  func.func @transform_0(%arg0: i32) -> (i32, i32) {
    %c0_i32 = arith.constant 0 : i32
    %c0_i32_0 = arith.constant 0 : i32
    return %arg0, %c0_i32 : i32, i32
  }
  func.func @transform_1(%arg0: i32) -> (i32, i32) {
    %c0_i32 = arith.constant 0 : i32
    %c0_i32_0 = arith.constant 0 : i32
    %c0_i32_1 = arith.constant 0 : i32
    return %c0_i32, %c0_i32_0 : i32, i32
  }
  func.func @transform_2(%arg0: i32) -> (i32, i32) {
    %c0_i32 = arith.constant 0 : i32
    %c0_i32_0 = arith.constant 0 : i32
    %c0_i32_1 = arith.constant 0 : i32
    return %c0_i32, %c0_i32_0 : i32, i32
  }
}

module attributes {stable_mosaic.version = 11 : i64} {
  func.func @_scale_shift_kernel(%arg0: i32, %arg1: memref<128x16xf32, #tpu.memory_space<vmem>>, %arg2: memref<1x16xf32, #tpu.memory_space<vmem>>, %arg3: memref<1x16xf32, #tpu.memory_space<vmem>>, %arg4: memref<128x16xf32, #tpu.memory_space<vmem>>) attributes {dimension_semantics = [#tpu.dimension_semantics<parallel>], iteration_bounds = array<i64: 1>, scalar_prefetch = 0 : i64, scratch_operands = 0 : i64, tpu.core_type = #tpu.core_type<tc>, window_params = [{transform_indices = @transform_0, window_bounds = array<i64: 128, 16>}, {pipeline_mode = #tpu.pipeline_mode<synchronous>, transform_indices = @transform_1, window_bounds = array<i64: 1, 16>}, {pipeline_mode = #tpu.pipeline_mode<synchronous>, transform_indices = @transform_2, window_bounds = array<i64: 1, 16>}, {transform_indices = @transform_3, window_bounds = array<i64: 128, 16>}]} {
    %c0 = arith.constant 0 : index
    %c0_0 = arith.constant 0 : index
    %0 = vector.load %arg1[%c0, %c0_0] : memref<128x16xf32, #tpu.memory_space<vmem>>, vector<128x16xf32>
    %c0_1 = arith.constant 0 : index
    %c0_2 = arith.constant 0 : index
    %1 = vector.load %arg2[%c0_1, %c0_2] : memref<1x16xf32, #tpu.memory_space<vmem>>, vector<1x16xf32>
    %2 = vector.broadcast %1 : vector<1x16xf32> to vector<128x16xf32>
    %3 = arith.mulf %0, %2 : vector<128x16xf32>
    %c0_3 = arith.constant 0 : index
    %c0_4 = arith.constant 0 : index
    %4 = vector.load %arg3[%c0_3, %c0_4] : memref<1x16xf32, #tpu.memory_space<vmem>>, vector<1x16xf32>
    %5 = vector.broadcast %4 : vector<1x16xf32> to vector<128x16xf32>
    %6 = arith.addf %3, %5 : vector<128x16xf32>
    %c0_5 = arith.constant 0 : index
    %c0_6 = arith.constant 0 : index
    %7 = vector.load %arg4[%c0_5, %c0_6] : memref<128x16xf32, #tpu.memory_space<vmem>>, vector<128x16xf32>
    tpu.vector_store %arg4[%c0_5, %c0_6], %6 {strides = array<i32>} : memref<128x16xf32, #tpu.memory_space<vmem>>, vector<128x16xf32>,
    return
  }
  func.func @transform_0(%arg0: i32) -> (i32, i32) {
    %c0_i32 = arith.constant 0 : i32
    %c0_i32_0 = arith.constant 0 : i32
    return %arg0, %c0_i32 : i32, i32
  }
  func.func @transform_1(%arg0: i32) -> (i32, i32) {
    %c0_i32 = arith.constant 0 : i32
    %c0_i32_0 = arith.constant 0 : i32
    %c0_i32_1 = arith.constant 0 : i32
    return %c0_i32, %c0_i32_0 : i32, i32
  }
  func.func @transform_2(%arg0: i32) -> (i32, i32) {
    %c0_i32 = arith.constant 0 : i32
    %c0_i32_0 = arith.constant 0 : i32
    %c0_i32_1 = arith.constant 0 : i32
    return %c0_i32, %c0_i32_0 : i32, i32
  }
  func.func @transform_3(%arg0: i32) -> (i32, i32) {
    %c0_i32 = arith.constant 0 : i32
    %c0_i32_0 = arith.constant 0 : i32
    return %arg0, %c0_i32 : i32, i32
  }
}

module attributes {stable_mosaic.version = 11 : i64} {
  func.func @_scale_shift_kernel(%arg0: i32, %arg1: memref<32x32xf32, #tpu.memory_space<vmem>>, %arg2: memref<1x32xf32, #tpu.memory_space<vmem>>, %arg3: memref<1x32xf32, #tpu.memory_space<vmem>>, %arg4: memref<32x32xf32, #tpu.memory_space<vmem>>) attributes {dimension_semantics = [#tpu.dimension_semantics<parallel>], iteration_bounds = array<i64: 1>, scalar_prefetch = 0 : i64, scratch_operands = 0 : i64, tpu.core_type = #tpu.core_type<tc>, window_params = [{transform_indices = @transform_0, window_bounds = array<i64: 32, 32>}, {pipeline_mode = #tpu.pipeline_mode<synchronous>, transform_indices = @transform_1, window_bounds = array<i64: 1, 32>}, {pipeline_mode = #tpu.pipeline_mode<synchronous>, transform_indices = @transform_2, window_bounds = array<i64: 1, 32>}, {transform_indices = @transform_3, window_bounds = array<i64: 32, 32>}]} {
    %c0 = arith.constant 0 : index
    %c0_0 = arith.constant 0 : index
    %0 = vector.load %arg1[%c0, %c0_0] : memref<32x32xf32, #tpu.memory_space<vmem>>, vector<32x32xf32>
    %c0_1 = arith.constant 0 : index
    %c0_2 = arith.constant 0 : index
    %1 = vector.load %arg2[%c0_1, %c0_2] : memref<1x32xf32, #tpu.memory_space<vmem>>, vector<1x32xf32>
    %2 = vector.broadcast %1 : vector<1x32xf32> to vector<32x32xf32>
    %3 = arith.mulf %0, %2 : vector<32x32xf32>
    %c0_3 = arith.constant 0 : index
    %c0_4 = arith.constant 0 : index
    %4 = vector.load %arg3[%c0_3, %c0_4] : memref<1x32xf32, #tpu.memory_space<vmem>>, vector<1x32xf32>
    %5 = vector.broadcast %4 : vector<1x32xf32> to vector<32x32xf32>
    %6 = arith.addf %3, %5 : vector<32x32xf32>
    %c0_5 = arith.constant 0 : index
    %c0_6 = arith.constant 0 : index
    %7 = vector.load %arg4[%c0_5, %c0_6] : memref<32x32xf32, #tpu.memory_space<vmem>>, vector<32x32xf32>
    tpu.vector_store %arg4[%c0_5, %c0_6], %6 {strides = array<i32>} : memref<32x32xf32, #tpu.memory_space<vmem>>, vector<32x32xf32>,
    return
  }
  func.func @transform_0(%arg0: i32) -> (i32, i32) {
    %c0_i32 = arith.constant 0 : i32
    %c0_i32_0 = arith.constant 0 : i32
    return %arg0, %c0_i32 : i32, i32
  }
  func.func @transform_1(%arg0: i32) -> (i32, i32) {
    %c0_i32 = arith.constant 0 : i32
    %c0_i32_0 = arith.constant 0 : i32
    %c0_i32_1 = arith.constant 0 : i32
    return %c0_i32, %c0_i32_0 : i32, i32
  }
  func.func @transform_2(%arg0: i32) -> (i32, i32) {
    %c0_i32 = arith.constant 0 : i32
    %c0_i32_0 = arith.constant 0 : i32
    %c0_i32_1 = arith.constant 0 : i32
    return %c0_i32, %c0_i32_0 : i32, i32
  }
  func.func @transform_3(%arg0: i32) -> (i32, i32) {
    %c0_i32 = arith.constant 0 : i32
    %c0_i32_0 = arith.constant 0 : i32
    return %arg0, %c0_i32 : i32, i32
  }
}

module attributes {stable_mosaic.version = 11 : i64} {
  func.func @_bn_stats_kernel(%arg0: i32, %arg1: memref<32x32xf32, #tpu.memory_space<vmem>>, %arg2: memref<1x32xf32, #tpu.memory_space<vmem>>, %arg3: memref<1x32xf32, #tpu.memory_space<vmem>>) attributes {dimension_semantics = [#tpu.dimension_semantics<arbitrary>], iteration_bounds = array<i64: 1>, scalar_prefetch = 0 : i64, scratch_operands = 0 : i64, tpu.core_type = #tpu.core_type<tc>, window_params = [{transform_indices = @transform_0, window_bounds = array<i64: 32, 32>}, {pipeline_mode = #tpu.pipeline_mode<synchronous>, transform_indices = @transform_1, window_bounds = array<i64: 1, 32>}, {pipeline_mode = #tpu.pipeline_mode<synchronous>, transform_indices = @transform_2, window_bounds = array<i64: 1, 32>}]} {
    %c0_i32 = arith.constant 0 : i32
    %0 = arith.cmpi eq, %arg0, %c0_i32 : i32
    %1 = arith.extui %0 : i1 to i32
    %c0_i32_0 = arith.constant 0 : i32
    %2 = arith.cmpi ne, %1, %c0_i32_0 : i32
    scf.if %2 {
      %cst_13 = arith.constant 0.000000e+00 : f32
      %23 = vector.broadcast %cst_13 : f32 to vector<1x32xf32>
      %c0_14 = arith.constant 0 : index
      %c0_15 = arith.constant 0 : index
      %24 = vector.load %arg2[%c0_14, %c0_15] : memref<1x32xf32, #tpu.memory_space<vmem>>, vector<1x32xf32>
      tpu.vector_store %arg2[%c0_14, %c0_15], %23 {strides = array<i32>} : memref<1x32xf32, #tpu.memory_space<vmem>>, vector<1x32xf32>,
      %cst_16 = arith.constant 0.000000e+00 : f32
      %25 = vector.broadcast %cst_16 : f32 to vector<1x32xf32>
      %c0_17 = arith.constant 0 : index
      %c0_18 = arith.constant 0 : index
      %26 = vector.load %arg3[%c0_17, %c0_18] : memref<1x32xf32, #tpu.memory_space<vmem>>, vector<1x32xf32>
      tpu.vector_store %arg3[%c0_17, %c0_18], %25 {strides = array<i32>} : memref<1x32xf32, #tpu.memory_space<vmem>>, vector<1x32xf32>,
    } else {
    }
    %c0 = arith.constant 0 : index
    %c0_1 = arith.constant 0 : index
    %3 = vector.load %arg1[%c0, %c0_1] : memref<32x32xf32, #tpu.memory_space<vmem>>, vector<32x32xf32>
    %4 = tpu.iota {dimensions = array<i32: 0>} : vector<32x32xi32>
    %c32_i32 = arith.constant 32 : i32
    %5 = arith.muli %arg0, %c32_i32 : i32
    %6 = vector.broadcast %5 : i32 to vector<32x32xi32>
    %7 = arith.addi %4, %6 : vector<32x32xi32>
    %c32_i32_2 = arith.constant 32 : i32
    %8 = vector.broadcast %c32_i32_2 : i32 to vector<32x32xi32>
    %9 = arith.cmpi slt, %7, %8 : vector<32x32xi32>
    %cst = arith.constant 0.000000e+00 : f32
    %10 = vector.broadcast %cst : f32 to vector<32x32xf32>
    %11 = arith.select %9, %3, %10 : vector<32x32xi1>, vector<32x32xf32>
    %c0_3 = arith.constant 0 : index
    %c0_4 = arith.constant 0 : index
    %12 = vector.load %arg2[%c0_3, %c0_4] : memref<1x32xf32, #tpu.memory_space<vmem>>, vector<1x32xf32>
    %cst_5 = arith.constant dense<0.000000e+00> : vector<32xf32>
    %13 = vector.multi_reduction <add>, %11, %cst_5 [0] : vector<32x32xf32> to vector<32xf32>
    %14 = vector.shape_cast %13 : vector<32xf32> to vector<1x32xf32>
    %15 = arith.addf %12, %14 : vector<1x32xf32>
    %c0_6 = arith.constant 0 : index
    %c0_7 = arith.constant 0 : index
    %16 = vector.load %arg2[%c0_6, %c0_7] : memref<1x32xf32, #tpu.memory_space<vmem>>, vector<1x32xf32>
    tpu.vector_store %arg2[%c0_6, %c0_7], %15 {strides = array<i32>} : memref<1x32xf32, #tpu.memory_space<vmem>>, vector<1x32xf32>,
    %c0_8 = arith.constant 0 : index
    %c0_9 = arith.constant 0 : index
    %17 = vector.load %arg3[%c0_8, %c0_9] : memref<1x32xf32, #tpu.memory_space<vmem>>, vector<1x32xf32>
    %18 = arith.mulf %11, %11 : vector<32x32xf32>
    %cst_10 = arith.constant dense<0.000000e+00> : vector<32xf32>
    %19 = vector.multi_reduction <add>, %18, %cst_10 [0] : vector<32x32xf32> to vector<32xf32>
    %20 = vector.shape_cast %19 : vector<32xf32> to vector<1x32xf32>
    %21 = arith.addf %17, %20 : vector<1x32xf32>
    %c0_11 = arith.constant 0 : index
    %c0_12 = arith.constant 0 : index
    %22 = vector.load %arg3[%c0_11, %c0_12] : memref<1x32xf32, #tpu.memory_space<vmem>>, vector<1x32xf32>
    tpu.vector_store %arg3[%c0_11, %c0_12], %21 {strides = array<i32>} : memref<1x32xf32, #tpu.memory_space<vmem>>, vector<1x32xf32>,
    return
  }
  func.func @transform_0(%arg0: i32) -> (i32, i32) {
    %c0_i32 = arith.constant 0 : i32
    %c0_i32_0 = arith.constant 0 : i32
    return %arg0, %c0_i32 : i32, i32
  }
  func.func @transform_1(%arg0: i32) -> (i32, i32) {
    %c0_i32 = arith.constant 0 : i32
    %c0_i32_0 = arith.constant 0 : i32
    %c0_i32_1 = arith.constant 0 : i32
    return %c0_i32, %c0_i32_0 : i32, i32
  }
  func.func @transform_2(%arg0: i32) -> (i32, i32) {
    %c0_i32 = arith.constant 0 : i32
    %c0_i32_0 = arith.constant 0 : i32
    %c0_i32_1 = arith.constant 0 : i32
    return %c0_i32, %c0_i32_0 : i32, i32
  }
}

module attributes {stable_mosaic.version = 11 : i64} {
  func.func @_matmul_bf16_kernel(%arg0: i32, %arg1: memref<32x256xbf16, #tpu.memory_space<vmem>>, %arg2: memref<256x128xbf16, #tpu.memory_space<vmem>>, %arg3: memref<32x128xf32, #tpu.memory_space<vmem>>) attributes {dimension_semantics = [#tpu.dimension_semantics<parallel>], iteration_bounds = array<i64: 1>, scalar_prefetch = 0 : i64, scratch_operands = 0 : i64, tpu.core_type = #tpu.core_type<tc>, window_params = [{transform_indices = @transform_0, window_bounds = array<i64: 32, 256>}, {pipeline_mode = #tpu.pipeline_mode<synchronous>, transform_indices = @transform_1, window_bounds = array<i64: 256, 128>}, {transform_indices = @transform_2, window_bounds = array<i64: 32, 128>}]} {
    %c0 = arith.constant 0 : index
    %c0_0 = arith.constant 0 : index
    %0 = vector.load %arg1[%c0, %c0_0] : memref<32x256xbf16, #tpu.memory_space<vmem>>, vector<32x256xbf16>
    %c0_1 = arith.constant 0 : index
    %c0_2 = arith.constant 0 : index
    %1 = vector.load %arg2[%c0_1, %c0_2] : memref<256x128xbf16, #tpu.memory_space<vmem>>, vector<256x128xbf16>
    %cst = arith.constant dense<0.000000e+00> : vector<32x128xf32>
    %2 = tpu.matmul %0, %1, %cst {dimension_numbers = #tpu.dot_dimension_numbers<[1], [0], [0], [1], [0, 0, 1, 1], [], []>} : vector<32x256xbf16>, vector<256x128xbf16>, vector<32x128xf32> -> vector<32x128xf32>
    %c0_3 = arith.constant 0 : index
    %c0_4 = arith.constant 0 : index
    %3 = vector.load %arg3[%c0_3, %c0_4] : memref<32x128xf32, #tpu.memory_space<vmem>>, vector<32x128xf32>
    tpu.vector_store %arg3[%c0_3, %c0_4], %2 {strides = array<i32>} : memref<32x128xf32, #tpu.memory_space<vmem>>, vector<32x128xf32>,
    return
  }
  func.func @transform_0(%arg0: i32) -> (i32, i32) {
    %c0_i32 = arith.constant 0 : i32
    %c0_i32_0 = arith.constant 0 : i32
    return %arg0, %c0_i32 : i32, i32
  }
  func.func @transform_1(%arg0: i32) -> (i32, i32) {
    %c0_i32 = arith.constant 0 : i32
    %c0_i32_0 = arith.constant 0 : i32
    %c0_i32_1 = arith.constant 0 : i32
    return %c0_i32, %c0_i32_0 : i32, i32
  }
  func.func @transform_2(%arg0: i32) -> (i32, i32) {
    %c0_i32 = arith.constant 0 : i32
    %c0_i32_0 = arith.constant 0 : i32
    return %arg0, %c0_i32 : i32, i32
  }
}

module attributes {stable_mosaic.version = 11 : i64} {
  func.func @_matmul_bf16_kernel(%arg0: i32, %arg1: memref<8x512xbf16, #tpu.memory_space<vmem>>, %arg2: memref<512x128xbf16, #tpu.memory_space<vmem>>, %arg3: memref<8x128xf32, #tpu.memory_space<vmem>>) attributes {dimension_semantics = [#tpu.dimension_semantics<parallel>], iteration_bounds = array<i64: 1>, scalar_prefetch = 0 : i64, scratch_operands = 0 : i64, tpu.core_type = #tpu.core_type<tc>, window_params = [{transform_indices = @transform_0, window_bounds = array<i64: 8, 512>}, {pipeline_mode = #tpu.pipeline_mode<synchronous>, transform_indices = @transform_1, window_bounds = array<i64: 512, 128>}, {transform_indices = @transform_2, window_bounds = array<i64: 8, 128>}]} {
    %c0 = arith.constant 0 : index
    %c0_0 = arith.constant 0 : index
    %0 = vector.load %arg1[%c0, %c0_0] : memref<8x512xbf16, #tpu.memory_space<vmem>>, vector<8x512xbf16>
    %c0_1 = arith.constant 0 : index
    %c0_2 = arith.constant 0 : index
    %1 = vector.load %arg2[%c0_1, %c0_2] : memref<512x128xbf16, #tpu.memory_space<vmem>>, vector<512x128xbf16>
    %cst = arith.constant dense<0.000000e+00> : vector<8x128xf32>
    %2 = tpu.matmul %0, %1, %cst {dimension_numbers = #tpu.dot_dimension_numbers<[1], [0], [0], [1], [0, 0, 1, 1], [], []>} : vector<8x512xbf16>, vector<512x128xbf16>, vector<8x128xf32> -> vector<8x128xf32>
    %c0_3 = arith.constant 0 : index
    %c0_4 = arith.constant 0 : index
    %3 = vector.load %arg3[%c0_3, %c0_4] : memref<8x128xf32, #tpu.memory_space<vmem>>, vector<8x128xf32>
    tpu.vector_store %arg3[%c0_3, %c0_4], %2 {strides = array<i32>} : memref<8x128xf32, #tpu.memory_space<vmem>>, vector<8x128xf32>,
    return
  }
  func.func @transform_0(%arg0: i32) -> (i32, i32) {
    %c0_i32 = arith.constant 0 : i32
    %c0_i32_0 = arith.constant 0 : i32
    return %arg0, %c0_i32 : i32, i32
  }
  func.func @transform_1(%arg0: i32) -> (i32, i32) {
    %c0_i32 = arith.constant 0 : i32
    %c0_i32_0 = arith.constant 0 : i32
    %c0_i32_1 = arith.constant 0 : i32
    return %c0_i32, %c0_i32_0 : i32, i32
  }
  func.func @transform_2(%arg0: i32) -> (i32, i32) {
    %c0_i32 = arith.constant 0 : i32
    %c0_i32_0 = arith.constant 0 : i32
    return %arg0, %c0_i32 : i32, i32
  }
}

module attributes {stable_mosaic.version = 11 : i64} {
  func.func @_scale_shift_kernel(%arg0: i32, %arg1: memref<8x64xf32, #tpu.memory_space<vmem>>, %arg2: memref<1x64xf32, #tpu.memory_space<vmem>>, %arg3: memref<1x64xf32, #tpu.memory_space<vmem>>, %arg4: memref<8x64xf32, #tpu.memory_space<vmem>>) attributes {dimension_semantics = [#tpu.dimension_semantics<parallel>], iteration_bounds = array<i64: 1>, scalar_prefetch = 0 : i64, scratch_operands = 0 : i64, tpu.core_type = #tpu.core_type<tc>, window_params = [{transform_indices = @transform_0, window_bounds = array<i64: 8, 64>}, {pipeline_mode = #tpu.pipeline_mode<synchronous>, transform_indices = @transform_1, window_bounds = array<i64: 1, 64>}, {pipeline_mode = #tpu.pipeline_mode<synchronous>, transform_indices = @transform_2, window_bounds = array<i64: 1, 64>}, {transform_indices = @transform_3, window_bounds = array<i64: 8, 64>}]} {
    %c0 = arith.constant 0 : index
    %c0_0 = arith.constant 0 : index
    %0 = vector.load %arg1[%c0, %c0_0] : memref<8x64xf32, #tpu.memory_space<vmem>>, vector<8x64xf32>
    %c0_1 = arith.constant 0 : index
    %c0_2 = arith.constant 0 : index
    %1 = vector.load %arg2[%c0_1, %c0_2] : memref<1x64xf32, #tpu.memory_space<vmem>>, vector<1x64xf32>
    %2 = vector.broadcast %1 : vector<1x64xf32> to vector<8x64xf32>
    %3 = arith.mulf %0, %2 : vector<8x64xf32>
    %c0_3 = arith.constant 0 : index
    %c0_4 = arith.constant 0 : index
    %4 = vector.load %arg3[%c0_3, %c0_4] : memref<1x64xf32, #tpu.memory_space<vmem>>, vector<1x64xf32>
    %5 = vector.broadcast %4 : vector<1x64xf32> to vector<8x64xf32>
    %6 = arith.addf %3, %5 : vector<8x64xf32>
    %c0_5 = arith.constant 0 : index
    %c0_6 = arith.constant 0 : index
    %7 = vector.load %arg4[%c0_5, %c0_6] : memref<8x64xf32, #tpu.memory_space<vmem>>, vector<8x64xf32>
    tpu.vector_store %arg4[%c0_5, %c0_6], %6 {strides = array<i32>} : memref<8x64xf32, #tpu.memory_space<vmem>>, vector<8x64xf32>,
    return
  }
  func.func @transform_0(%arg0: i32) -> (i32, i32) {
    %c0_i32 = arith.constant 0 : i32
    %c0_i32_0 = arith.constant 0 : i32
    return %arg0, %c0_i32 : i32, i32
  }
  func.func @transform_1(%arg0: i32) -> (i32, i32) {
    %c0_i32 = arith.constant 0 : i32
    %c0_i32_0 = arith.constant 0 : i32
    %c0_i32_1 = arith.constant 0 : i32
    return %c0_i32, %c0_i32_0 : i32, i32
  }
  func.func @transform_2(%arg0: i32) -> (i32, i32) {
    %c0_i32 = arith.constant 0 : i32
    %c0_i32_0 = arith.constant 0 : i32
    %c0_i32_1 = arith.constant 0 : i32
    return %c0_i32, %c0_i32_0 : i32, i32
  }
  func.func @transform_3(%arg0: i32) -> (i32, i32) {
    %c0_i32 = arith.constant 0 : i32
    %c0_i32_0 = arith.constant 0 : i32
    return %arg0, %c0_i32 : i32, i32
  }
}

module attributes {stable_mosaic.version = 11 : i64} {
  func.func @_bn_stats_kernel(%arg0: i32, %arg1: memref<8x64xf32, #tpu.memory_space<vmem>>, %arg2: memref<1x64xf32, #tpu.memory_space<vmem>>, %arg3: memref<1x64xf32, #tpu.memory_space<vmem>>) attributes {dimension_semantics = [#tpu.dimension_semantics<arbitrary>], iteration_bounds = array<i64: 1>, scalar_prefetch = 0 : i64, scratch_operands = 0 : i64, tpu.core_type = #tpu.core_type<tc>, window_params = [{transform_indices = @transform_0, window_bounds = array<i64: 8, 64>}, {pipeline_mode = #tpu.pipeline_mode<synchronous>, transform_indices = @transform_1, window_bounds = array<i64: 1, 64>}, {pipeline_mode = #tpu.pipeline_mode<synchronous>, transform_indices = @transform_2, window_bounds = array<i64: 1, 64>}]} {
    %c0_i32 = arith.constant 0 : i32
    %0 = arith.cmpi eq, %arg0, %c0_i32 : i32
    %1 = arith.extui %0 : i1 to i32
    %c0_i32_0 = arith.constant 0 : i32
    %2 = arith.cmpi ne, %1, %c0_i32_0 : i32
    scf.if %2 {
      %cst_13 = arith.constant 0.000000e+00 : f32
      %23 = vector.broadcast %cst_13 : f32 to vector<1x64xf32>
      %c0_14 = arith.constant 0 : index
      %c0_15 = arith.constant 0 : index
      %24 = vector.load %arg2[%c0_14, %c0_15] : memref<1x64xf32, #tpu.memory_space<vmem>>, vector<1x64xf32>
      tpu.vector_store %arg2[%c0_14, %c0_15], %23 {strides = array<i32>} : memref<1x64xf32, #tpu.memory_space<vmem>>, vector<1x64xf32>,
      %cst_16 = arith.constant 0.000000e+00 : f32
      %25 = vector.broadcast %cst_16 : f32 to vector<1x64xf32>
      %c0_17 = arith.constant 0 : index
      %c0_18 = arith.constant 0 : index
      %26 = vector.load %arg3[%c0_17, %c0_18] : memref<1x64xf32, #tpu.memory_space<vmem>>, vector<1x64xf32>
      tpu.vector_store %arg3[%c0_17, %c0_18], %25 {strides = array<i32>} : memref<1x64xf32, #tpu.memory_space<vmem>>, vector<1x64xf32>,
    } else {
    }
    %c0 = arith.constant 0 : index
    %c0_1 = arith.constant 0 : index
    %3 = vector.load %arg1[%c0, %c0_1] : memref<8x64xf32, #tpu.memory_space<vmem>>, vector<8x64xf32>
    %4 = tpu.iota {dimensions = array<i32: 0>} : vector<8x64xi32>
    %c8_i32 = arith.constant 8 : i32
    %5 = arith.muli %arg0, %c8_i32 : i32
    %6 = vector.broadcast %5 : i32 to vector<8x64xi32>
    %7 = arith.addi %4, %6 : vector<8x64xi32>
    %c8_i32_2 = arith.constant 8 : i32
    %8 = vector.broadcast %c8_i32_2 : i32 to vector<8x64xi32>
    %9 = arith.cmpi slt, %7, %8 : vector<8x64xi32>
    %cst = arith.constant 0.000000e+00 : f32
    %10 = vector.broadcast %cst : f32 to vector<8x64xf32>
    %11 = arith.select %9, %3, %10 : vector<8x64xi1>, vector<8x64xf32>
    %c0_3 = arith.constant 0 : index
    %c0_4 = arith.constant 0 : index
    %12 = vector.load %arg2[%c0_3, %c0_4] : memref<1x64xf32, #tpu.memory_space<vmem>>, vector<1x64xf32>
    %cst_5 = arith.constant dense<0.000000e+00> : vector<64xf32>
    %13 = vector.multi_reduction <add>, %11, %cst_5 [0] : vector<8x64xf32> to vector<64xf32>
    %14 = vector.shape_cast %13 : vector<64xf32> to vector<1x64xf32>
    %15 = arith.addf %12, %14 : vector<1x64xf32>
    %c0_6 = arith.constant 0 : index
    %c0_7 = arith.constant 0 : index
    %16 = vector.load %arg2[%c0_6, %c0_7] : memref<1x64xf32, #tpu.memory_space<vmem>>, vector<1x64xf32>
    tpu.vector_store %arg2[%c0_6, %c0_7], %15 {strides = array<i32>} : memref<1x64xf32, #tpu.memory_space<vmem>>, vector<1x64xf32>,
    %c0_8 = arith.constant 0 : index
    %c0_9 = arith.constant 0 : index
    %17 = vector.load %arg3[%c0_8, %c0_9] : memref<1x64xf32, #tpu.memory_space<vmem>>, vector<1x64xf32>
    %18 = arith.mulf %11, %11 : vector<8x64xf32>
    %cst_10 = arith.constant dense<0.000000e+00> : vector<64xf32>
    %19 = vector.multi_reduction <add>, %18, %cst_10 [0] : vector<8x64xf32> to vector<64xf32>
    %20 = vector.shape_cast %19 : vector<64xf32> to vector<1x64xf32>
    %21 = arith.addf %17, %20 : vector<1x64xf32>
    %c0_11 = arith.constant 0 : index
    %c0_12 = arith.constant 0 : index
    %22 = vector.load %arg3[%c0_11, %c0_12] : memref<1x64xf32, #tpu.memory_space<vmem>>, vector<1x64xf32>
    tpu.vector_store %arg3[%c0_11, %c0_12], %21 {strides = array<i32>} : memref<1x64xf32, #tpu.memory_space<vmem>>, vector<1x64xf32>,
    return
  }
  func.func @transform_0(%arg0: i32) -> (i32, i32) {
    %c0_i32 = arith.constant 0 : i32
    %c0_i32_0 = arith.constant 0 : i32
    return %arg0, %c0_i32 : i32, i32
  }
  func.func @transform_1(%arg0: i32) -> (i32, i32) {
    %c0_i32 = arith.constant 0 : i32
    %c0_i32_0 = arith.constant 0 : i32
    %c0_i32_1 = arith.constant 0 : i32
    return %c0_i32, %c0_i32_0 : i32, i32
  }
  func.func @transform_2(%arg0: i32) -> (i32, i32) {
    %c0_i32 = arith.constant 0 : i32
    %c0_i32_0 = arith.constant 0 : i32
    %c0_i32_1 = arith.constant 0 : i32
    return %c0_i32, %c0_i32_0 : i32, i32
  }
}

module attributes {stable_mosaic.version = 11 : i64} {
  func.func @_relu_matmul_kernel(%arg0: i32, %arg1: memref<2x64xf32, #tpu.memory_space<vmem>>, %arg2: memref<64x1024xbf16, #tpu.memory_space<vmem>>, %arg3: memref<2x1024xf32, #tpu.memory_space<vmem>>) attributes {dimension_semantics = [#tpu.dimension_semantics<parallel>], iteration_bounds = array<i64: 1>, scalar_prefetch = 0 : i64, scratch_operands = 0 : i64, tpu.core_type = #tpu.core_type<tc>, window_params = [{transform_indices = @transform_0, window_bounds = array<i64: 2, 64>}, {pipeline_mode = #tpu.pipeline_mode<synchronous>, transform_indices = @transform_1, window_bounds = array<i64: 64, 1024>}, {transform_indices = @transform_2, window_bounds = array<i64: 2, 1024>}]} {
    %c0 = arith.constant 0 : index
    %c0_0 = arith.constant 0 : index
    %0 = vector.load %arg1[%c0, %c0_0] : memref<2x64xf32, #tpu.memory_space<vmem>>, vector<2x64xf32>
    %cst = arith.constant 0.000000e+00 : f32
    %1 = vector.broadcast %cst : f32 to vector<2x64xf32>
    %2 = arith.maximumf %0, %1 : vector<2x64xf32>
    %3 = arith.truncf %2 : vector<2x64xf32> to vector<2x64xbf16>
    %c0_1 = arith.constant 0 : index
    %c0_2 = arith.constant 0 : index
    %4 = vector.load %arg2[%c0_1, %c0_2] : memref<64x1024xbf16, #tpu.memory_space<vmem>>, vector<64x1024xbf16>
    %cst_3 = arith.constant dense<0.000000e+00> : vector<2x1024xf32>
    %5 = tpu.matmul %3, %4, %cst_3 {dimension_numbers = #tpu.dot_dimension_numbers<[1], [0], [0], [1], [0, 0, 1, 1], [], []>} : vector<2x64xbf16>, vector<64x1024xbf16>, vector<2x1024xf32> -> vector<2x1024xf32>
    %c0_4 = arith.constant 0 : index
    %c0_5 = arith.constant 0 : index
    %6 = vector.load %arg3[%c0_4, %c0_5] : memref<2x1024xf32, #tpu.memory_space<vmem>>, vector<2x1024xf32>
    tpu.vector_store %arg3[%c0_4, %c0_5], %5 {strides = array<i32>} : memref<2x1024xf32, #tpu.memory_space<vmem>>, vector<2x1024xf32>,
    return
  }
  func.func @transform_0(%arg0: i32) -> (i32, i32) {
    %c0_i32 = arith.constant 0 : i32
    %c0_i32_0 = arith.constant 0 : i32
    return %arg0, %c0_i32 : i32, i32
  }
  func.func @transform_1(%arg0: i32) -> (i32, i32) {
    %c0_i32 = arith.constant 0 : i32
    %c0_i32_0 = arith.constant 0 : i32
    %c0_i32_1 = arith.constant 0 : i32
    return %c0_i32, %c0_i32_0 : i32, i32
  }
  func.func @transform_2(%arg0: i32) -> (i32, i32) {
    %c0_i32 = arith.constant 0 : i32
    %c0_i32_0 = arith.constant 0 : i32
    return %arg0, %c0_i32 : i32, i32
  }
}

module attributes {stable_mosaic.version = 11 : i64} {
  func.func @_matmul_bf16_kernel(%arg0: i32, %arg1: memref<2x1024xbf16, #tpu.memory_space<vmem>>, %arg2: memref<1024x128xbf16, #tpu.memory_space<vmem>>, %arg3: memref<2x128xf32, #tpu.memory_space<vmem>>) attributes {dimension_semantics = [#tpu.dimension_semantics<parallel>], iteration_bounds = array<i64: 1>, scalar_prefetch = 0 : i64, scratch_operands = 0 : i64, tpu.core_type = #tpu.core_type<tc>, window_params = [{transform_indices = @transform_0, window_bounds = array<i64: 2, 1024>}, {pipeline_mode = #tpu.pipeline_mode<synchronous>, transform_indices = @transform_1, window_bounds = array<i64: 1024, 128>}, {transform_indices = @transform_2, window_bounds = array<i64: 2, 128>}]} {
    %c0 = arith.constant 0 : index
    %c0_0 = arith.constant 0 : index
    %0 = vector.load %arg1[%c0, %c0_0] : memref<2x1024xbf16, #tpu.memory_space<vmem>>, vector<2x1024xbf16>
    %c0_1 = arith.constant 0 : index
    %c0_2 = arith.constant 0 : index
    %1 = vector.load %arg2[%c0_1, %c0_2] : memref<1024x128xbf16, #tpu.memory_space<vmem>>, vector<1024x128xbf16>
    %cst = arith.constant dense<0.000000e+00> : vector<2x128xf32>
    %2 = tpu.matmul %0, %1, %cst {dimension_numbers = #tpu.dot_dimension_numbers<[1], [0], [0], [1], [0, 0, 1, 1], [], []>} : vector<2x1024xbf16>, vector<1024x128xbf16>, vector<2x128xf32> -> vector<2x128xf32>
    %c0_3 = arith.constant 0 : index
    %c0_4 = arith.constant 0 : index
    %3 = vector.load %arg3[%c0_3, %c0_4] : memref<2x128xf32, #tpu.memory_space<vmem>>, vector<2x128xf32>
    tpu.vector_store %arg3[%c0_3, %c0_4], %2 {strides = array<i32>} : memref<2x128xf32, #tpu.memory_space<vmem>>, vector<2x128xf32>,
    return
  }
  func.func @transform_0(%arg0: i32) -> (i32, i32) {
    %c0_i32 = arith.constant 0 : i32
    %c0_i32_0 = arith.constant 0 : i32
    return %arg0, %c0_i32 : i32, i32
  }
  func.func @transform_1(%arg0: i32) -> (i32, i32) {
    %c0_i32 = arith.constant 0 : i32
    %c0_i32_0 = arith.constant 0 : i32
    %c0_i32_1 = arith.constant 0 : i32
    return %c0_i32, %c0_i32_0 : i32, i32
  }
  func.func @transform_2(%arg0: i32) -> (i32, i32) {
    %c0_i32 = arith.constant 0 : i32
    %c0_i32_0 = arith.constant 0 : i32
    return %arg0, %c0_i32 : i32, i32
  }
}

module attributes {stable_mosaic.version = 11 : i64} {
  func.func @_relu_matmul_kernel(%arg0: i32, %arg1: memref<8x128xf32, #tpu.memory_space<vmem>>, %arg2: memref<128x512xbf16, #tpu.memory_space<vmem>>, %arg3: memref<8x512xf32, #tpu.memory_space<vmem>>) attributes {dimension_semantics = [#tpu.dimension_semantics<parallel>], iteration_bounds = array<i64: 1>, scalar_prefetch = 0 : i64, scratch_operands = 0 : i64, tpu.core_type = #tpu.core_type<tc>, window_params = [{transform_indices = @transform_0, window_bounds = array<i64: 8, 128>}, {pipeline_mode = #tpu.pipeline_mode<synchronous>, transform_indices = @transform_1, window_bounds = array<i64: 128, 512>}, {transform_indices = @transform_2, window_bounds = array<i64: 8, 512>}]} {
    %c0 = arith.constant 0 : index
    %c0_0 = arith.constant 0 : index
    %0 = vector.load %arg1[%c0, %c0_0] : memref<8x128xf32, #tpu.memory_space<vmem>>, vector<8x128xf32>
    %cst = arith.constant 0.000000e+00 : f32
    %1 = vector.broadcast %cst : f32 to vector<8x128xf32>
    %2 = arith.maximumf %0, %1 : vector<8x128xf32>
    %3 = arith.truncf %2 : vector<8x128xf32> to vector<8x128xbf16>
    %c0_1 = arith.constant 0 : index
    %c0_2 = arith.constant 0 : index
    %4 = vector.load %arg2[%c0_1, %c0_2] : memref<128x512xbf16, #tpu.memory_space<vmem>>, vector<128x512xbf16>
    %cst_3 = arith.constant dense<0.000000e+00> : vector<8x512xf32>
    %5 = tpu.matmul %3, %4, %cst_3 {dimension_numbers = #tpu.dot_dimension_numbers<[1], [0], [0], [1], [0, 0, 1, 1], [], []>} : vector<8x128xbf16>, vector<128x512xbf16>, vector<8x512xf32> -> vector<8x512xf32>
    %c0_4 = arith.constant 0 : index
    %c0_5 = arith.constant 0 : index
    %6 = vector.load %arg3[%c0_4, %c0_5] : memref<8x512xf32, #tpu.memory_space<vmem>>, vector<8x512xf32>
    tpu.vector_store %arg3[%c0_4, %c0_5], %5 {strides = array<i32>} : memref<8x512xf32, #tpu.memory_space<vmem>>, vector<8x512xf32>,
    return
  }
  func.func @transform_0(%arg0: i32) -> (i32, i32) {
    %c0_i32 = arith.constant 0 : i32
    %c0_i32_0 = arith.constant 0 : i32
    return %arg0, %c0_i32 : i32, i32
  }
  func.func @transform_1(%arg0: i32) -> (i32, i32) {
    %c0_i32 = arith.constant 0 : i32
    %c0_i32_0 = arith.constant 0 : i32
    %c0_i32_1 = arith.constant 0 : i32
    return %c0_i32, %c0_i32_0 : i32, i32
  }
  func.func @transform_2(%arg0: i32) -> (i32, i32) {
    %c0_i32 = arith.constant 0 : i32
    %c0_i32_0 = arith.constant 0 : i32
    return %arg0, %c0_i32 : i32, i32
  }
}

module attributes {stable_mosaic.version = 11 : i64} {
  func.func @_relu_matmul_kernel(%arg0: i32, %arg1: memref<32x64xf32, #tpu.memory_space<vmem>>, %arg2: memref<64x256xbf16, #tpu.memory_space<vmem>>, %arg3: memref<32x256xf32, #tpu.memory_space<vmem>>) attributes {dimension_semantics = [#tpu.dimension_semantics<parallel>], iteration_bounds = array<i64: 1>, scalar_prefetch = 0 : i64, scratch_operands = 0 : i64, tpu.core_type = #tpu.core_type<tc>, window_params = [{transform_indices = @transform_0, window_bounds = array<i64: 32, 64>}, {pipeline_mode = #tpu.pipeline_mode<synchronous>, transform_indices = @transform_1, window_bounds = array<i64: 64, 256>}, {transform_indices = @transform_2, window_bounds = array<i64: 32, 256>}]} {
    %c0 = arith.constant 0 : index
    %c0_0 = arith.constant 0 : index
    %0 = vector.load %arg1[%c0, %c0_0] : memref<32x64xf32, #tpu.memory_space<vmem>>, vector<32x64xf32>
    %cst = arith.constant 0.000000e+00 : f32
    %1 = vector.broadcast %cst : f32 to vector<32x64xf32>
    %2 = arith.maximumf %0, %1 : vector<32x64xf32>
    %3 = arith.truncf %2 : vector<32x64xf32> to vector<32x64xbf16>
    %c0_1 = arith.constant 0 : index
    %c0_2 = arith.constant 0 : index
    %4 = vector.load %arg2[%c0_1, %c0_2] : memref<64x256xbf16, #tpu.memory_space<vmem>>, vector<64x256xbf16>
    %cst_3 = arith.constant dense<0.000000e+00> : vector<32x256xf32>
    %5 = tpu.matmul %3, %4, %cst_3 {dimension_numbers = #tpu.dot_dimension_numbers<[1], [0], [0], [1], [0, 0, 1, 1], [], []>} : vector<32x64xbf16>, vector<64x256xbf16>, vector<32x256xf32> -> vector<32x256xf32>
    %c0_4 = arith.constant 0 : index
    %c0_5 = arith.constant 0 : index
    %6 = vector.load %arg3[%c0_4, %c0_5] : memref<32x256xf32, #tpu.memory_space<vmem>>, vector<32x256xf32>
    tpu.vector_store %arg3[%c0_4, %c0_5], %5 {strides = array<i32>} : memref<32x256xf32, #tpu.memory_space<vmem>>, vector<32x256xf32>,
    return
  }
  func.func @transform_0(%arg0: i32) -> (i32, i32) {
    %c0_i32 = arith.constant 0 : i32
    %c0_i32_0 = arith.constant 0 : i32
    return %arg0, %c0_i32 : i32, i32
  }
  func.func @transform_1(%arg0: i32) -> (i32, i32) {
    %c0_i32 = arith.constant 0 : i32
    %c0_i32_0 = arith.constant 0 : i32
    %c0_i32_1 = arith.constant 0 : i32
    return %c0_i32, %c0_i32_0 : i32, i32
  }
  func.func @transform_2(%arg0: i32) -> (i32, i32) {
    %c0_i32 = arith.constant 0 : i32
    %c0_i32_0 = arith.constant 0 : i32
    return %arg0, %c0_i32 : i32, i32
  }
}

module attributes {stable_mosaic.version = 11 : i64} {
  func.func @_relu_matmul_kernel(%arg0: i32, %arg1: memref<128x32xf32, #tpu.memory_space<vmem>>, %arg2: memref<32x128xbf16, #tpu.memory_space<vmem>>, %arg3: memref<128x128xf32, #tpu.memory_space<vmem>>) attributes {dimension_semantics = [#tpu.dimension_semantics<parallel>], iteration_bounds = array<i64: 1>, scalar_prefetch = 0 : i64, scratch_operands = 0 : i64, tpu.core_type = #tpu.core_type<tc>, window_params = [{transform_indices = @transform_0, window_bounds = array<i64: 128, 32>}, {pipeline_mode = #tpu.pipeline_mode<synchronous>, transform_indices = @transform_1, window_bounds = array<i64: 32, 128>}, {transform_indices = @transform_2, window_bounds = array<i64: 128, 128>}]} {
    %c0 = arith.constant 0 : index
    %c0_0 = arith.constant 0 : index
    %0 = vector.load %arg1[%c0, %c0_0] : memref<128x32xf32, #tpu.memory_space<vmem>>, vector<128x32xf32>
    %cst = arith.constant 0.000000e+00 : f32
    %1 = vector.broadcast %cst : f32 to vector<128x32xf32>
    %2 = arith.maximumf %0, %1 : vector<128x32xf32>
    %3 = arith.truncf %2 : vector<128x32xf32> to vector<128x32xbf16>
    %c0_1 = arith.constant 0 : index
    %c0_2 = arith.constant 0 : index
    %4 = vector.load %arg2[%c0_1, %c0_2] : memref<32x128xbf16, #tpu.memory_space<vmem>>, vector<32x128xbf16>
    %cst_3 = arith.constant dense<0.000000e+00> : vector<128x128xf32>
    %5 = tpu.matmul %3, %4, %cst_3 {dimension_numbers = #tpu.dot_dimension_numbers<[1], [0], [0], [1], [0, 0, 1, 1], [], []>} : vector<128x32xbf16>, vector<32x128xbf16>, vector<128x128xf32> -> vector<128x128xf32>
    %c0_4 = arith.constant 0 : index
    %c0_5 = arith.constant 0 : index
    %6 = vector.load %arg3[%c0_4, %c0_5] : memref<128x128xf32, #tpu.memory_space<vmem>>, vector<128x128xf32>
    tpu.vector_store %arg3[%c0_4, %c0_5], %5 {strides = array<i32>} : memref<128x128xf32, #tpu.memory_space<vmem>>, vector<128x128xf32>,
    return
  }
  func.func @transform_0(%arg0: i32) -> (i32, i32) {
    %c0_i32 = arith.constant 0 : i32
    %c0_i32_0 = arith.constant 0 : i32
    return %arg0, %c0_i32 : i32, i32
  }
  func.func @transform_1(%arg0: i32) -> (i32, i32) {
    %c0_i32 = arith.constant 0 : i32
    %c0_i32_0 = arith.constant 0 : i32
    %c0_i32_1 = arith.constant 0 : i32
    return %c0_i32, %c0_i32_0 : i32, i32
  }
  func.func @transform_2(%arg0: i32) -> (i32, i32) {
    %c0_i32 = arith.constant 0 : i32
    %c0_i32_0 = arith.constant 0 : i32
    return %arg0, %c0_i32 : i32, i32
  }
}

module attributes {stable_mosaic.version = 11 : i64} {
  func.func @_bn_stats_kernel(%arg0: i32, %arg1: memref<512x8xf32, #tpu.memory_space<vmem>>, %arg2: memref<1x8xf32, #tpu.memory_space<vmem>>, %arg3: memref<1x8xf32, #tpu.memory_space<vmem>>) attributes {dimension_semantics = [#tpu.dimension_semantics<arbitrary>], iteration_bounds = array<i64: 1>, scalar_prefetch = 0 : i64, scratch_operands = 0 : i64, tpu.core_type = #tpu.core_type<tc>, window_params = [{transform_indices = @transform_0, window_bounds = array<i64: 512, 8>}, {pipeline_mode = #tpu.pipeline_mode<synchronous>, transform_indices = @transform_1, window_bounds = array<i64: 1, 8>}, {pipeline_mode = #tpu.pipeline_mode<synchronous>, transform_indices = @transform_2, window_bounds = array<i64: 1, 8>}]} {
    %c0_i32 = arith.constant 0 : i32
    %0 = arith.cmpi eq, %arg0, %c0_i32 : i32
    %1 = arith.extui %0 : i1 to i32
    %c0_i32_0 = arith.constant 0 : i32
    %2 = arith.cmpi ne, %1, %c0_i32_0 : i32
    scf.if %2 {
      %cst_13 = arith.constant 0.000000e+00 : f32
      %23 = vector.broadcast %cst_13 : f32 to vector<1x8xf32>
      %c0_14 = arith.constant 0 : index
      %c0_15 = arith.constant 0 : index
      %24 = vector.load %arg2[%c0_14, %c0_15] : memref<1x8xf32, #tpu.memory_space<vmem>>, vector<1x8xf32>
      tpu.vector_store %arg2[%c0_14, %c0_15], %23 {strides = array<i32>} : memref<1x8xf32, #tpu.memory_space<vmem>>, vector<1x8xf32>,
      %cst_16 = arith.constant 0.000000e+00 : f32
      %25 = vector.broadcast %cst_16 : f32 to vector<1x8xf32>
      %c0_17 = arith.constant 0 : index
      %c0_18 = arith.constant 0 : index
      %26 = vector.load %arg3[%c0_17, %c0_18] : memref<1x8xf32, #tpu.memory_space<vmem>>, vector<1x8xf32>
      tpu.vector_store %arg3[%c0_17, %c0_18], %25 {strides = array<i32>} : memref<1x8xf32, #tpu.memory_space<vmem>>, vector<1x8xf32>,
    } else {
    }
    %c0 = arith.constant 0 : index
    %c0_1 = arith.constant 0 : index
    %3 = vector.load %arg1[%c0, %c0_1] : memref<512x8xf32, #tpu.memory_space<vmem>>, vector<512x8xf32>
    %4 = tpu.iota {dimensions = array<i32: 0>} : vector<512x8xi32>
    %c512_i32 = arith.constant 512 : i32
    %5 = arith.muli %arg0, %c512_i32 : i32
    %6 = vector.broadcast %5 : i32 to vector<512x8xi32>
    %7 = arith.addi %4, %6 : vector<512x8xi32>
    %c512_i32_2 = arith.constant 512 : i32
    %8 = vector.broadcast %c512_i32_2 : i32 to vector<512x8xi32>
    %9 = arith.cmpi slt, %7, %8 : vector<512x8xi32>
    %cst = arith.constant 0.000000e+00 : f32
    %10 = vector.broadcast %cst : f32 to vector<512x8xf32>
    %11 = arith.select %9, %3, %10 : vector<512x8xi1>, vector<512x8xf32>
    %c0_3 = arith.constant 0 : index
    %c0_4 = arith.constant 0 : index
    %12 = vector.load %arg2[%c0_3, %c0_4] : memref<1x8xf32, #tpu.memory_space<vmem>>, vector<1x8xf32>
    %cst_5 = arith.constant dense<0.000000e+00> : vector<8xf32>
    %13 = vector.multi_reduction <add>, %11, %cst_5 [0] : vector<512x8xf32> to vector<8xf32>
    %14 = vector.shape_cast %13 : vector<8xf32> to vector<1x8xf32>
    %15 = arith.addf %12, %14 : vector<1x8xf32>
    %c0_6 = arith.constant 0 : index
    %c0_7 = arith.constant 0 : index
    %16 = vector.load %arg2[%c0_6, %c0_7] : memref<1x8xf32, #tpu.memory_space<vmem>>, vector<1x8xf32>
    tpu.vector_store %arg2[%c0_6, %c0_7], %15 {strides = array<i32>} : memref<1x8xf32, #tpu.memory_space<vmem>>, vector<1x8xf32>,
    %c0_8 = arith.constant 0 : index
    %c0_9 = arith.constant 0 : index
    %17 = vector.load %arg3[%c0_8, %c0_9] : memref<1x8xf32, #tpu.memory_space<vmem>>, vector<1x8xf32>
    %18 = arith.mulf %11, %11 : vector<512x8xf32>
    %cst_10 = arith.constant dense<0.000000e+00> : vector<8xf32>
    %19 = vector.multi_reduction <add>, %18, %cst_10 [0] : vector<512x8xf32> to vector<8xf32>
    %20 = vector.shape_cast %19 : vector<8xf32> to vector<1x8xf32>
    %21 = arith.addf %17, %20 : vector<1x8xf32>
    %c0_11 = arith.constant 0 : index
    %c0_12 = arith.constant 0 : index
    %22 = vector.load %arg3[%c0_11, %c0_12] : memref<1x8xf32, #tpu.memory_space<vmem>>, vector<1x8xf32>
    tpu.vector_store %arg3[%c0_11, %c0_12], %21 {strides = array<i32>} : memref<1x8xf32, #tpu.memory_space<vmem>>, vector<1x8xf32>,
    return
  }
  func.func @transform_0(%arg0: i32) -> (i32, i32) {
    %c0_i32 = arith.constant 0 : i32
    %c0_i32_0 = arith.constant 0 : i32
    return %arg0, %c0_i32 : i32, i32
  }
  func.func @transform_1(%arg0: i32) -> (i32, i32) {
    %c0_i32 = arith.constant 0 : i32
    %c0_i32_0 = arith.constant 0 : i32
    %c0_i32_1 = arith.constant 0 : i32
    return %c0_i32, %c0_i32_0 : i32, i32
  }
  func.func @transform_2(%arg0: i32) -> (i32, i32) {
    %c0_i32 = arith.constant 0 : i32
    %c0_i32_0 = arith.constant 0 : i32
    %c0_i32_1 = arith.constant 0 : i32
    return %c0_i32, %c0_i32_0 : i32, i32
  }
}

module attributes {stable_mosaic.version = 11 : i64} {
  func.func @_scale_shift_kernel(%arg0: i32, %arg1: memref<512x8xf32, #tpu.memory_space<vmem>>, %arg2: memref<1x8xf32, #tpu.memory_space<vmem>>, %arg3: memref<1x8xf32, #tpu.memory_space<vmem>>, %arg4: memref<512x8xf32, #tpu.memory_space<vmem>>) attributes {dimension_semantics = [#tpu.dimension_semantics<parallel>], iteration_bounds = array<i64: 1>, scalar_prefetch = 0 : i64, scratch_operands = 0 : i64, tpu.core_type = #tpu.core_type<tc>, window_params = [{transform_indices = @transform_0, window_bounds = array<i64: 512, 8>}, {pipeline_mode = #tpu.pipeline_mode<synchronous>, transform_indices = @transform_1, window_bounds = array<i64: 1, 8>}, {pipeline_mode = #tpu.pipeline_mode<synchronous>, transform_indices = @transform_2, window_bounds = array<i64: 1, 8>}, {transform_indices = @transform_3, window_bounds = array<i64: 512, 8>}]} {
    %c0 = arith.constant 0 : index
    %c0_0 = arith.constant 0 : index
    %0 = vector.load %arg1[%c0, %c0_0] : memref<512x8xf32, #tpu.memory_space<vmem>>, vector<512x8xf32>
    %c0_1 = arith.constant 0 : index
    %c0_2 = arith.constant 0 : index
    %1 = vector.load %arg2[%c0_1, %c0_2] : memref<1x8xf32, #tpu.memory_space<vmem>>, vector<1x8xf32>
    %2 = vector.broadcast %1 : vector<1x8xf32> to vector<512x8xf32>
    %3 = arith.mulf %0, %2 : vector<512x8xf32>
    %c0_3 = arith.constant 0 : index
    %c0_4 = arith.constant 0 : index
    %4 = vector.load %arg3[%c0_3, %c0_4] : memref<1x8xf32, #tpu.memory_space<vmem>>, vector<1x8xf32>
    %5 = vector.broadcast %4 : vector<1x8xf32> to vector<512x8xf32>
    %6 = arith.addf %3, %5 : vector<512x8xf32>
    %c0_5 = arith.constant 0 : index
    %c0_6 = arith.constant 0 : index
    %7 = vector.load %arg4[%c0_5, %c0_6] : memref<512x8xf32, #tpu.memory_space<vmem>>, vector<512x8xf32>
    tpu.vector_store %arg4[%c0_5, %c0_6], %6 {strides = array<i32>} : memref<512x8xf32, #tpu.memory_space<vmem>>, vector<512x8xf32>,
    return
  }
  func.func @transform_0(%arg0: i32) -> (i32, i32) {
    %c0_i32 = arith.constant 0 : i32
    %c0_i32_0 = arith.constant 0 : i32
    return %arg0, %c0_i32 : i32, i32
  }
  func.func @transform_1(%arg0: i32) -> (i32, i32) {
    %c0_i32 = arith.constant 0 : i32
    %c0_i32_0 = arith.constant 0 : i32
    %c0_i32_1 = arith.constant 0 : i32
    return %c0_i32, %c0_i32_0 : i32, i32
  }
  func.func @transform_2(%arg0: i32) -> (i32, i32) {
    %c0_i32 = arith.constant 0 : i32
    %c0_i32_0 = arith.constant 0 : i32
    %c0_i32_1 = arith.constant 0 : i32
    return %c0_i32, %c0_i32_0 : i32, i32
  }
  func.func @transform_3(%arg0: i32) -> (i32, i32) {
    %c0_i32 = arith.constant 0 : i32
    %c0_i32_0 = arith.constant 0 : i32
    return %arg0, %c0_i32 : i32, i32
  }
}

module attributes {stable_mosaic.version = 11 : i64} {
  func.func @_relu_matmul_kernel(%arg0: i32, %arg1: memref<512x16xf32, #tpu.memory_space<vmem>>, %arg2: memref<16x128xbf16, #tpu.memory_space<vmem>>, %arg3: memref<512x128xf32, #tpu.memory_space<vmem>>) attributes {dimension_semantics = [#tpu.dimension_semantics<parallel>], iteration_bounds = array<i64: 1>, scalar_prefetch = 0 : i64, scratch_operands = 0 : i64, tpu.core_type = #tpu.core_type<tc>, window_params = [{transform_indices = @transform_0, window_bounds = array<i64: 512, 16>}, {pipeline_mode = #tpu.pipeline_mode<synchronous>, transform_indices = @transform_1, window_bounds = array<i64: 16, 128>}, {transform_indices = @transform_2, window_bounds = array<i64: 512, 128>}]} {
    %c0 = arith.constant 0 : index
    %c0_0 = arith.constant 0 : index
    %0 = vector.load %arg1[%c0, %c0_0] : memref<512x16xf32, #tpu.memory_space<vmem>>, vector<512x16xf32>
    %cst = arith.constant 0.000000e+00 : f32
    %1 = vector.broadcast %cst : f32 to vector<512x16xf32>
    %2 = arith.maximumf %0, %1 : vector<512x16xf32>
    %3 = arith.truncf %2 : vector<512x16xf32> to vector<512x16xbf16>
    %c0_1 = arith.constant 0 : index
    %c0_2 = arith.constant 0 : index
    %4 = vector.load %arg2[%c0_1, %c0_2] : memref<16x128xbf16, #tpu.memory_space<vmem>>, vector<16x128xbf16>
    %cst_3 = arith.constant dense<0.000000e+00> : vector<512x128xf32>
    %5 = tpu.matmul %3, %4, %cst_3 {dimension_numbers = #tpu.dot_dimension_numbers<[1], [0], [0], [1], [0, 0, 1, 1], [], []>} : vector<512x16xbf16>, vector<16x128xbf16>, vector<512x128xf32> -> vector<512x128xf32>
    %c0_4 = arith.constant 0 : index
    %c0_5 = arith.constant 0 : index
    %6 = vector.load %arg3[%c0_4, %c0_5] : memref<512x128xf32, #tpu.memory_space<vmem>>, vector<512x128xf32>
    tpu.vector_store %arg3[%c0_4, %c0_5], %5 {strides = array<i32>} : memref<512x128xf32, #tpu.memory_space<vmem>>, vector<512x128xf32>,
    return
  }
  func.func @transform_0(%arg0: i32) -> (i32, i32) {
    %c0_i32 = arith.constant 0 : i32
    %c0_i32_0 = arith.constant 0 : i32
    return %arg0, %c0_i32 : i32, i32
  }
  func.func @transform_1(%arg0: i32) -> (i32, i32) {
    %c0_i32 = arith.constant 0 : i32
    %c0_i32_0 = arith.constant 0 : i32
    %c0_i32_1 = arith.constant 0 : i32
    return %c0_i32, %c0_i32_0 : i32, i32
  }
  func.func @transform_2(%arg0: i32) -> (i32, i32) {
    %c0_i32 = arith.constant 0 : i32
    %c0_i32_0 = arith.constant 0 : i32
    return %arg0, %c0_i32 : i32, i32
  }
}

module attributes {stable_mosaic.version = 11 : i64} {
  func.func @_bias_tanh_kernel(%arg0: i32, %arg1: memref<1024x3xf32, #tpu.memory_space<vmem>>, %arg2: memref<1x3xf32, #tpu.memory_space<vmem>>, %arg3: memref<1024x3xf32, #tpu.memory_space<vmem>>) attributes {dimension_semantics = [#tpu.dimension_semantics<parallel>], iteration_bounds = array<i64: 2>, scalar_prefetch = 0 : i64, scratch_operands = 0 : i64, tpu.core_type = #tpu.core_type<tc>, window_params = [{transform_indices = @transform_0, window_bounds = array<i64: 1024, 3>}, {pipeline_mode = #tpu.pipeline_mode<synchronous>, transform_indices = @transform_1, window_bounds = array<i64: 1, 3>}, {transform_indices = @transform_2, window_bounds = array<i64: 1024, 3>}]} {
    %c0 = arith.constant 0 : index
    %c0_0 = arith.constant 0 : index
    %0 = vector.load %arg1[%c0, %c0_0] : memref<1024x3xf32, #tpu.memory_space<vmem>>, vector<1024x3xf32>
    %c0_1 = arith.constant 0 : index
    %c0_2 = arith.constant 0 : index
    %1 = vector.load %arg2[%c0_1, %c0_2] : memref<1x3xf32, #tpu.memory_space<vmem>>, vector<1x3xf32>
    %2 = vector.broadcast %1 : vector<1x3xf32> to vector<1024x3xf32>
    %3 = arith.addf %0, %2 : vector<1024x3xf32>
    %4 = math.tanh %3 : vector<1024x3xf32>
    %c0_3 = arith.constant 0 : index
    %c0_4 = arith.constant 0 : index
    %5 = vector.load %arg3[%c0_3, %c0_4] : memref<1024x3xf32, #tpu.memory_space<vmem>>, vector<1024x3xf32>
    tpu.vector_store %arg3[%c0_3, %c0_4], %4 {strides = array<i32>} : memref<1024x3xf32, #tpu.memory_space<vmem>>, vector<1024x3xf32>,
    return
  }
  func.func @transform_0(%arg0: i32) -> (i32, i32) {
    %c0_i32 = arith.constant 0 : i32
    %c0_i32_0 = arith.constant 0 : i32
    return %arg0, %c0_i32 : i32, i32
  }
  func.func @transform_1(%arg0: i32) -> (i32, i32) {
    %c0_i32 = arith.constant 0 : i32
    %c0_i32_0 = arith.constant 0 : i32
    %c0_i32_1 = arith.constant 0 : i32
    return %c0_i32, %c0_i32_0 : i32, i32
  }
  func.func @transform_2(%arg0: i32) -> (i32, i32) {
    %c0_i32 = arith.constant 0 : i32
    %c0_i32_0 = arith.constant 0 : i32
    return %arg0, %c0_i32 : i32, i32
  }
}

</mosaic_0001>

<bundles_post_ra>
// kernel: _lambda_.25
= control target key start
LH: loop header
LB: loop body
LE: loop exit
PB: predicated region body
PF: predicated region fallthrough
CT: control target
= control target key end

     0   :  { %vm260_vm0 = vcmask 392192   ;;  %s1271_s1 = inlined_call_operand.vmem [shape: bf16[48,128], index: 1, kind: input, shape index: {}]   ;;  %s1272_s0 = inlined_call_operand.vmem [shape: bf16[512,48], index: 0, kind: input, shape index: {}]   ;;  %s1273_s2 = inlined_call_operand.vmem [shape: f32[512,128], index: 2, kind: output, shape index: {}]  }
   0x1   :  { %v892_v0 = vld [vmem:[%s1271_s1 + $0x10] sm:$0xff]   ;;  %v893_v1 = vld [vmem:[%s1271_s1 + $0x8] sm:$0xff]   ;;  %v894_v2 = vld [vmem:[%s1271_s1] sm:$0xff]  }
   0x2   :  { %816 = vmatprep.subr.bf16.mxu0 %v892_v0  ;;  %886 = vmatprep.subr.bf16.mxu1 %v892_v0  ;;  %v895_v3 = vld [vmem:[%s1272_s0] sm:$0xff]   ;;  %v897_v5 = vld [vmem:[%s1272_s0 + $0x8] sm:$0xff]   ;;  %v899_v7 = vld [vmem:[%s1272_s0 + $0x10] sm:$0xff]  }
   0x3   :  { %817 = vmatpush3.bf16.msra.mxu0 %v892_v0  ;;  %889 = vmatpush3.bf16.msra.mxu1 %v892_v0  ;;  %v896_v4 = vld [vmem:[%s1272_s0 + $0x80] sm:$0xff]   ;;  %v898_v6 = vld [vmem:[%s1272_s0 + $0x88] sm:$0xff]   ;;  %v900_v8 = vld [vmem:[%s1272_s0 + $0x90] sm:$0xff]  }
   0x4   :  { %818 = vmatprep.subr.bf16.mxu0 %v893_v1  ;;  %887 = vmatprep.subr.bf16.mxu1 %v893_v1  ;;  %v901_v9 = vld [vmem:[%s1272_s0 + $0x18] sm:$0xff]   ;;  %v903_v11 = vld [vmem:[%s1272_s0 + $0x20] sm:$0xff]   ;;  %v905_v13 = vld [vmem:[%s1272_s0 + $0x28] sm:$0xff]  }
   0x5   :  { %822 = vmatprep.mubr.msk.bf16.mxu0 %vm260_vm0, %v895_v3  ;;  %854 = vmatprep.mubr.msk.bf16.mxu1 %vm260_vm0, %v896_v4  ;;  %v902_v10 = vld [vmem:[%s1272_s0 + $0x98] sm:$0xff]   ;;  %v904_v12 = vld [vmem:[%s1272_s0 + $0xa0] sm:$0xff]   ;;  %v906_v14 = vld [vmem:[%s1272_s0 + $0xa8] sm:$0xff]  }
   0x6   :  { %v907_v15 = vld [vmem:[%s1272_s0 + $0x30] sm:$0xff]   ;;  %v909_v17 = vld [vmem:[%s1272_s0 + $0x38] sm:$0xff]   ;;  %v911_v19 = vld [vmem:[%s1272_s0 + $0x40] sm:$0xff]  }
   0x7   :  { %819 = vmatpush3.bf16.msra.mxu0 %v893_v1  ;;  %890 = vmatpush3.bf16.msra.mxu1 %v893_v1  ;;  %v908_v16 = vld [vmem:[%s1272_s0 + $0xb0] sm:$0xff]   ;;  %v910_v18 = vld [vmem:[%s1272_s0 + $0xb8] sm:$0xff]   ;;  %v912_v20 = vld [vmem:[%s1272_s0 + $0xc0] sm:$0xff]  }
   0x8   :  { %820 = vmatprep.subr.bf16.mxu0 %v894_v2  ;;  %888 = vmatprep.subr.bf16.mxu1 %v894_v2  ;;  %v913_v21 = vld [vmem:[%s1272_s0 + $0x48] sm:$0xff]   ;;  %v915_v23 = vld [vmem:[%s1272_s0 + $0x50] sm:$0xff]   ;;  %v917_v25 = vld [vmem:[%s1272_s0 + $0x58] sm:$0xff]  }
   0x9   :  { %v914_v22 = vld [vmem:[%s1272_s0 + $0xc8] sm:$0xff]   ;;  %v916_v24 = vld [vmem:[%s1272_s0 + $0xd0] sm:$0xff]   ;;  %v918_v26 = vld [vmem:[%s1272_s0 + $0xd8] sm:$0xff]  }
   0xa   :  { %v919_v27 = vld [vmem:[%s1272_s0 + $0x60] sm:$0xff]   ;;  %v921_v29 = vld [vmem:[%s1272_s0 + $0x68] sm:$0xff]   ;;  %v923_v31 = vld [vmem:[%s1272_s0 + $0x70] sm:$0xff]  }
   0xb   :  { %821 = vmatpush3.bf16.msra.mxu0 %v894_v2  ;;  %891 = vmatpush3.bf16.msra.mxu1 %v894_v2  ;;  %v920_v28 = vld [vmem:[%s1272_s0 + $0xe0] sm:$0xff]   ;;  %v922_v30 = vld [vmem:[%s1272_s0 + $0xe8] sm:$0xff]   ;;  %v924_v32 = vld [vmem:[%s1272_s0 + $0xf0] sm:$0xff]  }
   0xc   :  { %v925_v33 = vld [vmem:[%s1272_s0 + $0x78] sm:$0xff]  }
   0xd   :  { %v926_v34 = vld [vmem:[%s1272_s0 + $0xf8] sm:$0xff]  }
   0xe   :  { %823 = vmatmul.mubr.msk.bf16.vlgmr.msra.gmra.mxu0 %vm260_vm0, %v897_v5  ;;  %855 = vmatmul.mubr.msk.bf16.vlgmr.msra.gmra.mxu1 %vm260_vm0, %v898_v6 }
   0xf   :  { %826 = vmatprep.mubr.msk.bf16.mxu0 %vm260_vm0, %v899_v7  ;;  %858 = vmatprep.mubr.msk.bf16.mxu1 %vm260_vm0, %v900_v8 }
  0x16   :  { %827 = vmatmul.mubr.msk.bf16.gmra.mxu0 %vm260_vm0, %v901_v9  ;;  %859 = vmatmul.mubr.msk.bf16.gmra.mxu1 %vm260_vm0, %v902_v10 }
  0x17   :  { %830 = vmatprep.mubr.msk.bf16.mxu0 %vm260_vm0, %v903_v11  ;;  %862 = vmatprep.mubr.msk.bf16.mxu1 %vm260_vm0, %v904_v12 }
  0x1e   :  { %831 = vmatmul.mubr.msk.bf16.gmra.mxu0 %vm260_vm0, %v905_v13  ;;  %863 = vmatmul.mubr.msk.bf16.gmra.mxu1 %vm260_vm0, %v906_v14 }
  0x1f   :  { %834 = vmatprep.mubr.msk.bf16.mxu0 %vm260_vm0, %v907_v15  ;;  %866 = vmatprep.mubr.msk.bf16.mxu1 %vm260_vm0, %v908_v16 }
  0x26   :  { %835 = vmatmul.mubr.msk.bf16.gmra.mxu0 %vm260_vm0, %v909_v17  ;;  %867 = vmatmul.mubr.msk.bf16.gmra.mxu1 %vm260_vm0, %v910_v18 }
  0x27   :  { %838 = vmatprep.mubr.msk.bf16.mxu0 %vm260_vm0, %v911_v19  ;;  %870 = vmatprep.mubr.msk.bf16.mxu1 %vm260_vm0, %v912_v20 }
  0x2e   :  { %839 = vmatmul.mubr.msk.bf16.gmra.mxu0 %vm260_vm0, %v913_v21  ;;  %871 = vmatmul.mubr.msk.bf16.gmra.mxu1 %vm260_vm0, %v914_v22 }
  0x2f   :  { %842 = vmatprep.mubr.msk.bf16.mxu0 %vm260_vm0, %v915_v23  ;;  %874 = vmatprep.mubr.msk.bf16.mxu1 %vm260_vm0, %v916_v24 }
  0x36   :  { %843 = vmatmul.mubr.msk.bf16.gmra.mxu0 %vm260_vm0, %v917_v25  ;;  %875 = vmatmul.mubr.msk.bf16.gmra.mxu1 %vm260_vm0, %v918_v26 }
  0x37   :  { %846 = vmatprep.mubr.msk.bf16.mxu0 %vm260_vm0, %v919_v27  ;;  %878 = vmatprep.mubr.msk.bf16.mxu1 %vm260_vm0, %v920_v28 }
  0x3e   :  { %847 = vmatmul.mubr.msk.bf16.gmra.mxu0 %vm260_vm0, %v921_v29  ;;  %879 = vmatmul.mubr.msk.bf16.gmra.mxu1 %vm260_vm0, %v922_v30 }
  0x3f   :  { %850 = vmatprep.mubr.msk.bf16.mxu0 %vm260_vm0, %v923_v31  ;;  %882 = vmatprep.mubr.msk.bf16.mxu1 %vm260_vm0, %v924_v32 }
  0x46   :  { %851 = vmatmul.mubr.msk.bf16.gmra.mxu0 %vm260_vm0, %v925_v33  ;;  %883 = vmatmul.mubr.msk.bf16.gmra.mxu1 %vm260_vm0, %v926_v34 }
  0xce   :  { %v824_v35 = vpop.f32.mrf.mxu0  ;;  %v856_v36 = vpop.f32.mrf.mxu1 }
  0xcf   :  { %648 = vst [vmem:[%s1273_s2 + $0x10] sm:$0xff] %v824_v35  ;;  %680 = vst [vmem:[%s1273_s2 + $0x110] sm:$0xff] %v856_v36 }
  0xd0   :  { %v391_v37 = vpop.f32.mrf.mxu0  ;;  %v519_v38 = vpop.f32.mrf.mxu1 }
  0xd1   :  { %646 = vst [vmem:[%s1273_s2] sm:$0xff] %v391_v37  ;;  %678 = vst [vmem:[%s1273_s2 + $0x100] sm:$0xff] %v519_v38 }
  0xd2   :  { %v825_v39 = vpop.f32.mrf.mxu0  ;;  %v857_v40 = vpop.f32.mrf.mxu1 }
  0xd3   :  { %649 = vst [vmem:[%s1273_s2 + $0x18] sm:$0xff] %v825_v39  ;;  %681 = vst [vmem:[%s1273_s2 + $0x118] sm:$0xff] %v857_v40 }
  0xd4   :  { %v394_v41 = vpop.f32.mrf.mxu0  ;;  %v522_v42 = vpop.f32.mrf.mxu1 }
  0xd5   :  { %647 = vst [vmem:[%s1273_s2 + $0x8] sm:$0xff] %v394_v41  ;;  %679 = vst [vmem:[%s1273_s2 + $0x108] sm:$0xff] %v522_v42 }
  0xd6   :  { %v828_v43 = vpop.f32.mrf.mxu0  ;;  %v860_v44 = vpop.f32.mrf.mxu1 }
  0xd7   :  { %652 = vst [vmem:[%s1273_s2 + $0x30] sm:$0xff] %v828_v43  ;;  %684 = vst [vmem:[%s1273_s2 + $0x130] sm:$0xff] %v860_v44 }
  0xd8   :  { %v407_v45 = vpop.f32.mrf.mxu0  ;;  %v535_v46 = vpop.f32.mrf.mxu1 }
  0xd9   :  { %650 = vst [vmem:[%s1273_s2 + $0x20] sm:$0xff] %v407_v45  ;;  %682 = vst [vmem:[%s1273_s2 + $0x120] sm:$0xff] %v535_v46 }
  0xda   :  { %v829_v47 = vpop.f32.mrf.mxu0  ;;  %v861_v48 = vpop.f32.mrf.mxu1 }
  0xdb   :  { %653 = vst [vmem:[%s1273_s2 + $0x38] sm:$0xff] %v829_v47  ;;  %685 = vst [vmem:[%s1273_s2 + $0x138] sm:$0xff] %v861_v48 }
  0xdc   :  { %v410_v49 = vpop.f32.mrf.mxu0  ;;  %v538_v50 = vpop.f32.mrf.mxu1 }
  0xdd   :  { %651 = vst [vmem:[%s1273_s2 + $0x28] sm:$0xff] %v410_v49  ;;  %683 = vst [vmem:[%s1273_s2 + $0x128] sm:$0xff] %v538_v50 }
  0xde   :  { %v832_v51 = vpop.f32.mrf.mxu0  ;;  %v864_v52 = vpop.f32.mrf.mxu1 }
  0xdf   :  { %656 = vst [vmem:[%s1273_s2 + $0x50] sm:$0xff] %v832_v51  ;;  %688 = vst [vmem:[%s1273_s2 + $0x150] sm:$0xff] %v864_v52 }
  0xe0   :  { %v423_v53 = vpop.f32.mrf.mxu0  ;;  %v551_v54 = vpop.f32.mrf.mxu1 }
  0xe1   :  { %654 = vst [vmem:[%s1273_s2 + $0x40] sm:$0xff] %v423_v53  ;;  %686 = vst [vmem:[%s1273_s2 + $0x140] sm:$0xff] %v551_v54 }
  0xe2   :  { %v833_v55 = vpop.f32.mrf.mxu0  ;;  %v865_v56 = vpop.f32.mrf.mxu1 }
  0xe3   :  { %657 = vst [vmem:[%s1273_s2 + $0x58] sm:$0xff] %v833_v55  ;;  %689 = vst [vmem:[%s1273_s2 + $0x158] sm:$0xff] %v865_v56 }
  0xe4   :  { %v426_v57 = vpop.f32.mrf.mxu0  ;;  %v554_v58 = vpop.f32.mrf.mxu1 }
  0xe5   :  { %655 = vst [vmem:[%s1273_s2 + $0x48] sm:$0xff] %v426_v57  ;;  %687 = vst [vmem:[%s1273_s2 + $0x148] sm:$0xff] %v554_v58 }
  0xe6   :  { %v836_v59 = vpop.f32.mrf.mxu0  ;;  %v868_v60 = vpop.f32.mrf.mxu1 }
  0xe7   :  { %660 = vst [vmem:[%s1273_s2 + $0x70] sm:$0xff] %v836_v59  ;;  %692 = vst [vmem:[%s1273_s2 + $0x170] sm:$0xff] %v868_v60 }
  0xe8   :  { %v439_v61 = vpop.f32.mrf.mxu0  ;;  %v567_v62 = vpop.f32.mrf.mxu1 }
  0xe9   :  { %658 = vst [vmem:[%s1273_s2 + $0x60] sm:$0xff] %v439_v61  ;;  %690 = vst [vmem:[%s1273_s2 + $0x160] sm:$0xff] %v567_v62 }
  0xea   :  { %v837_v63 = vpop.f32.mrf.mxu0  ;;  %v869_v0 = vpop.f32.mrf.mxu1 }
  0xeb   :  { %661 = vst [vmem:[%s1273_s2 + $0x78] sm:$0xff] %v837_v63  ;;  %693 = vst [vmem:[%s1273_s2 + $0x178] sm:$0xff] %v869_v0 }
  0xec   :  { %v442_v1 = vpop.f32.mrf.mxu0  ;;  %v570_v2 = vpop.f32.mrf.mxu1 }
  0xed   :  { %659 = vst [vmem:[%s1273_s2 + $0x68] sm:$0xff] %v442_v1  ;;  %691 = vst [vmem:[%s1273_s2 + $0x168] sm:$0xff] %v570_v2 }
  0xee   :  { %v840_v3 = vpop.f32.mrf.mxu0  ;;  %v872_v4 = vpop.f32.mrf.mxu1 }
  0xef   :  { %664 = vst [vmem:[%s1273_s2 + $0x90] sm:$0xff] %v840_v3  ;;  %696 = vst [vmem:[%s1273_s2 + $0x190] sm:$0xff] %v872_v4 }
  0xf0   :  { %v455_v5 = vpop.f32.mrf.mxu0  ;;  %v583_v6 = vpop.f32.mrf.mxu1 }
  0xf1   :  { %662 = vst [vmem:[%s1273_s2 + $0x80] sm:$0xff] %v455_v5  ;;  %694 = vst [vmem:[%s1273_s2 + $0x180] sm:$0xff] %v583_v6 }
  0xf2   :  { %v841_v7 = vpop.f32.mrf.mxu0  ;;  %v873_v8 = vpop.f32.mrf.mxu1 }
  0xf3   :  { %665 = vst [vmem:[%s1273_s2 + $0x98] sm:$0xff] %v841_v7  ;;  %697 = vst [vmem:[%s1273_s2 + $0x198] sm:$0xff] %v873_v8 }
  0xf4   :  { %v458_v9 = vpop.f32.mrf.mxu0  ;;  %v586_v10 = vpop.f32.mrf.mxu1 }
  0xf5   :  { %663 = vst [vmem:[%s1273_s2 + $0x88] sm:$0xff] %v458_v9  ;;  %695 = vst [vmem:[%s1273_s2 + $0x188] sm:$0xff] %v586_v10 }
  0xf6   :  { %v844_v11 = vpop.f32.mrf.mxu0  ;;  %v876_v12 = vpop.f32.mrf.mxu1 }
  0xf7   :  { %668 = vst [vmem:[%s1273_s2 + $0xb0] sm:$0xff] %v844_v11  ;;  %700 = vst [vmem:[%s1273_s2 + $0x1b0] sm:$0xff] %v876_v12 }
  0xf8   :  { %v471_v13 = vpop.f32.mrf.mxu0  ;;  %v599_v14 = vpop.f32.mrf.mxu1 }
  0xf9   :  { %666 = vst [vmem:[%s1273_s2 + $0xa0] sm:$0xff] %v471_v13  ;;  %698 = vst [vmem:[%s1273_s2 + $0x1a0] sm:$0xff] %v599_v14 }
  0xfa   :  { %v845_v15 = vpop.f32.mrf.mxu0  ;;  %v877_v16 = vpop.f32.mrf.mxu1 }
  0xfb   :  { %669 = vst [vmem:[%s1273_s2 + $0xb8] sm:$0xff] %v845_v15  ;;  %701 = vst [vmem:[%s1273_s2 + $0x1b8] sm:$0xff] %v877_v16 }
  0xfc   :  { %v474_v17 = vpop.f32.mrf.mxu0  ;;  %v602_v18 = vpop.f32.mrf.mxu1 }
  0xfd   :  { %667 = vst [vmem:[%s1273_s2 + $0xa8] sm:$0xff] %v474_v17  ;;  %699 = vst [vmem:[%s1273_s2 + $0x1a8] sm:$0xff] %v602_v18 }
  0xfe   :  { %v848_v19 = vpop.f32.mrf.mxu0  ;;  %v880_v20 = vpop.f32.mrf.mxu1 }
  0xff   :  { %672 = vst [vmem:[%s1273_s2 + $0xd0] sm:$0xff] %v848_v19  ;;  %704 = vst [vmem:[%s1273_s2 + $0x1d0] sm:$0xff] %v880_v20 }
 0x100   :  { %v487_v21 = vpop.f32.mrf.mxu0  ;;  %v615_v22 = vpop.f32.mrf.mxu1 }
 0x101   :  { %670 = vst [vmem:[%s1273_s2 + $0xc0] sm:$0xff] %v487_v21  ;;  %702 = vst [vmem:[%s1273_s2 + $0x1c0] sm:$0xff] %v615_v22 }
 0x102   :  { %v849_v23 = vpop.f32.mrf.mxu0  ;;  %v881_v24 = vpop.f32.mrf.mxu1 }
 0x103   :  { %673 = vst [vmem:[%s1273_s2 + $0xd8] sm:$0xff] %v849_v23  ;;  %705 = vst [vmem:[%s1273_s2 + $0x1d8] sm:$0xff] %v881_v24 }
 0x104   :  { %v490_v25 = vpop.f32.mrf.mxu0  ;;  %v618_v26 = vpop.f32.mrf.mxu1 }
 0x105   :  { %671 = vst [vmem:[%s1273_s2 + $0xc8] sm:$0xff] %v490_v25  ;;  %703 = vst [vmem:[%s1273_s2 + $0x1c8] sm:$0xff] %v618_v26 }
 0x106   :  { %v852_v27 = vpop.f32.mrf.mxu0  ;;  %v884_v28 = vpop.f32.mrf.mxu1 }
 0x107   :  { %676 = vst [vmem:[%s1273_s2 + $0xf0] sm:$0xff] %v852_v27  ;;  %708 = vst [vmem:[%s1273_s2 + $0x1f0] sm:$0xff] %v884_v28 }
 0x108   :  { %v503_v29 = vpop.f32.mrf.mxu0  ;;  %v631_v30 = vpop.f32.mrf.mxu1 }
 0x109   :  { %674 = vst [vmem:[%s1273_s2 + $0xe0] sm:$0xff] %v503_v29  ;;  %706 = vst [vmem:[%s1273_s2 + $0x1e0] sm:$0xff] %v631_v30 }
 0x10a   :  { %v853_v31 = vpop.f32.mrf.mxu0  ;;  %v885_v32 = vpop.f32.mrf.mxu1 }
 0x10b   :  { %677 = vst [vmem:[%s1273_s2 + $0xf8] sm:$0xff] %v853_v31  ;;  %709 = vst [vmem:[%s1273_s2 + $0x1f8] sm:$0xff] %v885_v32 }
 0x10c   :  { %v506_v33 = vpop.f32.mrf.mxu0  ;;  %v634_v34 = vpop.f32.mrf.mxu1 }
 0x10d   :  { %675 = vst [vmem:[%s1273_s2 + $0xe8] sm:$0xff] %v506_v33  ;;  %707 = vst [vmem:[%s1273_s2 + $0x1e8] sm:$0xff] %v634_v34 }

// kernel: _lambda_.26
= control target key start
LH: loop header
LB: loop body
LE: loop exit
PB: predicated region body
PF: predicated region fallthrough
CT: control target
= control target key end

     0   :  { %s464_s1 = inlined_call_operand.vmem [shape: bf16[128,128], index: 1, kind: input, shape index: {}]   ;;  %s465_s0 = inlined_call_operand.vmem [shape: bf16[128,128], index: 0, kind: input, shape index: {}]   ;;  %s466_s2 = inlined_call_operand.vmem [shape: f32[128,128], index: 2, kind: output, shape index: {}]  }
   0x1   :  { %v337_v0 = vld [vmem:[%s464_s1 + $0x38] sm:$0xff]   ;;  %v338_v1 = vld [vmem:[%s464_s1 + $0x30] sm:$0xff]   ;;  %v339_v2 = vld [vmem:[%s464_s1 + $0x28] sm:$0xff]  }
   0x2   :  { %289 = vmatprep.subr.bf16.mxu0 %v337_v0  ;;  %321 = vmatprep.subr.bf16.mxu1 %v337_v0  ;;  %v340_v3 = vld [vmem:[%s464_s1 + $0x20] sm:$0xff]   ;;  %v341_v6 = vld [vmem:[%s464_s1 + $0x18] sm:$0xff]   ;;  %v342_v7 = vld [vmem:[%s464_s1 + $0x10] sm:$0xff]  }
   0x3   :  { %290 = vmatpush3.bf16.msra.mxu0 %v337_v0  ;;  %329 = vmatpush3.bf16.msra.mxu1 %v337_v0  ;;  %v345_v4 = vld [vmem:[%s465_s0] sm:$0xff]   ;;  %v343_v8 = vld [vmem:[%s464_s1 + $0x8] sm:$0xff]   ;;  %v349_v12 = vld [vmem:[%s465_s0 + $0x10] sm:$0xff]  }
   0x4   :  { %291 = vmatprep.subr.bf16.mxu0 %v338_v1  ;;  %322 = vmatprep.subr.bf16.mxu1 %v338_v1  ;;  %v346_v5 = vld [vmem:[%s465_s0 + $0x20] sm:$0xff]   ;;  %v347_v10 = vld [vmem:[%s465_s0 + $0x8] sm:$0xff]   ;;  %v350_v13 = vld [vmem:[%s465_s0 + $0x30] sm:$0xff]  }
   0x5   :  { %305 = vmatprep.mubr.bf16.mxu0 %v345_v4  ;;  %313 = vmatprep.mubr.bf16.mxu1 %v346_v5  ;;  %v344_v9 = vld [vmem:[%s464_s1] sm:$0xff]   ;;  %v348_v11 = vld [vmem:[%s465_s0 + $0x28] sm:$0xff]   ;;  %v351_v14 = vld [vmem:[%s465_s0 + $0x18] sm:$0xff]  }
   0x6   :  { %v352_v15 = vld [vmem:[%s465_s0 + $0x38] sm:$0xff]  }
   0x7   :  { %292 = vmatpush3.bf16.msra.mxu0 %v338_v1  ;;  %330 = vmatpush3.bf16.msra.mxu1 %v338_v1 }
   0x8   :  { %293 = vmatprep.subr.bf16.mxu0 %v339_v2  ;;  %323 = vmatprep.subr.bf16.mxu1 %v339_v2 }
   0xb   :  { %294 = vmatpush3.bf16.msra.mxu0 %v339_v2  ;;  %331 = vmatpush3.bf16.msra.mxu1 %v339_v2 }
   0xc   :  { %295 = vmatprep.subr.bf16.mxu0 %v340_v3  ;;  %324 = vmatprep.subr.bf16.mxu1 %v340_v3 }
   0xf   :  { %296 = vmatpush3.bf16.msra.mxu0 %v340_v3  ;;  %332 = vmatpush3.bf16.msra.mxu1 %v340_v3 }
  0x10   :  { %297 = vmatprep.subr.bf16.mxu0 %v341_v6  ;;  %325 = vmatprep.subr.bf16.mxu1 %v341_v6 }
  0x13   :  { %298 = vmatpush3.bf16.msra.mxu0 %v341_v6  ;;  %333 = vmatpush3.bf16.msra.mxu1 %v341_v6 }
  0x14   :  { %299 = vmatprep.subr.bf16.mxu0 %v342_v7  ;;  %326 = vmatprep.subr.bf16.mxu1 %v342_v7 }
  0x17   :  { %300 = vmatpush3.bf16.msra.mxu0 %v342_v7  ;;  %334 = vmatpush3.bf16.msra.mxu1 %v342_v7 }
  0x18   :  { %301 = vmatprep.subr.bf16.mxu0 %v343_v8  ;;  %327 = vmatprep.subr.bf16.mxu1 %v343_v8 }
  0x1b   :  { %302 = vmatpush3.bf16.msra.mxu0 %v343_v8  ;;  %335 = vmatpush3.bf16.msra.mxu1 %v343_v8 }
  0x1c   :  { %303 = vmatprep.subr.bf16.mxu0 %v344_v9  ;;  %328 = vmatprep.subr.bf16.mxu1 %v344_v9 }
  0x1f   :  { %304 = vmatpush3.bf16.msra.mxu0 %v344_v9  ;;  %336 = vmatpush3.bf16.msra.mxu1 %v344_v9 }
  0x22   :  { %306 = vmatmul.mubr.bf16.vlgmr.msra.gmra.mxu0 %v347_v10  ;;  %314 = vmatmul.mubr.bf16.vlgmr.msra.gmra.mxu1 %v348_v11 }
  0x23   :  { %309 = vmatprep.mubr.bf16.mxu0 %v349_v12  ;;  %317 = vmatprep.mubr.bf16.mxu1 %v350_v13 }
  0x2a   :  { %310 = vmatmul.mubr.bf16.gmra.mxu0 %v351_v14  ;;  %318 = vmatmul.mubr.bf16.gmra.mxu1 %v352_v15 }
  0xe2   :  { %v307_v16 = vpop.f32.mrf.mxu0  ;;  %v315_v17 = vpop.f32.mrf.mxu1 }
  0xe3   :  { %239 = vst [vmem:[%s466_s2 + $0x10] sm:$0xff] %v307_v16  ;;  %247 = vst [vmem:[%s466_s2 + $0x50] sm:$0xff] %v315_v17 }
  0xe4   :  { %v174_v18 = vpop.f32.mrf.mxu0  ;;  %v206_v19 = vpop.f32.mrf.mxu1 }
  0xe5   :  { %237 = vst [vmem:[%s466_s2] sm:$0xff] %v174_v18  ;;  %245 = vst [vmem:[%s466_s2 + $0x40] sm:$0xff] %v206_v19 }
  0xe6   :  { %v308_v20 = vpop.f32.mrf.mxu0  ;;  %v316_v21 = vpop.f32.mrf.mxu1 }
  0xe7   :  { %240 = vst [vmem:[%s466_s2 + $0x18] sm:$0xff] %v308_v20  ;;  %248 = vst [vmem:[%s466_s2 + $0x58] sm:$0xff] %v316_v21 }
  0xe8   :  { %v177_v22 = vpop.f32.mrf.mxu0  ;;  %v209_v23 = vpop.f32.mrf.mxu1 }
  0xe9   :  { %238 = vst [vmem:[%s466_s2 + $0x8] sm:$0xff] %v177_v22  ;;  %246 = vst [vmem:[%s466_s2 + $0x48] sm:$0xff] %v209_v23 }
  0xea   :  { %v311_v24 = vpop.f32.mrf.mxu0  ;;  %v319_v25 = vpop.f32.mrf.mxu1 }
  0xeb   :  { %243 = vst [vmem:[%s466_s2 + $0x30] sm:$0xff] %v311_v24  ;;  %251 = vst [vmem:[%s466_s2 + $0x70] sm:$0xff] %v319_v25 }
  0xec   :  { %v190_v26 = vpop.f32.mrf.mxu0  ;;  %v222_v27 = vpop.f32.mrf.mxu1 }
  0xed   :  { %241 = vst [vmem:[%s466_s2 + $0x20] sm:$0xff] %v190_v26  ;;  %249 = vst [vmem:[%s466_s2 + $0x60] sm:$0xff] %v222_v27 }
  0xee   :  { %v312_v28 = vpop.f32.mrf.mxu0  ;;  %v320_v29 = vpop.f32.mrf.mxu1 }
  0xef   :  { %244 = vst [vmem:[%s466_s2 + $0x38] sm:$0xff] %v312_v28  ;;  %252 = vst [vmem:[%s466_s2 + $0x78] sm:$0xff] %v320_v29 }
  0xf0   :  { %v193_v30 = vpop.f32.mrf.mxu0  ;;  %v225_v31 = vpop.f32.mrf.mxu1 }
  0xf1   :  { %242 = vst [vmem:[%s466_s2 + $0x28] sm:$0xff] %v193_v30  ;;  %250 = vst [vmem:[%s466_s2 + $0x68] sm:$0xff] %v225_v31 }

// kernel: _lambda_.27
= control target key start
LH: loop header
LB: loop body
LE: loop exit
PB: predicated region body
PF: predicated region fallthrough
CT: control target
= control target key end

     0   :  { %vm14_vm0 = vcmask 122880   ;;  %vm101_vm1 = vcmask 130048   ;;  %v207_v0 = vmov 0.0   ;;  %s325_s0 = inlined_call_operand.vmem [shape: f32[128,16], index: 0, kind: input, shape index: {}]   ;;  %s326_s1 = inlined_call_operand.vmem [shape: f32[1,16], index: 1, kind: output, shape index: {0}]   ;;  %s327_s2 = inlined_call_operand.vmem [shape: f32[1,16], index: 2, kind: output, shape index: {1}]  }
   0x1   :  { %15 = vst.msk [vmem:[%s326_s1] sm:$0x1] %vm14_vm0, %v207_v0  ;;  %v17_v1 = vld [vmem:[%s325_s0] sm:$0xff]  ;;  %v18_v2 = vld [vmem:[%s325_s0 + $0x8] sm:$0xff]  ;;  %v19_v3 = vld [vmem:[%s325_s0 + $0x10] sm:$0xff] }
   0x2   :  { %16 = vst.msk [vmem:[%s327_s2] sm:$0x1] %vm14_vm0, %v207_v0  ;;  %v102_v4 = vsel %vm101_vm1, %v17_v1, 0.0  ;;  %v103_v5 = vsel %vm101_vm1, %v18_v2, 0.0  ;;  %v105_v6 = vsel %vm101_vm1, %v19_v3, 0.0  ;;  %v20_v7 = vld [vmem:[%s325_s0 + $0x18] sm:$0xff]  ;;  %v143_v15 = vmul.f32 %v17_v1, %v17_v1 }
   0x3   :  { %v104_v8 = vadd.f32 %v103_v5, %v102_v4  ;;  %v107_v9 = vsel %vm101_vm1, %v20_v7, 0.0  ;;  %v21_v10 = vld [vmem:[%s325_s0 + $0x20] sm:$0xff]  ;;  %v22_v13 = vld [vmem:[%s325_s0 + $0x28] sm:$0xff]  ;;  %v144_v16 = vmul.f32 %v18_v2, %v18_v2  ;;  %v145_v17 = vmul.f32 %v19_v3, %v19_v3  ;;  %v23_v19 = vld [vmem:[%s325_s0 + $0x30] sm:$0xff] }
   0x4   :  { %v109_v12 = vsel %vm101_vm1, %v21_v10, 0.0  ;;  %v111_v18 = vsel %vm101_vm1, %v22_v13, 0.0  ;;  %v146_v21 = vmul.f32 %v20_v7, %v20_v7  ;;  %v113_v22 = vsel %vm101_vm1, %v23_v19, 0.0  ;;  %v24_v24 = vld [vmem:[%s325_s0 + $0x38] sm:$0xff]  ;;  %v25_v31 = vld [vmem:[%s325_s0 + $0x40] sm:$0xff]  ;;  %v26_v37 = vld [vmem:[%s325_s0 + $0x48] sm:$0xff] }
   0x5   :  { %v106_v11 = vadd.f32 %v105_v6, %v104_v8  ;;  %v147_v23 = vmul.f32 %v21_v10, %v21_v10  ;;  %v159_v26 = vsel %vm101_vm1, %v143_v15, 0.0  ;;  %v160_v27 = vsel %vm101_vm1, %v144_v16, 0.0  ;;  %v27_v43 = vld [vmem:[%s325_s0 + $0x50] sm:$0xff]  ;;  %v28_v49 = vld [vmem:[%s325_s0 + $0x58] sm:$0xff]  ;;  %v29_v55 = vld [vmem:[%s325_s0 + $0x60] sm:$0xff] }
   0x6   :  { %v162_v28 = vsel %vm101_vm1, %v145_v17, 0.0  ;;  %v115_v29 = vsel %vm101_vm1, %v24_v24, 0.0  ;;  %v161_v30 = vadd.f32 %v160_v27, %v159_v26  ;;  %v148_v33 = vmul.f32 %v22_v13, %v22_v13  ;;  %v30_v61 = vld [vmem:[%s325_s0 + $0x68] sm:$0xff]  ;;  %v31_v3 = vld [vmem:[%s325_s0 + $0x70] sm:$0xff] }
   0x7   :  { %v108_v14 = vadd.f32 %v107_v9, %v106_v11  ;;  %v164_v34 = vsel %vm101_vm1, %v146_v21, 0.0  ;;  %v117_v35 = vsel %vm101_vm1, %v25_v31, 0.0  ;;  %v149_v39 = vmul.f32 %v23_v19, %v23_v19  ;;  %v32_v9 = vld [vmem:[%s325_s0 + $0x78] sm:$0xff] }
   0x8   :  { %v163_v36 = vadd.f32 %v162_v28, %v161_v30  ;;  %v166_v40 = vsel %vm101_vm1, %v147_v23, 0.0  ;;  %v119_v41 = vsel %vm101_vm1, %v26_v37, 0.0  ;;  %v150_v45 = vmul.f32 %v24_v24, %v24_v24 }
   0x9   :  { %v110_v20 = vadd.f32 %v109_v12, %v108_v14  ;;  %v168_v46 = vsel %vm101_vm1, %v148_v33, 0.0  ;;  %v121_v47 = vsel %vm101_vm1, %v27_v43, 0.0  ;;  %v151_v51 = vmul.f32 %v25_v31, %v25_v31 }
   0xa   :  { %v165_v42 = vadd.f32 %v164_v34, %v163_v36  ;;  %v170_v52 = vsel %vm101_vm1, %v149_v39, 0.0  ;;  %v123_v53 = vsel %vm101_vm1, %v28_v49, 0.0  ;;  %v152_v57 = vmul.f32 %v26_v37, %v26_v37  ;;  %v100_v36 = vld [vmem:[%s326_s1] sm:$0x1] }
   0xb   :  { %v112_v25 = vadd.f32 %v111_v18, %v110_v20  ;;  %v172_v58 = vsel %vm101_vm1, %v150_v45, 0.0  ;;  %v125_v59 = vsel %vm101_vm1, %v29_v55, 0.0  ;;  %v153_v63 = vmul.f32 %v27_v43, %v27_v43 }
   0xc   :  { %v167_v48 = vadd.f32 %v166_v40, %v165_v42  ;;  %v174_v0 = vsel %vm101_vm1, %v151_v51, 0.0  ;;  %v127_v1 = vsel %vm101_vm1, %v30_v61, 0.0  ;;  %v154_v5 = vmul.f32 %v28_v49, %v28_v49 }
   0xd   :  { %v114_v32 = vadd.f32 %v113_v22, %v112_v25  ;;  %v176_v6 = vsel %vm101_vm1, %v152_v57, 0.0  ;;  %v129_v7 = vsel %vm101_vm1, %v31_v3, 0.0  ;;  %v155_v11 = vmul.f32 %v29_v55, %v29_v55 }
   0xe   :  { %v169_v54 = vadd.f32 %v168_v46, %v167_v48  ;;  %v178_v12 = vsel %vm101_vm1, %v153_v63, 0.0  ;;  %v131_v13 = vsel %vm101_vm1, %v32_v9, 0.0  ;;  %v156_v16 = vmul.f32 %v30_v61, %v30_v61 }
   0xf   :  { %v116_v38 = vadd.f32 %v115_v29, %v114_v32  ;;  %v180_v17 = vsel %vm101_vm1, %v154_v5, 0.0  ;;  %v157_v20 = vmul.f32 %v31_v3, %v31_v3  ;;  %v182_v21 = vsel %vm101_vm1, %v155_v11, 0.0 }
  0x10   :  { %v171_v60 = vadd.f32 %v170_v52, %v169_v54  ;;  %v158_v24 = vmul.f32 %v32_v9, %v32_v9  ;;  %v184_v25 = vsel %vm101_vm1, %v156_v16, 0.0 }
  0x11   :  { %v118_v44 = vadd.f32 %v117_v35, %v116_v38  ;;  %v186_v28 = vsel %vm101_vm1, %v157_v20, 0.0 }
  0x12   :  { %v173_v2 = vadd.f32 %v172_v58, %v171_v60  ;;  %v188_v31 = vsel %vm101_vm1, %v158_v24, 0.0 }
  0x13   :  { %v120_v50 = vadd.f32 %v119_v41, %v118_v44  ;;  %v142_v44 = vld [vmem:[%s327_s2] sm:$0x1] }
  0x14   :  { %v175_v8 = vadd.f32 %v174_v0, %v173_v2 }
  0x15   :  { %v122_v56 = vadd.f32 %v121_v47, %v120_v50 }
  0x16   :  { %v177_v14 = vadd.f32 %v176_v6, %v175_v8 }
  0x17   :  { %v124_v62 = vadd.f32 %v123_v53, %v122_v56 }
  0x18   :  { %v179_v18 = vadd.f32 %v178_v12, %v177_v14 }
  0x19   :  { %v126_v4 = vadd.f32 %v125_v59, %v124_v62 }
  0x1a   :  { %v181_v22 = vadd.f32 %v180_v17, %v179_v18 }
  0x1b   :  { %v128_v10 = vadd.f32 %v127_v1, %v126_v4 }
  0x1c   :  { %v183_v26 = vadd.f32 %v182_v21, %v181_v22 }
  0x1d   :  { %v130_v15 = vadd.f32 %v129_v7, %v128_v10 }
  0x1e   :  { %v185_v29 = vadd.f32 %v184_v25, %v183_v26 }
  0x1f   :  { %v132_v19 = vadd.f32 %v131_v13, %v130_v15 }
  0x20   :  { %v187_v32 = vadd.f32 %v186_v28, %v185_v29 }
  0x21   :  { %v133_v23 = vrot.slane %v132_v19, 4 }
  0x22   :  { %v189_v34 = vadd.f32 %v188_v31, %v187_v32 }
  0x23   :  { %v134_v27 = vadd.f32 %v133_v23, %v132_v19 }
  0x24   :  { %v190_v37 = vrot.slane %v189_v34, 4 }
  0x25   :  { %v135_v30 = vrot.slane %v134_v27, 2 }
  0x26   :  { %v191_v39 = vadd.f32 %v190_v37, %v189_v34 }
  0x27   :  { %v136_v33 = vadd.f32 %v135_v30, %v134_v27 }
  0x28   :  { %v192_v41 = vrot.slane %v191_v39, 2 }
  0x29   :  { %v137_v35 = vrot.slane %v136_v33, 1 }
  0x2a   :  { %v193_v42 = vadd.f32 %v192_v41, %v191_v39 }
  0x2b   :  { %v138_v38 = vadd.f32 %v137_v35, %v136_v33 }
  0x2c   :  { %v194_v43 = vrot.slane %v193_v42, 1 }
  0x2d   :  { %v139_v40 = vadd.f32 %v138_v38, %v100_v36 }
  0x2e   :  { %v195_v45 = vadd.f32 %v194_v43, %v193_v42 }
  0x2f   :  { %141 = vst.msk [vmem:[%s326_s1] sm:$0x1] %vm14_vm0, %v139_v40 }
  0x30   :  { %v196_v46 = vadd.f32 %v195_v45, %v142_v44 }
  0x32   :  { %197 = vst.msk [vmem:[%s327_s2] sm:$0x1] %vm14_vm0, %v196_v46 }

// kernel: _lambda_.28
= control target key start
LH: loop header
LB: loop body
LE: loop exit
PB: predicated region body
PF: predicated region fallthrough
CT: control target
= control target key end

     0   :  { %vm76_vm0 = vcmask 130048   ;;  %s237_s0 = inlined_call_operand.vmem [shape: f32[128,16], index: 0, kind: input, shape index: {}]   ;;  %s238_s1 = inlined_call_operand.vmem [shape: f32[1,16], index: 1, kind: input, shape index: {}]   ;;  %s239_s2 = inlined_call_operand.vmem [shape: f32[1,16], index: 2, kind: input, shape index: {}]   ;;  %s240_s3 = inlined_call_operand.vmem [shape: f32[128,16], index: 3, kind: output, shape index: {}]  }
   0x1   :  { %v14_v0 = vld [vmem:[%s237_s0] sm:$0xff]  ;;  %v15_v4 = vld [vmem:[%s237_s0 + $0x8] sm:$0xff]  ;;  %v16_v5 = vld [vmem:[%s237_s0 + $0x10] sm:$0xff] }
   0x2   :  { %v97_v1 = vld [vmem:[%s238_s1] ss:$0 sm:$0xff]  ;;  %v17_v6 = vld [vmem:[%s237_s0 + $0x18] sm:$0xff]  ;;  %v19_v11 = vld [vmem:[%s237_s0 + $0x28] sm:$0xff] }
   0x3   :  { %v98_v2 = vld [vmem:[%s239_s2] ss:$0 sm:$0xff]  ;;  %v37_v3 = vmul.f32 %v97_v1, %v14_v0  ;;  %v38_v7 = vmul.f32 %v97_v1, %v15_v4  ;;  %v39_v8 = vmul.f32 %v97_v1, %v16_v5  ;;  %v40_v9 = vmul.f32 %v97_v1, %v17_v6  ;;  %v20_v12 = vld [vmem:[%s237_s0 + $0x30] sm:$0xff]  ;;  %v21_v17 = vld [vmem:[%s237_s0 + $0x38] sm:$0xff] }
   0x4   :  { %v18_v10 = vld [vmem:[%s237_s0 + $0x20] sm:$0xff]  ;;  %v42_v15 = vmul.f32 %v97_v1, %v19_v11  ;;  %v43_v16 = vmul.f32 %v97_v1, %v20_v12  ;;  %v23_v19 = vld [vmem:[%s237_s0 + $0x48] sm:$0xff]  ;;  %v44_v23 = vmul.f32 %v97_v1, %v21_v17  ;;  %v24_v24 = vld [vmem:[%s237_s0 + $0x50] sm:$0xff] }
   0x5   :  { %v60_v13 = vadd.f32 %v98_v2, %v37_v3  ;;  %v41_v14 = vmul.f32 %v97_v1, %v18_v10  ;;  %v22_v18 = vld [vmem:[%s237_s0 + $0x40] sm:$0xff]  ;;  %v61_v20 = vadd.f32 %v98_v2, %v38_v7  ;;  %v62_v21 = vadd.f32 %v98_v2, %v39_v8  ;;  %v25_v25 = vld [vmem:[%s237_s0 + $0x58] sm:$0xff]  ;;  %v27_v31 = vld [vmem:[%s237_s0 + $0x68] sm:$0xff] }
   0x6   :  { %v63_v22 = vadd.f32 %v98_v2, %v40_v9  ;;  %v26_v26 = vld [vmem:[%s237_s0 + $0x60] sm:$0xff]  ;;  %v65_v28 = vadd.f32 %v98_v2, %v42_v15  ;;  %v66_v29 = vadd.f32 %v98_v2, %v43_v16  ;;  %v45_v30 = vmul.f32 %v97_v1, %v22_v18  ;;  %v28_v32 = vld [vmem:[%s237_s0 + $0x70] sm:$0xff]  ;;  %v29_v33 = vld [vmem:[%s237_s0 + $0x78] sm:$0xff] }
   0x7   :  { %77 = vst.msk [vmem:[%s240_s3] sm:$0xff] %vm76_vm0, %v60_v13  ;;  %v64_v27 = vadd.f32 %v98_v2, %v41_v14  ;;  %78 = vst.msk [vmem:[%s240_s3 + $0x8] sm:$0xff] %vm76_vm0, %v61_v20  ;;  %v67_v34 = vadd.f32 %v98_v2, %v44_v23  ;;  %v46_v35 = vmul.f32 %v97_v1, %v23_v19 }
   0x8   :  { %79 = vst.msk [vmem:[%s240_s3 + $0x10] sm:$0xff] %vm76_vm0, %v62_v21  ;;  %80 = vst.msk [vmem:[%s240_s3 + $0x18] sm:$0xff] %vm76_vm0, %v63_v22  ;;  %v47_v36 = vmul.f32 %v97_v1, %v24_v24  ;;  %v48_v37 = vmul.f32 %v97_v1, %v25_v25  ;;  %v68_v38 = vadd.f32 %v98_v2, %v45_v30 }
   0x9   :  { %81 = vst.msk [vmem:[%s240_s3 + $0x20] sm:$0xff] %vm76_vm0, %v64_v27  ;;  %82 = vst.msk [vmem:[%s240_s3 + $0x28] sm:$0xff] %vm76_vm0, %v65_v28  ;;  %v49_v39 = vmul.f32 %v97_v1, %v26_v26  ;;  %v50_v40 = vmul.f32 %v97_v1, %v27_v31  ;;  %v51_v41 = vmul.f32 %v97_v1, %v28_v32 }
   0xa   :  { %83 = vst.msk [vmem:[%s240_s3 + $0x30] sm:$0xff] %vm76_vm0, %v66_v29  ;;  %84 = vst.msk [vmem:[%s240_s3 + $0x38] sm:$0xff] %vm76_vm0, %v67_v34  ;;  %v69_v42 = vadd.f32 %v98_v2, %v46_v35  ;;  %v70_v43 = vadd.f32 %v98_v2, %v47_v36  ;;  %v71_v44 = vadd.f32 %v98_v2, %v48_v37 }
   0xb   :  { %v52_v45 = vmul.f32 %v97_v1, %v29_v33  ;;  %85 = vst.msk [vmem:[%s240_s3 + $0x40] sm:$0xff] %vm76_vm0, %v68_v38  ;;  %v72_v46 = vadd.f32 %v98_v2, %v49_v39  ;;  %v73_v47 = vadd.f32 %v98_v2, %v50_v40  ;;  %v74_v48 = vadd.f32 %v98_v2, %v51_v41 }
   0xc   :  { %86 = vst.msk [vmem:[%s240_s3 + $0x48] sm:$0xff] %vm76_vm0, %v69_v42  ;;  %87 = vst.msk [vmem:[%s240_s3 + $0x50] sm:$0xff] %vm76_vm0, %v70_v43 }
   0xd   :  { %88 = vst.msk [vmem:[%s240_s3 + $0x58] sm:$0xff] %vm76_vm0, %v71_v44  ;;  %v75_v49 = vadd.f32 %v98_v2, %v52_v45  ;;  %89 = vst.msk [vmem:[%s240_s3 + $0x60] sm:$0xff] %vm76_vm0, %v72_v46 }
   0xe   :  { %90 = vst.msk [vmem:[%s240_s3 + $0x68] sm:$0xff] %vm76_vm0, %v73_v47  ;;  %91 = vst.msk [vmem:[%s240_s3 + $0x70] sm:$0xff] %vm76_vm0, %v74_v48 }
   0xf   :  { %92 = vst.msk [vmem:[%s240_s3 + $0x78] sm:$0xff] %vm76_vm0, %v75_v49 }

// kernel: _lambda_.31
= control target key start
LH: loop header
LB: loop body
LE: loop exit
PB: predicated region body
PF: predicated region fallthrough
CT: control target
= control target key end

     0   :  { %vm40_vm0 = vcmask 261120   ;;  %s101_s0 = inlined_call_operand.vmem [shape: f32[32,32], index: 0, kind: input, shape index: {}]   ;;  %s102_s1 = inlined_call_operand.vmem [shape: f32[1,32], index: 1, kind: input, shape index: {}]   ;;  %s103_s2 = inlined_call_operand.vmem [shape: f32[1,32], index: 2, kind: input, shape index: {}]   ;;  %s104_s3 = inlined_call_operand.vmem [shape: f32[32,32], index: 3, kind: output, shape index: {}]  }
   0x1   :  { %v14_v0 = vld [vmem:[%s101_s0] sm:$0xff]  ;;  %v15_v4 = vld [vmem:[%s101_s0 + $0x8] sm:$0xff]  ;;  %v16_v5 = vld [vmem:[%s101_s0 + $0x10] sm:$0xff] }
   0x2   :  { %v49_v1 = vld [vmem:[%s102_s1] ss:$0 sm:$0xff]  ;;  %v17_v6 = vld [vmem:[%s101_s0 + $0x18] sm:$0xff] }
   0x3   :  { %v50_v2 = vld [vmem:[%s103_s2] ss:$0 sm:$0xff]  ;;  %v25_v3 = vmul.f32 %v49_v1, %v14_v0  ;;  %v26_v7 = vmul.f32 %v49_v1, %v15_v4  ;;  %v27_v8 = vmul.f32 %v49_v1, %v16_v5  ;;  %v28_v9 = vmul.f32 %v49_v1, %v17_v6 }
   0x5   :  { %v36_v10 = vadd.f32 %v50_v2, %v25_v3  ;;  %v37_v11 = vadd.f32 %v50_v2, %v26_v7  ;;  %v38_v12 = vadd.f32 %v50_v2, %v27_v8  ;;  %v39_v13 = vadd.f32 %v50_v2, %v28_v9 }
   0x7   :  { %41 = vst.msk [vmem:[%s104_s3] sm:$0xff] %vm40_vm0, %v36_v10  ;;  %42 = vst.msk [vmem:[%s104_s3 + $0x8] sm:$0xff] %vm40_vm0, %v37_v11 }
   0x8   :  { %43 = vst.msk [vmem:[%s104_s3 + $0x10] sm:$0xff] %vm40_vm0, %v38_v12  ;;  %44 = vst.msk [vmem:[%s104_s3 + $0x18] sm:$0xff] %vm40_vm0, %v39_v13 }

// kernel: _lambda_.30
= control target key start
LH: loop header
LB: loop body
LE: loop exit
PB: predicated region body
PF: predicated region fallthrough
CT: control target
= control target key end

     0   :  { %vm14_vm0 = vcmask 253952   ;;  %vm41_vm1 = vcmask 261120   ;;  %v87_v0 = vmov 0.0   ;;  %s145_s0 = inlined_call_operand.vmem [shape: f32[32,32], index: 0, kind: input, shape index: {}]   ;;  %s146_s1 = inlined_call_operand.vmem [shape: f32[1,32], index: 1, kind: output, shape index: {0}]   ;;  %s147_s2 = inlined_call_operand.vmem [shape: f32[1,32], index: 2, kind: output, shape index: {1}]  }
   0x1   :  { %15 = vst.msk [vmem:[%s146_s1] sm:$0x1] %vm14_vm0, %v87_v0  ;;  %v17_v1 = vld [vmem:[%s145_s0] sm:$0xff]  ;;  %v18_v2 = vld [vmem:[%s145_s0 + $0x8] sm:$0xff]  ;;  %v19_v3 = vld [vmem:[%s145_s0 + $0x10] sm:$0xff] }
   0x2   :  { %16 = vst.msk [vmem:[%s147_s2] sm:$0x1] %vm14_vm0, %v87_v0  ;;  %v20_v4 = vld [vmem:[%s145_s0 + $0x18] sm:$0xff]  ;;  %v42_v5 = vsel %vm41_vm1, %v17_v1, 0.0  ;;  %v43_v6 = vsel %vm41_vm1, %v18_v2, 0.0  ;;  %v45_v7 = vsel %vm41_vm1, %v19_v3, 0.0  ;;  %v59_v8 = vmul.f32 %v17_v1, %v17_v1 }
   0x3   :  { %v44_v9 = vadd.f32 %v43_v6, %v42_v5  ;;  %v60_v10 = vmul.f32 %v18_v2, %v18_v2  ;;  %v61_v11 = vmul.f32 %v19_v3, %v19_v3  ;;  %v47_v12 = vsel %vm41_vm1, %v20_v4, 0.0 }
   0x4   :  { %v62_v13 = vmul.f32 %v20_v4, %v20_v4  ;;  %v63_v14 = vsel %vm41_vm1, %v59_v8, 0.0 }
   0x5   :  { %v46_v15 = vadd.f32 %v45_v7, %v44_v9  ;;  %v64_v16 = vsel %vm41_vm1, %v60_v10, 0.0  ;;  %v66_v17 = vsel %vm41_vm1, %v61_v11, 0.0 }
   0x6   :  { %v65_v18 = vadd.f32 %v64_v16, %v63_v14  ;;  %v68_v20 = vsel %vm41_vm1, %v62_v13, 0.0 }
   0x7   :  { %v48_v19 = vadd.f32 %v47_v12, %v46_v15 }
   0x8   :  { %v67_v21 = vadd.f32 %v66_v17, %v65_v18  ;;  %v40_v31 = vld [vmem:[%s146_s1] sm:$0x1] }
   0x9   :  { %v49_v22 = vrot.slane %v48_v19, 4  ;;  %v58_v36 = vld [vmem:[%s147_s2] sm:$0x1] }
   0xa   :  { %v69_v23 = vadd.f32 %v68_v20, %v67_v21 }
   0xb   :  { %v50_v24 = vadd.f32 %v49_v22, %v48_v19 }
   0xc   :  { %v70_v25 = vrot.slane %v69_v23, 4 }
   0xd   :  { %v51_v26 = vrot.slane %v50_v24, 2 }
   0xe   :  { %v71_v27 = vadd.f32 %v70_v25, %v69_v23 }
   0xf   :  { %v52_v28 = vadd.f32 %v51_v26, %v50_v24 }
  0x10   :  { %v72_v29 = vrot.slane %v71_v27, 2 }
  0x11   :  { %v53_v30 = vrot.slane %v52_v28, 1 }
  0x12   :  { %v73_v32 = vadd.f32 %v72_v29, %v71_v27 }
  0x13   :  { %v54_v33 = vadd.f32 %v53_v30, %v52_v28 }
  0x14   :  { %v74_v34 = vrot.slane %v73_v32, 1 }
  0x15   :  { %v55_v35 = vadd.f32 %v54_v33, %v40_v31 }
  0x16   :  { %v75_v37 = vadd.f32 %v74_v34, %v73_v32 }
  0x17   :  { %57 = vst.msk [vmem:[%s146_s1] sm:$0x1] %vm14_vm0, %v55_v35 }
  0x18   :  { %v76_v38 = vadd.f32 %v75_v37, %v58_v36 }
  0x1a   :  { %77 = vst.msk [vmem:[%s147_s2] sm:$0x1] %vm14_vm0, %v76_v38 }

// kernel: _lambda_.29
= control target key start
LH: loop header
LB: loop body
LE: loop exit
PB: predicated region body
PF: predicated region fallthrough
CT: control target
= control target key end

     0   :  { %s394_s1 = inlined_call_operand.vmem [shape: bf16[256,128], index: 1, kind: input, shape index: {}]   ;;  %s395_s0 = inlined_call_operand.vmem [shape: bf16[32,256], index: 0, kind: input, shape index: {}]   ;;  %s396_s2 = inlined_call_operand.vmem [shape: f32[32,128], index: 2, kind: output, shape index: {}]  }
   0x1   :  { %v285_v0 = vld [vmem:[%s394_s1 + $0x78] sm:$0xff]   ;;  %v287_v2 = vld [vmem:[%s394_s1 + $0x70] sm:$0xff]   ;;  %v289_v4 = vld [vmem:[%s394_s1 + $0x68] sm:$0xff]  }
   0x2   :  { %v286_v1 = vld [vmem:[%s394_s1 + $0x38] sm:$0xff]   ;;  %241 = vmatprep.subr.bf16.mxu0 %v285_v0  ;;  %269 = vmatprep.subr.bf16.mxu1 %v285_v0  ;;  %v288_v3 = vld [vmem:[%s394_s1 + $0x30] sm:$0xff]   ;;  %v290_v5 = vld [vmem:[%s394_s1 + $0x28] sm:$0xff]  }
   0x3   :  { %242 = vmatpush3.bf16.msra.mxu0 %v286_v1  ;;  %277 = vmatpush3.bf16.msra.mxu1 %v286_v1  ;;  %v291_v6 = vld [vmem:[%s394_s1 + $0x60] sm:$0xff]   ;;  %v293_v8 = vld [vmem:[%s394_s1 + $0x58] sm:$0xff]   ;;  %v295_v10 = vld [vmem:[%s394_s1 + $0x50] sm:$0xff]  }
   0x4   :  { %243 = vmatprep.subr.bf16.mxu0 %v287_v2  ;;  %270 = vmatprep.subr.bf16.mxu1 %v287_v2  ;;  %v292_v7 = vld [vmem:[%s394_s1 + $0x20] sm:$0xff]   ;;  %v294_v9 = vld [vmem:[%s394_s1 + $0x18] sm:$0xff]   ;;  %v296_v13 = vld [vmem:[%s394_s1 + $0x10] sm:$0xff]  }
   0x5   :  { %v303_v11 = vld [vmem:[%s395_s0 + $0x4] ss:$8 sps:$4 sm:$0xff]   ;;  %v306_v12 = vld [vmem:[%s395_s0 + $0x14] ss:$8 sps:$4 sm:$0xff]   ;;  %v301_v18 = vld [vmem:[%s395_s0] ss:$8 sps:$4 sm:$0xff]  }
   0x6   :  { %v297_v14 = vld [vmem:[%s394_s1 + $0x48] sm:$0xff]   ;;  %196 = vmatprep.mubr.bf16.mxu0 %v303_v11  ;;  %204 = vmatprep.mubr.bf16.mxu1 %v306_v12  ;;  %v299_v16 = vld [vmem:[%s394_s1 + $0x40] sm:$0xff]   ;;  %v304_v19 = vld [vmem:[%s395_s0 + $0x10] ss:$8 sps:$4 sm:$0xff]  }
   0x7   :  { %244 = vmatpush3.bf16.msra.mxu0 %v288_v3  ;;  %278 = vmatpush3.bf16.msra.mxu1 %v288_v3  ;;  %v298_v15 = vld [vmem:[%s394_s1 + $0x8] sm:$0xff]   ;;  %v300_v17 = vld [vmem:[%s394_s1] sm:$0xff]  }
   0x8   :  { %245 = vmatprep.subr.bf16.mxu0 %v289_v4  ;;  %271 = vmatprep.subr.bf16.mxu1 %v289_v4 }
   0xb   :  { %246 = vmatpush3.bf16.msra.mxu0 %v290_v5  ;;  %279 = vmatpush3.bf16.msra.mxu1 %v290_v5 }
   0xc   :  { %247 = vmatprep.subr.bf16.mxu0 %v291_v6  ;;  %272 = vmatprep.subr.bf16.mxu1 %v291_v6 }
   0xf   :  { %248 = vmatpush3.bf16.msra.mxu0 %v292_v7  ;;  %280 = vmatpush3.bf16.msra.mxu1 %v292_v7 }
  0x10   :  { %249 = vmatprep.subr.bf16.mxu0 %v293_v8  ;;  %273 = vmatprep.subr.bf16.mxu1 %v293_v8 }
  0x13   :  { %250 = vmatpush3.bf16.msra.mxu0 %v294_v9  ;;  %281 = vmatpush3.bf16.msra.mxu1 %v294_v9 }
  0x14   :  { %251 = vmatprep.subr.bf16.mxu0 %v295_v10  ;;  %274 = vmatprep.subr.bf16.mxu1 %v295_v10 }
  0x17   :  { %252 = vmatpush3.bf16.msra.mxu0 %v296_v13  ;;  %282 = vmatpush3.bf16.msra.mxu1 %v296_v13 }
  0x18   :  { %253 = vmatprep.subr.bf16.mxu0 %v297_v14  ;;  %275 = vmatprep.subr.bf16.mxu1 %v297_v14 }
  0x1b   :  { %254 = vmatpush3.bf16.msra.mxu0 %v298_v15  ;;  %283 = vmatpush3.bf16.msra.mxu1 %v298_v15 }
  0x1c   :  { %255 = vmatprep.subr.bf16.mxu0 %v299_v16  ;;  %276 = vmatprep.subr.bf16.mxu1 %v299_v16 }
  0x1f   :  { %256 = vmatpush3.bf16.msra.mxu0 %v300_v17  ;;  %284 = vmatpush3.bf16.msra.mxu1 %v300_v17 }
  0x22   :  { %197 = vmatmul.mubr.bf16.vlgmr.msra.gmra.mxu0 %v301_v18  ;;  %205 = vmatmul.mubr.bf16.vlgmr.msra.gmra.mxu1 %v304_v19 }
  0xe2   :  { %v257_v20 = vpop.f32.mrf.mxu0  ;;  %v263_v21 = vpop.f32.mrf.mxu1 }
  0xe4   :  { %v258_v22 = vpop.f32.mrf.mxu0  ;;  %v264_v23 = vpop.f32.mrf.mxu1 }
  0xe5   :  { %v259_v24 = vadd.f32 %v258_v22, %v257_v20  ;;  %v265_v25 = vadd.f32 %v264_v23, %v263_v21 }
  0xe6   :  { %v260_v26 = vpop.f32.mrf.mxu0  ;;  %v266_v27 = vpop.f32.mrf.mxu1 }
  0xe7   :  { %213 = vst [vmem:[%s396_s2] sm:$0xff] %v259_v24  ;;  %215 = vst [vmem:[%s396_s2 + $0x10] sm:$0xff] %v265_v25 }
  0xe8   :  { %v261_v28 = vpop.f32.mrf.mxu0  ;;  %v267_v29 = vpop.f32.mrf.mxu1 }
  0xe9   :  { %v262_v30 = vadd.f32 %v261_v28, %v260_v26  ;;  %v268_v31 = vadd.f32 %v267_v29, %v266_v27 }
  0xeb   :  { %214 = vst [vmem:[%s396_s2 + $0x8] sm:$0xff] %v262_v30  ;;  %216 = vst [vmem:[%s396_s2 + $0x18] sm:$0xff] %v268_v31 }

// kernel: _lambda_.32
= control target key start
LH: loop header
LB: loop body
LE: loop exit
PB: predicated region body
PF: predicated region fallthrough
CT: control target
= control target key end

     0   :  { %s605_s1 = inlined_call_operand.vmem [shape: bf16[512,128], index: 1, kind: input, shape index: {}]   ;;  %s606_s0 = inlined_call_operand.vmem [shape: bf16[8,512], index: 0, kind: input, shape index: {}]   ;;  %s607_s2 = inlined_call_operand.vmem [shape: f32[8,128], index: 2, kind: output, shape index: {}]  }
   0x1   :  { %v449_v0 = vld [vmem:[%s605_s1 + $0x78] sm:$0xff]   ;;  %v453_v4 = vld [vmem:[%s605_s1 + $0x70] sm:$0xff]   ;;  %v457_v8 = vld [vmem:[%s605_s1 + $0x68] sm:$0xff]  }
   0x2   :  { %v450_v1 = vld [vmem:[%s605_s1 + $0xf8] sm:$0xff]   ;;  %405 = vmatprep.subr.bf16.mxu0 %v449_v0  ;;  %v454_v5 = vld [vmem:[%s605_s1 + $0xf0] sm:$0xff]   ;;  %v458_v9 = vld [vmem:[%s605_s1 + $0xe8] sm:$0xff]  }
   0x3   :  { %v451_v2 = vld [vmem:[%s605_s1 + $0x38] sm:$0xff]   ;;  %427 = vmatprep.subr.bf16.mxu1 %v450_v1  ;;  %v455_v6 = vld [vmem:[%s605_s1 + $0x30] sm:$0xff]   ;;  %v459_v10 = vld [vmem:[%s605_s1 + $0x28] sm:$0xff]  }
   0x4   :  { %v452_v3 = vld [vmem:[%s605_s1 + $0xb8] sm:$0xff]   ;;  %406 = vmatpush3.bf16.msra.mxu0 %v451_v2  ;;  %v456_v7 = vld [vmem:[%s605_s1 + $0xb0] sm:$0xff]   ;;  %v460_v11 = vld [vmem:[%s605_s1 + $0xa8] sm:$0xff]  }
   0x5   :  { %428 = vmatpush3.bf16.msra.mxu1 %v452_v3  ;;  %407 = vmatprep.subr.bf16.mxu0 %v453_v4  ;;  %v461_v12 = vld [vmem:[%s605_s1 + $0x60] sm:$0xff]   ;;  %v465_v16 = vld [vmem:[%s605_s1 + $0x58] sm:$0xff]   ;;  %v469_v20 = vld [vmem:[%s605_s1 + $0x50] sm:$0xff]  }
   0x6   :  { %429 = vmatprep.subr.bf16.mxu1 %v454_v5  ;;  %v462_v13 = vld [vmem:[%s605_s1 + $0xe0] sm:$0xff]   ;;  %v466_v17 = vld [vmem:[%s605_s1 + $0xd8] sm:$0xff]   ;;  %v470_v21 = vld [vmem:[%s605_s1 + $0xd0] sm:$0xff]  }
   0x7   :  { %v463_v14 = vld [vmem:[%s605_s1 + $0x20] sm:$0xff]   ;;  %v467_v18 = vld [vmem:[%s605_s1 + $0x18] sm:$0xff]   ;;  %v471_v22 = vld [vmem:[%s605_s1 + $0x10] sm:$0xff]  }
   0x8   :  { %408 = vmatpush3.bf16.msra.mxu0 %v455_v6  ;;  %v464_v15 = vld [vmem:[%s605_s1 + $0xa0] sm:$0xff]   ;;  %v468_v19 = vld [vmem:[%s605_s1 + $0x98] sm:$0xff]   ;;  %v472_v23 = vld [vmem:[%s605_s1 + $0x90] sm:$0xff]  }
   0x9   :  { %430 = vmatpush3.bf16.msra.mxu1 %v456_v7  ;;  %409 = vmatprep.subr.bf16.mxu0 %v457_v8  ;;  %v473_v24 = vld [vmem:[%s605_s1 + $0x48] sm:$0xff]   ;;  %v477_v28 = vld [vmem:[%s605_s1 + $0x40] sm:$0xff]  }
   0xa   :  { %431 = vmatprep.subr.bf16.mxu1 %v458_v9  ;;  %v474_v25 = vld [vmem:[%s605_s1 + $0xc8] sm:$0xff]   ;;  %v478_v29 = vld [vmem:[%s605_s1 + $0xc0] sm:$0xff]  }
   0xb   :  { %v475_v26 = vld [vmem:[%s605_s1 + $0x8] sm:$0xff]   ;;  %v479_v30 = vld [vmem:[%s605_s1] sm:$0xff]  }
   0xc   :  { %410 = vmatpush3.bf16.msra.mxu0 %v459_v10  ;;  %v476_v27 = vld [vmem:[%s605_s1 + $0x88] sm:$0xff]   ;;  %v480_v31 = vld [vmem:[%s605_s1 + $0x80] sm:$0xff]  }
   0xd   :  { %432 = vmatpush3.bf16.msra.mxu1 %v460_v11  ;;  %411 = vmatprep.subr.bf16.mxu0 %v461_v12  ;;  %v12_v32 = vld [vmem:[%s606_s0] sm:$0xff]  ;;  %v13_v33 = vld [vmem:[%s606_s0 + $0x8] sm:$0xff] }
   0xe   :  { %433 = vmatprep.subr.bf16.mxu1 %v462_v13  ;;  %v369_v34 = vcombine.low %v12_v32, %v12_v32  ;;  %v370_v35 = vcombine.high %v12_v32, %v12_v32  ;;  %v371_v36 = vcombine.low %v13_v33, %v13_v33  ;;  %v372_v37 = vcombine.high %v13_v33, %v13_v33 }
  0x10   :  { %412 = vmatpush3.bf16.msra.mxu0 %v463_v14  ;;  %316 = vmatprep.mubr.bf16.mxu0 %v370_v35 }
  0x11   :  { %434 = vmatpush3.bf16.msra.mxu1 %v464_v15  ;;  %413 = vmatprep.subr.bf16.mxu0 %v465_v16 }
  0x12   :  { %435 = vmatprep.subr.bf16.mxu1 %v466_v17  ;;  %356 = vmatprep.mubr.bf16.mxu1 %v372_v37 }
  0x14   :  { %414 = vmatpush3.bf16.msra.mxu0 %v467_v18 }
  0x15   :  { %436 = vmatpush3.bf16.msra.mxu1 %v468_v19  ;;  %415 = vmatprep.subr.bf16.mxu0 %v469_v20 }
  0x16   :  { %437 = vmatprep.subr.bf16.mxu1 %v470_v21 }
  0x18   :  { %416 = vmatpush3.bf16.msra.mxu0 %v471_v22 }
  0x19   :  { %438 = vmatpush3.bf16.msra.mxu1 %v472_v23  ;;  %417 = vmatprep.subr.bf16.mxu0 %v473_v24 }
  0x1a   :  { %439 = vmatprep.subr.bf16.mxu1 %v474_v25 }
  0x1c   :  { %418 = vmatpush3.bf16.msra.mxu0 %v475_v26 }
  0x1d   :  { %440 = vmatpush3.bf16.msra.mxu1 %v476_v27  ;;  %419 = vmatprep.subr.bf16.mxu0 %v477_v28 }
  0x1e   :  { %441 = vmatprep.subr.bf16.mxu1 %v478_v29 }
  0x20   :  { %420 = vmatpush3.bf16.msra.mxu0 %v479_v30 }
  0x21   :  { %442 = vmatpush3.bf16.msra.mxu1 %v480_v31 }
  0x23   :  { %317 = vmatmul.mubr.bf16.vlgmr.msra.gmra.mxu0 %v369_v34 }
  0x24   :  { %357 = vmatmul.mubr.bf16.vlgmr.msra.gmra.mxu1 %v371_v36 }
  0xe3   :  { %v421_v38 = vpop.f32.mrf.mxu0 }
  0xe4   :  { %v443_v39 = vpop.f32.mrf.mxu1 }
  0xe5   :  { %v422_v40 = vpop.f32.mrf.mxu0 }
  0xe6   :  { %v444_v41 = vpop.f32.mrf.mxu1  ;;  %v423_v42 = vadd.f32 %v422_v40, %v421_v38 }
  0xe7   :  { %v445_v43 = vadd.f32 %v444_v41, %v443_v39  ;;  %v424_v44 = vpop.f32.mrf.mxu0 }
  0xe8   :  { %v446_v45 = vpop.f32.mrf.mxu1 }
  0xe9   :  { %v359_v46 = vadd.f32 %v445_v43, %v423_v42  ;;  %v425_v47 = vpop.f32.mrf.mxu0 }
  0xea   :  { %v447_v48 = vpop.f32.mrf.mxu1 }
  0xeb   :  { %364 = vst [vmem:[%s607_s2] sm:$0xff] %v359_v46 }

// kernel: _lambda_.34
= control target key start
LH: loop header
LB: loop body
LE: loop exit
PB: predicated region body
PF: predicated region fallthrough
CT: control target
= control target key end

     0   :  { %vm31_vm0 = vcmask 523264   ;;  %s71_s0 = inlined_call_operand.vmem [shape: f32[8,64], index: 0, kind: input, shape index: {}]   ;;  %s72_s1 = inlined_call_operand.vmem [shape: f32[1,64], index: 1, kind: input, shape index: {}]   ;;  %s73_s2 = inlined_call_operand.vmem [shape: f32[1,64], index: 2, kind: input, shape index: {}]   ;;  %s74_s3 = inlined_call_operand.vmem [shape: f32[8,64], index: 3, kind: output, shape index: {}]  }
   0x1   :  { %v14_v0 = vld [vmem:[%s71_s0] sm:$0xff] }
   0x2   :  { %v37_v1 = vld [vmem:[%s72_s1] ss:$0 sm:$0xff] }
   0x3   :  { %v38_v2 = vld [vmem:[%s73_s2] ss:$0 sm:$0xff]  ;;  %v22_v3 = vmul.f32 %v37_v1, %v14_v0 }
   0x5   :  { %v30_v4 = vadd.f32 %v38_v2, %v22_v3 }
   0x7   :  { %32 = vst.msk [vmem:[%s74_s3] sm:$0xff] %vm31_vm0, %v30_v4 }

// kernel: _lambda_.33
= control target key start
LH: loop header
LB: loop body
LE: loop exit
PB: predicated region body
PF: predicated region fallthrough
CT: control target
= control target key end

     0   :  { %vm14_vm0 = vcmask 516096   ;;  %vm26_vm1 = vcmask 523264   ;;  %v57_v0 = vmov 0.0   ;;  %s98_s0 = inlined_call_operand.vmem [shape: f32[8,64], index: 0, kind: input, shape index: {}]   ;;  %s99_s1 = inlined_call_operand.vmem [shape: f32[1,64], index: 1, kind: output, shape index: {0}]   ;;  %s100_s2 = inlined_call_operand.vmem [shape: f32[1,64], index: 2, kind: output, shape index: {1}]  }
   0x1   :  { %15 = vst.msk [vmem:[%s99_s1] sm:$0x1] %vm14_vm0, %v57_v0  ;;  %v17_v1 = vld [vmem:[%s98_s0] sm:$0xff]  ;;  %16 = vst.msk [vmem:[%s100_s2] sm:$0x1] %vm14_vm0, %v57_v0 }
   0x2   :  { %v27_v2 = vsel %vm26_vm1, %v17_v1, 0.0  ;;  %v38_v3 = vmul.f32 %v17_v1, %v17_v1 }
   0x3   :  { %v28_v4 = vrot.slane %v27_v2, 4 }
   0x4   :  { %v39_v5 = vsel %vm26_vm1, %v38_v3, 0.0 }
   0x5   :  { %v29_v6 = vadd.f32 %v28_v4, %v27_v2  ;;  %v40_v7 = vrot.slane %v39_v5, 4 }
   0x7   :  { %v30_v8 = vrot.slane %v29_v6, 2  ;;  %v41_v9 = vadd.f32 %v40_v7, %v39_v5 }
   0x8   :  { %v25_v14 = vld [vmem:[%s99_s1] sm:$0x1] }
   0x9   :  { %v31_v10 = vadd.f32 %v30_v8, %v29_v6  ;;  %v42_v11 = vrot.slane %v41_v9, 2  ;;  %v37_v17 = vld [vmem:[%s100_s2] sm:$0x1] }
   0xb   :  { %v32_v12 = vrot.slane %v31_v10, 1  ;;  %v43_v13 = vadd.f32 %v42_v11, %v41_v9 }
   0xd   :  { %v33_v15 = vadd.f32 %v32_v12, %v31_v10  ;;  %v44_v16 = vrot.slane %v43_v13, 1 }
   0xf   :  { %v34_v18 = vadd.f32 %v33_v15, %v25_v14  ;;  %v45_v19 = vadd.f32 %v44_v16, %v43_v13 }
  0x11   :  { %36 = vst.msk [vmem:[%s99_s1] sm:$0x1] %vm14_vm0, %v34_v18  ;;  %v46_v20 = vadd.f32 %v45_v19, %v37_v17 }
  0x13   :  { %47 = vst.msk [vmem:[%s100_s2] sm:$0x1] %vm14_vm0, %v46_v20 }

// kernel: _lambda_.36
= control target key start
LH: loop header
LB: loop body
LE: loop exit
PB: predicated region body
PF: predicated region fallthrough
CT: control target
= control target key end

     0   :  { %v463_v3 = vmov 0   ;;  %vm207_vm0 = vcmask 523264   ;;  %s593_s1 = inlined_call_operand.vmem [shape: bf16[64,1024], index: 1, kind: input, shape index: {}]   ;;  %s594_s0 = inlined_call_operand.vmem [shape: f32[2,64], index: 0, kind: input, shape index: {}]   ;;  %s595_s2 = inlined_call_operand.vmem [shape: f32[2,1024], index: 2, kind: output, shape index: {}]  }
   0x1   :  { %v39_v0 = vld [vmem:[%s593_s1 + $0xc0] sm:$0xff]  ;;  %v40_v2 = vld [vmem:[%s593_s1 + $0xc8] sm:$0xff]  ;;  %243 = vmatprep.mubr.bf16.mxu0 %v463_v3  ;;  %284 = vmatprep.mubr.bf16.mxu1 %v463_v3  ;;  %v41_v32 = vld [vmem:[%s593_s1 + $0xd0] sm:$0xff] }
   0x2   :  { %v43_v1 = vld [vmem:[%s593_s1 + $0xe0] sm:$0xff]  ;;  %v44_v5 = vld [vmem:[%s593_s1 + $0xe8] sm:$0xff]  ;;  %v45_v33 = vld [vmem:[%s593_s1 + $0xf0] sm:$0xff] }
   0x3   :  { %v450_v4 = vcombine.high %v39_v0, %v43_v1  ;;  %v449_v6 = vcombine.low %v39_v0, %v43_v1  ;;  %v31_v7 = vld [vmem:[%s593_s1 + $0x80] sm:$0xff]  ;;  %v452_v9 = vcombine.high %v40_v2, %v44_v5  ;;  %v451_v10 = vcombine.low %v40_v2, %v44_v5  ;;  %v32_v12 = vld [vmem:[%s593_s1 + $0x88] sm:$0xff]  ;;  %v42_v35 = vld [vmem:[%s593_s1 + $0xd8] sm:$0xff] }
   0x4   :  { %v35_v8 = vld [vmem:[%s593_s1 + $0xa0] sm:$0xff]  ;;  %v36_v13 = vld [vmem:[%s593_s1 + $0xa8] sm:$0xff]  ;;  %v46_v36 = vld [vmem:[%s593_s1 + $0xf8] sm:$0xff]  ;;  %v454_v39 = vcombine.high %v41_v32, %v45_v33  ;;  %v453_v46 = vcombine.low %v41_v32, %v45_v33 }
   0x5   :  { %v442_v11 = vcombine.high %v31_v7, %v35_v8  ;;  %v23_v14 = vld [vmem:[%s593_s1 + $0x40] sm:$0xff]  ;;  %219 = vmatprep.subr.bf16.mxu0 %v450_v4  ;;  %v444_v15 = vcombine.high %v32_v12, %v36_v13  ;;  %v24_v17 = vld [vmem:[%s593_s1 + $0x48] sm:$0xff]  ;;  %260 = vmatprep.subr.bf16.mxu1 %v452_v9  ;;  %v441_v19 = vcombine.low %v31_v7, %v35_v8  ;;  %v33_v41 = vld [vmem:[%s593_s1 + $0x90] sm:$0xff] }
   0x6   :  { %v27_v16 = vld [vmem:[%s593_s1 + $0x60] sm:$0xff]  ;;  %v28_v18 = vld [vmem:[%s593_s1 + $0x68] sm:$0xff]  ;;  %220 = vmatpush1.bf16.msra.mxu0 %v449_v6  ;;  %261 = vmatpush1.bf16.msra.mxu1 %v451_v10  ;;  %v443_v20 = vcombine.low %v32_v12, %v36_v13  ;;  %v456_v40 = vcombine.high %v42_v35, %v46_v36  ;;  %v37_v42 = vld [vmem:[%s593_s1 + $0xb0] sm:$0xff]  ;;  %v455_v47 = vcombine.low %v42_v35, %v46_v36  ;;  %v388_v6 = vlaneseq }
   0x7   :  { %221 = vmatprep.subr.bf16.mxu0 %v442_v11  ;;  %v434_v21 = vcombine.high %v23_v14, %v27_v16  ;;  %262 = vmatprep.subr.bf16.mxu1 %v444_v15  ;;  %v436_v22 = vcombine.high %v24_v17, %v28_v18  ;;  %v15_v23 = vld [vmem:[%s593_s1] sm:$0xff]  ;;  %v16_v25 = vld [vmem:[%s593_s1 + $0x8] sm:$0xff]  ;;  %v433_v27 = vcombine.low %v23_v14, %v27_v16  ;;  %v34_v44 = vld [vmem:[%s593_s1 + $0x98] sm:$0xff] }
   0x8   :  { %v19_v24 = vld [vmem:[%s593_s1 + $0x20] sm:$0xff]  ;;  %v20_v26 = vld [vmem:[%s593_s1 + $0x28] sm:$0xff]  ;;  %v435_v29 = vcombine.low %v24_v17, %v28_v18  ;;  %v38_v45 = vld [vmem:[%s593_s1 + $0xb8] sm:$0xff]  ;;  %v446_v48 = vcombine.high %v33_v41, %v37_v42  ;;  %v445_v54 = vcombine.low %v33_v41, %v37_v42  ;;  %v389_v8 = vshrl.u32 %v388_v6, 7 }
   0x9   :  { %v12_v28 = vld [vmem:[%s594_s0] sm:$0x3]  ;;  %v426_v30 = vcombine.high %v15_v23, %v19_v24  ;;  %v428_v31 = vcombine.high %v16_v25, %v20_v26  ;;  %v425_v37 = vcombine.low %v15_v23, %v19_v24  ;;  %v427_v38 = vcombine.low %v16_v25, %v20_v26  ;;  %v25_v50 = vld [vmem:[%s593_s1 + $0x50] sm:$0xff]  ;;  %v26_v52 = vld [vmem:[%s593_s1 + $0x58] sm:$0xff] }
   0xa   :  { %222 = vmatpush1.bf16.msra.mxu0 %v441_v19  ;;  %263 = vmatpush1.bf16.msra.mxu1 %v443_v20  ;;  %v13_v34 = vmax.f32 %v12_v28, 0.0  ;;  %v448_v49 = vcombine.high %v34_v44, %v38_v45  ;;  %v29_v51 = vld [vmem:[%s593_s1 + $0x70] sm:$0xff]  ;;  %v30_v53 = vld [vmem:[%s593_s1 + $0x78] sm:$0xff]  ;;  %v447_v55 = vcombine.low %v34_v44, %v38_v45 }
   0xb   :  { %223 = vmatprep.subr.bf16.mxu0 %v434_v21  ;;  %264 = vmatprep.subr.bf16.mxu1 %v436_v22  ;;  %v438_v56 = vcombine.high %v25_v50, %v29_v51  ;;  %v440_v57 = vcombine.high %v26_v52, %v30_v53  ;;  %v17_v58 = vld [vmem:[%s593_s1 + $0x10] sm:$0xff]  ;;  %v18_v60 = vld [vmem:[%s593_s1 + $0x18] sm:$0xff]  ;;  %v437_v62 = vcombine.low %v25_v50, %v29_v51 }
   0xc   :  { %v14_v43 = vpack.c.bf16 %v13_v34, %v13_v34  ;;  %v21_v59 = vld [vmem:[%s593_s1 + $0x30] sm:$0xff]  ;;  %v22_v61 = vld [vmem:[%s593_s1 + $0x38] sm:$0xff]  ;;  %v439_v63 = vcombine.low %v26_v52, %v30_v53 }
   0xd   :  { %v430_v0 = vcombine.high %v17_v58, %v21_v59  ;;  %v432_v1 = vcombine.high %v18_v60, %v22_v61  ;;  %v429_v2 = vcombine.low %v17_v58, %v21_v59  ;;  %v431_v4 = vcombine.low %v18_v60, %v22_v61 }
   0xe   :  { %224 = vmatpush1.bf16.msra.mxu0 %v433_v27  ;;  %265 = vmatpush1.bf16.msra.mxu1 %v435_v29 }
   0xf   :  { %225 = vmatprep.subr.bf16.mxu0 %v426_v30  ;;  %266 = vmatprep.subr.bf16.mxu1 %v428_v31 }
  0x12   :  { %226 = vmatpush1.bf16.msra.mxu0 %v425_v37  ;;  %267 = vmatpush1.bf16.msra.mxu1 %v427_v38 }
  0x13   :  { %301 = vmatprep.subr.bf16.mxu0 %v454_v39  ;;  %342 = vmatprep.subr.bf16.mxu1 %v456_v40 }
  0x15   :  { %457 = vmatmul.mubr.msk.bf16.vlgmr.msra.gmra.mxu0 %vm207_vm0, %v14_v43  ;;  %458 = vmatmul.mubr.msk.bf16.vlgmr.msra.gmra.mxu1 %vm207_vm0, %v14_v43 }
  0x16   :  { %302 = vmatpush1.bf16.msra.mxu0 %v453_v46  ;;  %343 = vmatpush1.bf16.msra.mxu1 %v455_v47 }
  0x17   :  { %303 = vmatprep.subr.bf16.mxu0 %v446_v48  ;;  %344 = vmatprep.subr.bf16.mxu1 %v448_v49 }
  0x18   :  { %325 = vmatprep.mubr.bf16.mxu0 %v463_v3  ;;  %366 = vmatprep.mubr.bf16.mxu1 %v463_v3  ;;  %v464_v3 = vmov 1983009808  }
  0x19   :  { %v386_v5 = vunpack.c.l.s4 %v464_v3 }
  0x1a   :  { %304 = vmatpush1.bf16.msra.mxu0 %v445_v54  ;;  %345 = vmatpush1.bf16.msra.mxu1 %v447_v55 }
  0x1b   :  { %305 = vmatprep.subr.bf16.mxu0 %v438_v56  ;;  %346 = vmatprep.subr.bf16.mxu1 %v440_v57  ;;  %v387_v7 = vunpack.c.0.s8 %v386_v5 }
  0x1d   :  { %v390_v11 = vsub.s32 %v387_v7, %v389_v8 }
  0x1e   :  { %306 = vmatpush1.bf16.msra.mxu0 %v437_v62  ;;  %347 = vmatpush1.bf16.msra.mxu1 %v439_v63 }
  0x1f   :  { %307 = vmatprep.subr.bf16.mxu0 %v430_v0  ;;  %348 = vmatprep.subr.bf16.mxu1 %v432_v1 }
  0x22   :  { %308 = vmatpush1.bf16.msra.mxu0 %v429_v2  ;;  %349 = vmatpush1.bf16.msra.mxu1 %v431_v4 }
  0x25   :  { %459 = vmatmul.mubr.msk.bf16.vlgmr.msra.gmra.mxu0 %vm207_vm0, %v14_v43  ;;  %460 = vmatmul.mubr.msk.bf16.vlgmr.msra.gmra.mxu1 %vm207_vm0, %v14_v43 }
  0xd5   :  { %v245_v9 = vpop.f32.mrf.mxu0  ;;  %v286_v10 = vpop.f32.mrf.mxu1 }
  0xd7   :  { %v247_v12 = vpop.f32.mrf.mxu0  ;;  %v288_v14 = vpop.f32.mrf.mxu1 }
  0xd8   :  { %v383_v13 = vcombine.low %v245_v9, %v247_v12  ;;  %v384_v15 = vcombine.low %v286_v10, %v288_v14 }
  0xd9   :  { %v249_v16 = vpop.f32.mrf.mxu0  ;;  %v290_v18 = vpop.f32.mrf.mxu1 }
  0xda   :  { %v391_v17 = vrot.slane %v383_v13, %v390_v11  ;;  %v398_v19 = vrot.slane %v384_v15, %v390_v11 }
  0xdb   :  { %v250_v20 = vpop.f32.mrf.mxu0  ;;  %v291_v21 = vpop.f32.mrf.mxu1 }
  0xdc   :  { %v399_v22 = vcombine.low %v391_v17, %v398_v19 }
  0xde   :  { %419 = vst [vmem:[%s595_s2] sm:$0xff] %v399_v22 }
  0xe5   :  { %v327_v23 = vpop.f32.mrf.mxu0  ;;  %v368_v24 = vpop.f32.mrf.mxu1 }
  0xe7   :  { %v329_v25 = vpop.f32.mrf.mxu0  ;;  %v370_v27 = vpop.f32.mrf.mxu1 }
  0xe8   :  { %v400_v26 = vcombine.low %v327_v23, %v329_v25  ;;  %v401_v28 = vcombine.low %v368_v24, %v370_v27 }
  0xe9   :  { %v331_v29 = vpop.f32.mrf.mxu0  ;;  %v372_v31 = vpop.f32.mrf.mxu1 }
  0xea   :  { %v408_v30 = vrot.slane %v400_v26, %v390_v11  ;;  %v415_v32 = vrot.slane %v401_v28, %v390_v11 }
  0xeb   :  { %v332_v33 = vpop.f32.mrf.mxu0  ;;  %v373_v34 = vpop.f32.mrf.mxu1 }
  0xec   :  { %v416_v35 = vcombine.low %v408_v30, %v415_v32 }
  0xee   :  { %420 = vst [vmem:[%s595_s2 + $0x8] sm:$0xff] %v416_v35 }

// kernel: _lambda_.35
= control target key start
LH: loop header
LB: loop body
LE: loop exit
PB: predicated region body
PF: predicated region fallthrough
CT: control target
= control target key end

     0   :  { %v966_v22 = vmov 1966171168   ;;  %v146_v24 = vlaneseq  ;;  %s1193_s1 = inlined_call_operand.vmem [shape: bf16[1024,128], index: 1, kind: input, shape index: {}]   ;;  %s1194_s0 = inlined_call_operand.vmem [shape: bf16[2,1024], index: 0, kind: input, shape index: {}]   ;;  %s1195_s2 = inlined_call_operand.vmem [shape: f32[2,128], index: 2, kind: output, shape index: {}]  }
   0x1   :  { %v901_v0 = vld [vmem:[%s1193_s1 + $0x78] sm:$0xff]   ;;  %v905_v4 = vld [vmem:[%s1193_s1 + $0x70] sm:$0xff]   ;;  %v909_v8 = vld [vmem:[%s1193_s1 + $0x68] sm:$0xff]   ;;  %v144_v23 = vunpack.c.l.s4 %v966_v22 }
   0x2   :  { %v902_v1 = vld [vmem:[%s1193_s1 + $0xf8] sm:$0xff]   ;;  %812 = vmatprep.subr.bf16.mxu0 %v901_v0  ;;  %v906_v5 = vld [vmem:[%s1193_s1 + $0xf0] sm:$0xff]   ;;  %v910_v9 = vld [vmem:[%s1193_s1 + $0xe8] sm:$0xff]   ;;  %v147_v30 = vshrl.u32 %v146_v24, 7 }
   0x3   :  { %v903_v2 = vld [vmem:[%s1193_s1 + $0x38] sm:$0xff]   ;;  %834 = vmatprep.subr.bf16.mxu1 %v902_v1  ;;  %v907_v6 = vld [vmem:[%s1193_s1 + $0x30] sm:$0xff]   ;;  %v911_v10 = vld [vmem:[%s1193_s1 + $0x28] sm:$0xff]   ;;  %v145_v29 = vunpack.c.0.s8 %v144_v23 }
   0x4   :  { %v904_v3 = vld [vmem:[%s1193_s1 + $0xb8] sm:$0xff]   ;;  %813 = vmatpush3.bf16.msra.mxu0 %v903_v2  ;;  %v908_v7 = vld [vmem:[%s1193_s1 + $0xb0] sm:$0xff]   ;;  %v912_v11 = vld [vmem:[%s1193_s1 + $0xa8] sm:$0xff]  }
   0x5   :  { %835 = vmatpush3.bf16.msra.mxu1 %v904_v3  ;;  %814 = vmatprep.subr.bf16.mxu0 %v905_v4  ;;  %v913_v12 = vld [vmem:[%s1193_s1 + $0x60] sm:$0xff]   ;;  %v917_v16 = vld [vmem:[%s1193_s1 + $0x58] sm:$0xff]   ;;  %v921_v20 = vld [vmem:[%s1193_s1 + $0x50] sm:$0xff]   ;;  %v1072_v35 = vsub.s32 %v145_v29, %v147_v30 }
   0x6   :  { %836 = vmatprep.subr.bf16.mxu1 %v906_v5  ;;  %v914_v13 = vld [vmem:[%s1193_s1 + $0xe0] sm:$0xff]   ;;  %v918_v17 = vld [vmem:[%s1193_s1 + $0xd8] sm:$0xff]   ;;  %v922_v21 = vld [vmem:[%s1193_s1 + $0xd0] sm:$0xff]  }
   0x7   :  { %v915_v14 = vld [vmem:[%s1193_s1 + $0x20] sm:$0xff]   ;;  %v919_v18 = vld [vmem:[%s1193_s1 + $0x18] sm:$0xff]   ;;  %v923_v25 = vld [vmem:[%s1193_s1 + $0x10] sm:$0xff]  }
   0x8   :  { %815 = vmatpush3.bf16.msra.mxu0 %v907_v6  ;;  %v916_v15 = vld [vmem:[%s1193_s1 + $0xa0] sm:$0xff]   ;;  %v920_v19 = vld [vmem:[%s1193_s1 + $0x98] sm:$0xff]   ;;  %v924_v26 = vld [vmem:[%s1193_s1 + $0x90] sm:$0xff]  }
   0x9   :  { %837 = vmatpush3.bf16.msra.mxu1 %v908_v7  ;;  %816 = vmatprep.subr.bf16.mxu0 %v909_v8  ;;  %v925_v27 = vld [vmem:[%s1193_s1 + $0x48] sm:$0xff]   ;;  %v929_v33 = vld [vmem:[%s1193_s1 + $0x40] sm:$0xff]   ;;  %v934_v41 = vld [vmem:[%s1193_s1 + $0x178] sm:$0xff]  }
   0xa   :  { %838 = vmatprep.subr.bf16.mxu1 %v910_v9  ;;  %v926_v28 = vld [vmem:[%s1193_s1 + $0xc8] sm:$0xff]   ;;  %v930_v34 = vld [vmem:[%s1193_s1 + $0xc0] sm:$0xff]   ;;  %v935_v42 = vld [vmem:[%s1193_s1 + $0x1f8] sm:$0xff]  }
   0xb   :  { %v927_v31 = vld [vmem:[%s1193_s1 + $0x8] sm:$0xff]   ;;  %v931_v36 = vld [vmem:[%s1193_s1] sm:$0xff]   ;;  %v936_v47 = vld [vmem:[%s1193_s1 + $0x138] sm:$0xff]  }
   0xc   :  { %817 = vmatpush3.bf16.msra.mxu0 %v911_v10  ;;  %v928_v32 = vld [vmem:[%s1193_s1 + $0x88] sm:$0xff]   ;;  %v932_v37 = vld [vmem:[%s1193_s1 + $0x80] sm:$0xff]   ;;  %v938_v50 = vld [vmem:[%s1193_s1 + $0x170] sm:$0xff]  }
   0xd   :  { %839 = vmatpush3.bf16.msra.mxu1 %v912_v11  ;;  %818 = vmatprep.subr.bf16.mxu0 %v913_v12  ;;  %v12_v38 = vld [vmem:[%s1194_s0] sm:$0xff]  ;;  %v937_v52 = vld [vmem:[%s1193_s1 + $0x1b8] sm:$0xff]   ;;  %v939_v54 = vld [vmem:[%s1193_s1 + $0x1f0] sm:$0xff]  }
   0xe   :  { %840 = vmatprep.subr.bf16.mxu1 %v914_v13  ;;  %v142_v39 = vcombine.high %v12_v38, %v12_v38  ;;  %v149_v40 = vrot.slane %v12_v38, %v1072_v35  ;;  %v940_v55 = vld [vmem:[%s1193_s1 + $0x130] sm:$0xff]   ;;  %v942_v57 = vld [vmem:[%s1193_s1 + $0x168] sm:$0xff]   ;;  %v946_v61 = vld [vmem:[%s1193_s1 + $0x160] sm:$0xff]  }
   0xf   :  { %v941_v58 = vld [vmem:[%s1193_s1 + $0x1b0] sm:$0xff]   ;;  %v943_v59 = vld [vmem:[%s1193_s1 + $0x1e8] sm:$0xff]   ;;  %v947_v63 = vld [vmem:[%s1193_s1 + $0x1e0] sm:$0xff]  }
  0x10   :  { %819 = vmatpush3.bf16.msra.mxu0 %v915_v14  ;;  %v157_v43 = vcombine.high %v149_v40, %v149_v40  ;;  %v165_v44 = vrot.slane %v149_v40, %v1072_v35  ;;  %v1092_v45 = vrot.slane %v142_v39, %v1072_v35  ;;  %v944_v60 = vld [vmem:[%s1193_s1 + $0x128] sm:$0xff]   ;;  %v948_v0 = vld [vmem:[%s1193_s1 + $0x120] sm:$0xff]   ;;  %v950_v1 = vld [vmem:[%s1193_s1 + $0x158] sm:$0xff]  }
  0x11   :  { %841 = vmatpush3.bf16.msra.mxu1 %v916_v15  ;;  %820 = vmatprep.subr.bf16.mxu0 %v917_v16  ;;  %v945_v62 = vld [vmem:[%s1193_s1 + $0x1a8] sm:$0xff]   ;;  %v949_v2 = vld [vmem:[%s1193_s1 + $0x1a0] sm:$0xff]   ;;  %v951_v3 = vld [vmem:[%s1193_s1 + $0x1d8] sm:$0xff]  }
  0x12   :  { %842 = vmatprep.subr.bf16.mxu1 %v918_v17  ;;  %v179_v46 = vrot.slane %v157_v43, %v1072_v35  ;;  %v158_v48 = vcombine.high %v1092_v45, %v1092_v45  ;;  %v187_v49 = vcombine.high %v165_v44, %v165_v44  ;;  %v952_v4 = vld [vmem:[%s1193_s1 + $0x118] sm:$0xff]   ;;  %v954_v5 = vld [vmem:[%s1193_s1 + $0x150] sm:$0xff]   ;;  %v958_v9 = vld [vmem:[%s1193_s1 + $0x148] sm:$0xff]   ;;  %v172_v17 = vrot.slane %v1092_v45, %v1072_v35 }
  0x13   :  { %v953_v6 = vld [vmem:[%s1193_s1 + $0x198] sm:$0xff]   ;;  %v955_v7 = vld [vmem:[%s1193_s1 + $0x1d0] sm:$0xff]   ;;  %v959_v11 = vld [vmem:[%s1193_s1 + $0x1c8] sm:$0xff]  }
  0x14   :  { %821 = vmatpush3.bf16.msra.mxu0 %v919_v18  ;;  %615 = vmatprep.mubr.bf16.mxu0 %v179_v46  ;;  %v189_v51 = vcombine.high %v179_v46, %v179_v46  ;;  %v186_v53 = vrot.slane %v158_v48, %v1072_v35  ;;  %v956_v8 = vld [vmem:[%s1193_s1 + $0x110] sm:$0xff]   ;;  %v960_v12 = vld [vmem:[%s1193_s1 + $0x108] sm:$0xff]   ;;  %v962_v13 = vld [vmem:[%s1193_s1 + $0x140] sm:$0xff]  }
  0x15   :  { %843 = vmatpush3.bf16.msra.mxu1 %v920_v19  ;;  %822 = vmatprep.subr.bf16.mxu0 %v921_v20  ;;  %v957_v10 = vld [vmem:[%s1193_s1 + $0x190] sm:$0xff]   ;;  %v961_v14 = vld [vmem:[%s1193_s1 + $0x188] sm:$0xff]   ;;  %v963_v15 = vld [vmem:[%s1193_s1 + $0x1c0] sm:$0xff]   ;;  %v188_v19 = vcombine.high %v172_v17, %v172_v17 }
  0x16   :  { %844 = vmatprep.subr.bf16.mxu1 %v922_v21  ;;  %655 = vmatprep.mubr.bf16.mxu1 %v189_v51  ;;  %v190_v56 = vcombine.high %v186_v53, %v186_v53  ;;  %v964_v16 = vld [vmem:[%s1193_s1 + $0x100] sm:$0xff]  }
  0x17   :  { %v965_v18 = vld [vmem:[%s1193_s1 + $0x180] sm:$0xff]  }
  0x18   :  { %823 = vmatpush3.bf16.msra.mxu0 %v923_v25 }
  0x19   :  { %845 = vmatpush3.bf16.msra.mxu1 %v924_v26  ;;  %824 = vmatprep.subr.bf16.mxu0 %v925_v27 }
  0x1a   :  { %846 = vmatprep.subr.bf16.mxu1 %v926_v28 }
  0x1c   :  { %825 = vmatpush3.bf16.msra.mxu0 %v927_v31 }
  0x1d   :  { %847 = vmatpush3.bf16.msra.mxu1 %v928_v32  ;;  %826 = vmatprep.subr.bf16.mxu0 %v929_v33 }
  0x1e   :  { %848 = vmatprep.subr.bf16.mxu1 %v930_v34 }
  0x20   :  { %827 = vmatpush3.bf16.msra.mxu0 %v931_v36 }
  0x21   :  { %849 = vmatpush3.bf16.msra.mxu1 %v932_v37  ;;  %856 = vmatprep.subr.bf16.mxu0 %v934_v41 }
  0x22   :  { %878 = vmatprep.subr.bf16.mxu1 %v935_v42 }
  0x23   :  { %616 = vmatmul.mubr.bf16.vlgmr.msra.gmra.mxu0 %v165_v44 }
  0x24   :  { %857 = vmatpush3.bf16.msra.mxu0 %v936_v47  ;;  %656 = vmatmul.mubr.bf16.vlgmr.msra.gmra.mxu1 %v187_v49 }
  0x25   :  { %858 = vmatprep.subr.bf16.mxu0 %v938_v50  ;;  %879 = vmatpush3.bf16.msra.mxu1 %v937_v52 }
  0x26   :  { %695 = vmatprep.mubr.bf16.mxu0 %v186_v53  ;;  %880 = vmatprep.subr.bf16.mxu1 %v939_v54 }
  0x27   :  { %735 = vmatprep.mubr.bf16.mxu1 %v190_v56 }
  0x28   :  { %859 = vmatpush3.bf16.msra.mxu0 %v940_v55 }
  0x29   :  { %860 = vmatprep.subr.bf16.mxu0 %v942_v57  ;;  %881 = vmatpush3.bf16.msra.mxu1 %v941_v58 }
  0x2a   :  { %882 = vmatprep.subr.bf16.mxu1 %v943_v59 }
  0x2c   :  { %861 = vmatpush3.bf16.msra.mxu0 %v944_v60 }
  0x2d   :  { %862 = vmatprep.subr.bf16.mxu0 %v946_v61  ;;  %883 = vmatpush3.bf16.msra.mxu1 %v945_v62 }
  0x2e   :  { %884 = vmatprep.subr.bf16.mxu1 %v947_v63 }
  0x30   :  { %863 = vmatpush3.bf16.msra.mxu0 %v948_v0 }
  0x31   :  { %864 = vmatprep.subr.bf16.mxu0 %v950_v1  ;;  %885 = vmatpush3.bf16.msra.mxu1 %v949_v2 }
  0x32   :  { %886 = vmatprep.subr.bf16.mxu1 %v951_v3 }
  0x34   :  { %865 = vmatpush3.bf16.msra.mxu0 %v952_v4 }
  0x35   :  { %866 = vmatprep.subr.bf16.mxu0 %v954_v5  ;;  %887 = vmatpush3.bf16.msra.mxu1 %v953_v6 }
  0x36   :  { %888 = vmatprep.subr.bf16.mxu1 %v955_v7 }
  0x38   :  { %867 = vmatpush3.bf16.msra.mxu0 %v956_v8 }
  0x39   :  { %868 = vmatprep.subr.bf16.mxu0 %v958_v9  ;;  %889 = vmatpush3.bf16.msra.mxu1 %v957_v10 }
  0x3a   :  { %890 = vmatprep.subr.bf16.mxu1 %v959_v11 }
  0x3c   :  { %869 = vmatpush3.bf16.msra.mxu0 %v960_v12 }
  0x3d   :  { %870 = vmatprep.subr.bf16.mxu0 %v962_v13  ;;  %891 = vmatpush3.bf16.msra.mxu1 %v961_v14 }
  0x3e   :  { %892 = vmatprep.subr.bf16.mxu1 %v963_v15 }
  0x40   :  { %871 = vmatpush3.bf16.msra.mxu0 %v964_v16 }
  0x41   :  { %893 = vmatpush3.bf16.msra.mxu1 %v965_v18 }
  0x43   :  { %696 = vmatmul.mubr.bf16.vlgmr.msra.gmra.mxu0 %v172_v17 }
  0x44   :  { %736 = vmatmul.mubr.bf16.vlgmr.msra.gmra.mxu1 %v188_v19 }
  0xe3   :  { %v828_v20 = vpop.f32.mrf.mxu0 }
  0xe4   :  { %v850_v21 = vpop.f32.mrf.mxu1 }
  0xe5   :  { %v829_v22 = vpop.f32.mrf.mxu0 }
  0xe6   :  { %v851_v23 = vpop.f32.mrf.mxu1  ;;  %v830_v28 = vadd.f32 %v829_v22, %v828_v20 }
  0xe7   :  { %v831_v24 = vpop.f32.mrf.mxu0  ;;  %v852_v29 = vadd.f32 %v851_v23, %v850_v21 }
  0xe8   :  { %v853_v25 = vpop.f32.mrf.mxu1 }
  0xe9   :  { %v832_v26 = vpop.f32.mrf.mxu0  ;;  %v658_v33 = vadd.f32 %v852_v29, %v830_v28 }
  0xea   :  { %v854_v27 = vpop.f32.mrf.mxu1 }
 0x103   :  { %v872_v30 = vpop.f32.mrf.mxu0 }
 0x104   :  { %v894_v31 = vpop.f32.mrf.mxu1 }
 0x105   :  { %v873_v32 = vpop.f32.mrf.mxu0 }
 0x106   :  { %v874_v34 = vadd.f32 %v873_v32, %v872_v30  ;;  %v895_v35 = vpop.f32.mrf.mxu1 }
 0x107   :  { %v875_v36 = vpop.f32.mrf.mxu0  ;;  %v896_v38 = vadd.f32 %v895_v35, %v894_v31 }
 0x108   :  { %v698_v37 = vadd.f32 %v874_v34, %v658_v33  ;;  %v897_v39 = vpop.f32.mrf.mxu1 }
 0x109   :  { %v876_v40 = vpop.f32.mrf.mxu0 }
 0x10a   :  { %v738_v41 = vadd.f32 %v896_v38, %v698_v37  ;;  %v898_v42 = vpop.f32.mrf.mxu1 }
 0x10c   :  { %743 = vst [vmem:[%s1195_s2] sm:$0x3] %v738_v41 }

// kernel: _lambda_.39
= control target key start
LH: loop header
LB: loop body
LE: loop exit
PB: predicated region body
PF: predicated region fallthrough
CT: control target
= control target key end

     0   :  { %v378_v1 = vmov 0   ;;  %s505_s1 = inlined_call_operand.vmem [shape: bf16[128,512], index: 1, kind: input, shape index: {}]   ;;  %s506_s0 = inlined_call_operand.vmem [shape: f32[8,128], index: 0, kind: input, shape index: {}]   ;;  %s507_s2 = inlined_call_operand.vmem [shape: f32[8,512], index: 2, kind: output, shape index: {}]  }
   0x1   :  { %v330_v0 = vld [vmem:[%s505_s1 + $0xe4] ss:$16 sps:$4 sm:$0xff]   ;;  %239 = vmatprep.mubr.bf16.mxu0 %v378_v1  ;;  %280 = vmatprep.mubr.bf16.mxu1 %v378_v1  ;;  %v332_v2 = vld [vmem:[%s505_s1 + $0xec] ss:$16 sps:$4 sm:$0xff]   ;;  %v334_v3 = vld [vmem:[%s505_s1 + $0xe0] ss:$16 sps:$4 sm:$0xff]  }
   0x2   :  { %207 = vmatprep.subr.bf16.mxu0 %v330_v0  ;;  %v335_v4 = vld [vmem:[%s505_s1 + $0xe8] ss:$16 sps:$4 sm:$0xff]   ;;  %248 = vmatprep.subr.bf16.mxu1 %v332_v2  ;;  %v336_v5 = vld [vmem:[%s505_s1 + $0xc4] ss:$16 sps:$4 sm:$0xff]   ;;  %v338_v6 = vld [vmem:[%s505_s1 + $0xcc] ss:$16 sps:$4 sm:$0xff]  }
   0x3   :  { %208 = vmatpush1.bf16.msra.mxu0 %v334_v3  ;;  %249 = vmatpush1.bf16.msra.mxu1 %v335_v4  ;;  %v340_v7 = vld [vmem:[%s505_s1 + $0xc0] ss:$16 sps:$4 sm:$0xff]   ;;  %v341_v8 = vld [vmem:[%s505_s1 + $0xc8] ss:$16 sps:$4 sm:$0xff]   ;;  %v342_v9 = vld [vmem:[%s505_s1 + $0xa4] ss:$16 sps:$4 sm:$0xff]  }
   0x4   :  { %209 = vmatprep.subr.bf16.mxu0 %v336_v5  ;;  %250 = vmatprep.subr.bf16.mxu1 %v338_v6  ;;  %v344_v10 = vld [vmem:[%s505_s1 + $0xac] ss:$16 sps:$4 sm:$0xff]   ;;  %v346_v11 = vld [vmem:[%s505_s1 + $0xa0] ss:$16 sps:$4 sm:$0xff]   ;;  %v347_v12 = vld [vmem:[%s505_s1 + $0xa8] ss:$16 sps:$4 sm:$0xff]  }
   0x5   :  { %v348_v13 = vld [vmem:[%s505_s1 + $0x84] ss:$16 sps:$4 sm:$0xff]   ;;  %v350_v14 = vld [vmem:[%s505_s1 + $0x8c] ss:$16 sps:$4 sm:$0xff]   ;;  %v352_v15 = vld [vmem:[%s505_s1 + $0x80] ss:$16 sps:$4 sm:$0xff]  }
   0x6   :  { %v353_v16 = vld [vmem:[%s505_s1 + $0x88] ss:$16 sps:$4 sm:$0xff]   ;;  %v354_v17 = vld [vmem:[%s505_s1 + $0x64] ss:$16 sps:$4 sm:$0xff]   ;;  %v356_v18 = vld [vmem:[%s505_s1 + $0x6c] ss:$16 sps:$4 sm:$0xff]  }
   0x7   :  { %210 = vmatpush1.bf16.msra.mxu0 %v340_v7  ;;  %251 = vmatpush1.bf16.msra.mxu1 %v341_v8  ;;  %v358_v19 = vld [vmem:[%s505_s1 + $0x60] ss:$16 sps:$4 sm:$0xff]   ;;  %v359_v20 = vld [vmem:[%s505_s1 + $0x68] ss:$16 sps:$4 sm:$0xff]   ;;  %v360_v21 = vld [vmem:[%s505_s1 + $0x44] ss:$16 sps:$4 sm:$0xff]  }
   0x8   :  { %211 = vmatprep.subr.bf16.mxu0 %v342_v9  ;;  %252 = vmatprep.subr.bf16.mxu1 %v344_v10  ;;  %v362_v22 = vld [vmem:[%s505_s1 + $0x4c] ss:$16 sps:$4 sm:$0xff]   ;;  %v364_v23 = vld [vmem:[%s505_s1 + $0x40] ss:$16 sps:$4 sm:$0xff]   ;;  %v365_v24 = vld [vmem:[%s505_s1 + $0x48] ss:$16 sps:$4 sm:$0xff]  }
   0x9   :  { %v366_v25 = vld [vmem:[%s505_s1 + $0x24] ss:$16 sps:$4 sm:$0xff]   ;;  %v368_v26 = vld [vmem:[%s505_s1 + $0x2c] ss:$16 sps:$4 sm:$0xff]   ;;  %v370_v27 = vld [vmem:[%s505_s1 + $0x20] ss:$16 sps:$4 sm:$0xff]  }
   0xa   :  { %v371_v28 = vld [vmem:[%s505_s1 + $0x28] ss:$16 sps:$4 sm:$0xff]   ;;  %v12_v29 = vld [vmem:[%s506_s0] sm:$0xff]  ;;  %v374_v31 = vld [vmem:[%s505_s1 + $0xc] ss:$16 sps:$4 sm:$0xff]  }
   0xb   :  { %212 = vmatpush1.bf16.msra.mxu0 %v346_v11  ;;  %253 = vmatpush1.bf16.msra.mxu1 %v347_v12  ;;  %v372_v30 = vld [vmem:[%s505_s1 + $0x4] ss:$16 sps:$4 sm:$0xff]   ;;  %v13_v32 = vmax.f32 %v12_v29, 0.0  ;;  %v376_v33 = vld [vmem:[%s505_s1] ss:$16 sps:$4 sm:$0xff]  }
   0xc   :  { %213 = vmatprep.subr.bf16.mxu0 %v348_v13  ;;  %254 = vmatprep.subr.bf16.mxu1 %v350_v14  ;;  %v377_v34 = vld [vmem:[%s505_s1 + $0x8] ss:$16 sps:$4 sm:$0xff]  }
   0xd   :  { %v14_v35 = vpack.c.bf16 %v13_v32, %v13_v32 }
   0xf   :  { %214 = vmatpush1.bf16.msra.mxu0 %v352_v15  ;;  %255 = vmatpush1.bf16.msra.mxu1 %v353_v16 }
  0x10   :  { %215 = vmatprep.subr.bf16.mxu0 %v354_v17  ;;  %256 = vmatprep.subr.bf16.mxu1 %v356_v18 }
  0x13   :  { %216 = vmatpush1.bf16.msra.mxu0 %v358_v19  ;;  %257 = vmatpush1.bf16.msra.mxu1 %v359_v20 }
  0x14   :  { %217 = vmatprep.subr.bf16.mxu0 %v360_v21  ;;  %258 = vmatprep.subr.bf16.mxu1 %v362_v22 }
  0x17   :  { %218 = vmatpush1.bf16.msra.mxu0 %v364_v23  ;;  %259 = vmatpush1.bf16.msra.mxu1 %v365_v24 }
  0x18   :  { %219 = vmatprep.subr.bf16.mxu0 %v366_v25  ;;  %260 = vmatprep.subr.bf16.mxu1 %v368_v26 }
  0x1b   :  { %220 = vmatpush1.bf16.msra.mxu0 %v370_v27  ;;  %261 = vmatpush1.bf16.msra.mxu1 %v371_v28 }
  0x1c   :  { %221 = vmatprep.subr.bf16.mxu0 %v372_v30  ;;  %262 = vmatprep.subr.bf16.mxu1 %v374_v31 }
  0x1f   :  { %222 = vmatpush1.bf16.msra.mxu0 %v376_v33  ;;  %263 = vmatpush1.bf16.msra.mxu1 %v377_v34 }
  0x22   :  { %240 = vmatmul.mubr.bf16.vlgmr.msra.gmra.mxu0 %v14_v35  ;;  %281 = vmatmul.mubr.bf16.vlgmr.msra.gmra.mxu1 %v14_v35 }
  0xe2   :  { %v241_v36 = vpop.f32.mrf.mxu0  ;;  %v282_v37 = vpop.f32.mrf.mxu1 }
  0xe3   :  { %289 = vst [vmem:[%s507_s2] sm:$0xff] %v241_v36  ;;  %291 = vst [vmem:[%s507_s2 + $0x10] sm:$0xff] %v282_v37 }
  0xe4   :  { %v243_v38 = vpop.f32.mrf.mxu0  ;;  %v284_v39 = vpop.f32.mrf.mxu1 }
  0xe5   :  { %290 = vst [vmem:[%s507_s2 + $0x8] sm:$0xff] %v243_v38  ;;  %292 = vst [vmem:[%s507_s2 + $0x18] sm:$0xff] %v284_v39 }
  0xe6   :  { %v245_v40 = vpop.f32.mrf.mxu0  ;;  %v286_v41 = vpop.f32.mrf.mxu1 }
  0xe8   :  { %v246_v42 = vpop.f32.mrf.mxu0  ;;  %v287_v43 = vpop.f32.mrf.mxu1 }

// kernel: _lambda_.42
= control target key start
LH: loop header
LB: loop body
LE: loop exit
PB: predicated region body
PF: predicated region fallthrough
CT: control target
= control target key end

     0   :  { %v173_v1 = vmov 0   ;;  %vm70_vm0 = vcmask 523264   ;;  %s249_s1 = inlined_call_operand.vmem [shape: bf16[64,256], index: 1, kind: input, shape index: {}]   ;;  %s250_s0 = inlined_call_operand.vmem [shape: f32[32,64], index: 0, kind: input, shape index: {}]   ;;  %s251_s2 = inlined_call_operand.vmem [shape: f32[32,256], index: 2, kind: output, shape index: {}]  }
   0x1   :  { %v161_v0 = vld [vmem:[%s249_s1 + $0x34] ss:$8 sps:$4 sm:$0xff]   ;;  %109 = vmatprep.mubr.bf16.mxu0 %v173_v1  ;;  %119 = vmatprep.mubr.bf16.mxu1 %v173_v1  ;;  %v163_v2 = vld [vmem:[%s249_s1 + $0x30] ss:$8 sps:$4 sm:$0xff]   ;;  %v164_v3 = vld [vmem:[%s249_s1 + $0x24] ss:$8 sps:$4 sm:$0xff]  }
   0x2   :  { %85 = vmatprep.subr.bf16.mxu0 %v161_v0  ;;  %152 = vmatprep.subr.bf16.mxu1 %v161_v0  ;;  %v166_v4 = vld [vmem:[%s249_s1 + $0x20] ss:$8 sps:$4 sm:$0xff]   ;;  %v167_v5 = vld [vmem:[%s249_s1 + $0x14] ss:$8 sps:$4 sm:$0xff]   ;;  %v169_v6 = vld [vmem:[%s249_s1 + $0x10] ss:$8 sps:$4 sm:$0xff]  }
   0x3   :  { %86 = vmatpush1.bf16.msra.mxu0 %v163_v2  ;;  %156 = vmatpush1.bf16.msra.mxu1 %v163_v2  ;;  %v12_v7 = vld [vmem:[%s250_s0] sm:$0xff]  ;;  %v13_v8 = vld [vmem:[%s250_s0 + $0x8] sm:$0xff]  ;;  %v14_v9 = vld [vmem:[%s250_s0 + $0x10] sm:$0xff] }
   0x4   :  { %87 = vmatprep.subr.bf16.mxu0 %v164_v3  ;;  %153 = vmatprep.subr.bf16.mxu1 %v164_v3  ;;  %v15_v10 = vld [vmem:[%s250_s0 + $0x18] sm:$0xff]  ;;  %v170_v11 = vld [vmem:[%s249_s1 + $0x4] ss:$8 sps:$4 sm:$0xff]   ;;  %v16_v12 = vmax.f32 %v12_v7, 0.0  ;;  %v17_v13 = vmax.f32 %v13_v8, 0.0  ;;  %v18_v14 = vmax.f32 %v14_v9, 0.0 }
   0x5   :  { %v19_v15 = vmax.f32 %v15_v10, 0.0  ;;  %v172_v16 = vld [vmem:[%s249_s1] ss:$8 sps:$4 sm:$0xff]  }
   0x6   :  { %v20_v17 = vpack.c.bf16 %v17_v13, %v16_v12 }
   0x7   :  { %88 = vmatpush1.bf16.msra.mxu0 %v166_v4  ;;  %157 = vmatpush1.bf16.msra.mxu1 %v166_v4  ;;  %v21_v18 = vpack.c.bf16 %v19_v15, %v18_v14 }
   0x8   :  { %89 = vmatprep.subr.bf16.mxu0 %v167_v5  ;;  %154 = vmatprep.subr.bf16.mxu1 %v167_v5 }
   0xb   :  { %90 = vmatpush1.bf16.msra.mxu0 %v169_v6  ;;  %158 = vmatpush1.bf16.msra.mxu1 %v169_v6 }
   0xc   :  { %91 = vmatprep.subr.bf16.mxu0 %v170_v11  ;;  %155 = vmatprep.subr.bf16.mxu1 %v170_v11 }
   0xf   :  { %92 = vmatpush1.bf16.msra.mxu0 %v172_v16  ;;  %159 = vmatpush1.bf16.msra.mxu1 %v172_v16 }
  0x12   :  { %150 = vmatmul.mubr.msk.bf16.vlgmr.msra.gmra.mxu0 %vm70_vm0, %v20_v17  ;;  %151 = vmatmul.mubr.msk.bf16.vlgmr.msra.gmra.mxu1 %vm70_vm0, %v21_v18 }
  0xd2   :  { %v111_v19 = vpop.f32.mrf.mxu0  ;;  %v121_v20 = vpop.f32.mrf.mxu1 }
  0xd3   :  { %130 = vst [vmem:[%s251_s2] sm:$0xff] %v111_v19  ;;  %134 = vst [vmem:[%s251_s2 + $0x20] sm:$0xff] %v121_v20 }
  0xd4   :  { %v113_v21 = vpop.f32.mrf.mxu0  ;;  %v123_v22 = vpop.f32.mrf.mxu1 }
  0xd5   :  { %131 = vst [vmem:[%s251_s2 + $0x8] sm:$0xff] %v113_v21  ;;  %135 = vst [vmem:[%s251_s2 + $0x28] sm:$0xff] %v123_v22 }
  0xd6   :  { %v115_v23 = vpop.f32.mrf.mxu0  ;;  %v125_v24 = vpop.f32.mrf.mxu1 }
  0xd7   :  { %132 = vst [vmem:[%s251_s2 + $0x10] sm:$0xff] %v115_v23  ;;  %136 = vst [vmem:[%s251_s2 + $0x30] sm:$0xff] %v125_v24 }
  0xd8   :  { %v117_v25 = vpop.f32.mrf.mxu0  ;;  %v127_v26 = vpop.f32.mrf.mxu1 }
  0xd9   :  { %133 = vst [vmem:[%s251_s2 + $0x18] sm:$0xff] %v117_v25  ;;  %137 = vst [vmem:[%s251_s2 + $0x38] sm:$0xff] %v127_v26 }

// kernel: _lambda_.45
= control target key start
LH: loop header
LB: loop body
LE: loop exit
PB: predicated region body
PF: predicated region fallthrough
CT: control target
= control target key end

     0   :  { %vm68_vm0 = vcmask 261120   ;;  %s381_s1 = inlined_call_operand.vmem [shape: bf16[32,128], index: 1, kind: input, shape index: {}]   ;;  %s382_s0 = inlined_call_operand.vmem [shape: f32[128,32], index: 0, kind: input, shape index: {}]   ;;  %s383_s2 = inlined_call_operand.vmem [shape: f32[128,128], index: 2, kind: output, shape index: {}]  }
   0x1   :  { %v254_v0 = vld [vmem:[%s381_s1 + $0x8] sm:$0xff]   ;;  %v255_v1 = vld [vmem:[%s381_s1] sm:$0xff]   ;;  %v14_v9 = vld [vmem:[%s382_s0 + $0x10] sm:$0xff] }
   0x2   :  { %230 = vmatprep.subr.bf16.mxu0 %v254_v0  ;;  %250 = vmatprep.subr.bf16.mxu1 %v254_v0  ;;  %v12_v2 = vld [vmem:[%s382_s0] sm:$0xff]  ;;  %v13_v3 = vld [vmem:[%s382_s0 + $0x8] sm:$0xff]  ;;  %v15_v10 = vld [vmem:[%s382_s0 + $0x18] sm:$0xff]  ;;  %v30_v12 = vmax.f32 %v14_v9, 0.0 }
   0x3   :  { %v20_v4 = vld [vmem:[%s382_s0 + $0x40] sm:$0xff]  ;;  %231 = vmatpush3.bf16.msra.mxu0 %v254_v0  ;;  %252 = vmatpush3.bf16.msra.mxu1 %v254_v0  ;;  %v28_v5 = vmax.f32 %v12_v2, 0.0  ;;  %v29_v6 = vmax.f32 %v13_v3, 0.0  ;;  %v21_v7 = vld [vmem:[%s382_s0 + $0x48] sm:$0xff]  ;;  %v31_v13 = vmax.f32 %v15_v10, 0.0  ;;  %v22_v14 = vld [vmem:[%s382_s0 + $0x50] sm:$0xff] }
   0x4   :  { %v36_v8 = vmax.f32 %v20_v4, 0.0  ;;  %232 = vmatprep.subr.bf16.mxu0 %v255_v1  ;;  %251 = vmatprep.subr.bf16.mxu1 %v255_v1  ;;  %v37_v11 = vmax.f32 %v21_v7, 0.0  ;;  %v23_v15 = vld [vmem:[%s382_s0 + $0x58] sm:$0xff]  ;;  %v16_v16 = vld [vmem:[%s382_s0 + $0x20] sm:$0xff]  ;;  %v38_v18 = vmax.f32 %v22_v14, 0.0  ;;  %v17_v20 = vld [vmem:[%s382_s0 + $0x28] sm:$0xff] }
   0x5   :  { %v44_v17 = vpack.c.bf16 %v29_v6, %v28_v5  ;;  %v39_v19 = vmax.f32 %v23_v15, 0.0  ;;  %v32_v21 = vmax.f32 %v16_v16, 0.0  ;;  %v24_v22 = vld [vmem:[%s382_s0 + $0x60] sm:$0xff]  ;;  %v25_v23 = vld [vmem:[%s382_s0 + $0x68] sm:$0xff]  ;;  %v45_v25 = vpack.c.bf16 %v31_v13, %v30_v12  ;;  %v18_v28 = vld [vmem:[%s382_s0 + $0x30] sm:$0xff] }
   0x6   :  { %v48_v24 = vpack.c.bf16 %v37_v11, %v36_v8  ;;  %v33_v26 = vmax.f32 %v17_v20, 0.0  ;;  %v40_v27 = vmax.f32 %v24_v22, 0.0  ;;  %v41_v30 = vmax.f32 %v25_v23, 0.0  ;;  %v19_v31 = vld [vmem:[%s382_s0 + $0x38] sm:$0xff]  ;;  %v26_v32 = vld [vmem:[%s382_s0 + $0x70] sm:$0xff] }
   0x7   :  { %233 = vmatpush3.bf16.msra.mxu0 %v255_v1  ;;  %253 = vmatpush3.bf16.msra.mxu1 %v255_v1  ;;  %v49_v29 = vpack.c.bf16 %v39_v19, %v38_v18  ;;  %v27_v33 = vld [vmem:[%s382_s0 + $0x78] sm:$0xff]  ;;  %v34_v36 = vmax.f32 %v18_v28, 0.0  ;;  %v35_v37 = vmax.f32 %v19_v31, 0.0  ;;  %v42_v38 = vmax.f32 %v26_v32, 0.0 }
   0x8   :  { %234 = vmatprep.mubr.msk.bf16.mxu0 %vm68_vm0, %v44_v17  ;;  %242 = vmatprep.mubr.msk.bf16.mxu1 %vm68_vm0, %v48_v24  ;;  %v46_v34 = vpack.c.bf16 %v33_v26, %v32_v21  ;;  %v50_v35 = vpack.c.bf16 %v41_v30, %v40_v27  ;;  %v43_v39 = vmax.f32 %v27_v33, 0.0 }
   0x9   :  { %v47_v40 = vpack.c.bf16 %v35_v37, %v34_v36 }
   0xa   :  { %235 = vmatmul.mubr.msk.bf16.vlgmr.msra.gmra.mxu0 %vm68_vm0, %v45_v25  ;;  %243 = vmatmul.mubr.msk.bf16.vlgmr.msra.gmra.mxu1 %vm68_vm0, %v49_v29  ;;  %v51_v41 = vpack.c.bf16 %v43_v39, %v42_v38 }
   0xb   :  { %238 = vmatprep.mubr.msk.bf16.mxu0 %vm68_vm0, %v46_v34  ;;  %246 = vmatprep.mubr.msk.bf16.mxu1 %vm68_vm0, %v50_v35 }
  0x12   :  { %239 = vmatmul.mubr.msk.bf16.gmra.mxu0 %vm68_vm0, %v47_v40  ;;  %247 = vmatmul.mubr.msk.bf16.gmra.mxu1 %vm68_vm0, %v51_v41 }
  0xca   :  { %v236_v42 = vpop.f32.mrf.mxu0  ;;  %v244_v43 = vpop.f32.mrf.mxu1 }
  0xcb   :  { %192 = vst [vmem:[%s383_s2 + $0x10] sm:$0xff] %v236_v42  ;;  %200 = vst [vmem:[%s383_s2 + $0x50] sm:$0xff] %v244_v43 }
  0xcc   :  { %v127_v44 = vpop.f32.mrf.mxu0  ;;  %v159_v45 = vpop.f32.mrf.mxu1 }
  0xcd   :  { %190 = vst [vmem:[%s383_s2] sm:$0xff] %v127_v44  ;;  %198 = vst [vmem:[%s383_s2 + $0x40] sm:$0xff] %v159_v45 }
  0xce   :  { %v237_v46 = vpop.f32.mrf.mxu0  ;;  %v245_v47 = vpop.f32.mrf.mxu1 }
  0xcf   :  { %193 = vst [vmem:[%s383_s2 + $0x18] sm:$0xff] %v237_v46  ;;  %201 = vst [vmem:[%s383_s2 + $0x58] sm:$0xff] %v245_v47 }
  0xd0   :  { %v130_v48 = vpop.f32.mrf.mxu0  ;;  %v162_v49 = vpop.f32.mrf.mxu1 }
  0xd1   :  { %191 = vst [vmem:[%s383_s2 + $0x8] sm:$0xff] %v130_v48  ;;  %199 = vst [vmem:[%s383_s2 + $0x48] sm:$0xff] %v162_v49 }
  0xd2   :  { %v240_v50 = vpop.f32.mrf.mxu0  ;;  %v248_v51 = vpop.f32.mrf.mxu1 }
  0xd3   :  { %196 = vst [vmem:[%s383_s2 + $0x30] sm:$0xff] %v240_v50  ;;  %204 = vst [vmem:[%s383_s2 + $0x70] sm:$0xff] %v248_v51 }
  0xd4   :  { %v143_v52 = vpop.f32.mrf.mxu0  ;;  %v175_v53 = vpop.f32.mrf.mxu1 }
  0xd5   :  { %194 = vst [vmem:[%s383_s2 + $0x20] sm:$0xff] %v143_v52  ;;  %202 = vst [vmem:[%s383_s2 + $0x60] sm:$0xff] %v175_v53 }
  0xd6   :  { %v241_v54 = vpop.f32.mrf.mxu0  ;;  %v249_v55 = vpop.f32.mrf.mxu1 }
  0xd7   :  { %197 = vst [vmem:[%s383_s2 + $0x38] sm:$0xff] %v241_v54  ;;  %205 = vst [vmem:[%s383_s2 + $0x78] sm:$0xff] %v249_v55 }
  0xd8   :  { %v146_v56 = vpop.f32.mrf.mxu0  ;;  %v178_v57 = vpop.f32.mrf.mxu1 }
  0xd9   :  { %195 = vst [vmem:[%s383_s2 + $0x28] sm:$0xff] %v146_v56  ;;  %203 = vst [vmem:[%s383_s2 + $0x68] sm:$0xff] %v178_v57 }

// kernel: _lambda_.47
= control target key start
LH: loop header
LB: loop body
LE: loop exit
PB: predicated region body
PF: predicated region fallthrough
CT: control target
= control target key end

     0   :  { %vm220_vm0 = vcmask 64512   ;;  %s897_s0 = inlined_call_operand.vmem [shape: f32[512,8], index: 0, kind: input, shape index: {}]   ;;  %s898_s1 = inlined_call_operand.vmem [shape: f32[1,8], index: 1, kind: input, shape index: {}]   ;;  %s899_s2 = inlined_call_operand.vmem [shape: f32[1,8], index: 2, kind: input, shape index: {}]   ;;  %s900_s3 = inlined_call_operand.vmem [shape: f32[512,8], index: 3, kind: output, shape index: {}]  }
   0x1   :  { %v14_v0 = vld [vmem:[%s897_s0] sm:$0xff]  ;;  %v15_v4 = vld [vmem:[%s897_s0 + $0x8] sm:$0xff]  ;;  %v16_v5 = vld [vmem:[%s897_s0 + $0x10] sm:$0xff] }
   0x2   :  { %v317_v1 = vld [vmem:[%s898_s1] ss:$0 sm:$0xff]  ;;  %v17_v6 = vld [vmem:[%s897_s0 + $0x18] sm:$0xff]  ;;  %v19_v11 = vld [vmem:[%s897_s0 + $0x28] sm:$0xff] }
   0x3   :  { %v322_v2 = vld [vmem:[%s899_s2] ss:$0 sm:$0xff]  ;;  %v85_v3 = vmul.f32 %v317_v1, %v14_v0  ;;  %v86_v7 = vmul.f32 %v317_v1, %v15_v4  ;;  %v87_v8 = vmul.f32 %v317_v1, %v16_v5  ;;  %v88_v9 = vmul.f32 %v317_v1, %v17_v6  ;;  %v20_v12 = vld [vmem:[%s897_s0 + $0x30] sm:$0xff]  ;;  %v21_v17 = vld [vmem:[%s897_s0 + $0x38] sm:$0xff] }
   0x4   :  { %v18_v10 = vld [vmem:[%s897_s0 + $0x20] sm:$0xff]  ;;  %v90_v15 = vmul.f32 %v317_v1, %v19_v11  ;;  %v91_v16 = vmul.f32 %v317_v1, %v20_v12  ;;  %v23_v19 = vld [vmem:[%s897_s0 + $0x48] sm:$0xff]  ;;  %v92_v23 = vmul.f32 %v317_v1, %v21_v17  ;;  %v24_v24 = vld [vmem:[%s897_s0 + $0x50] sm:$0xff] }
   0x5   :  { %v156_v13 = vadd.f32 %v322_v2, %v85_v3  ;;  %v89_v14 = vmul.f32 %v317_v1, %v18_v10  ;;  %v22_v18 = vld [vmem:[%s897_s0 + $0x40] sm:$0xff]  ;;  %v157_v20 = vadd.f32 %v322_v2, %v86_v7  ;;  %v158_v21 = vadd.f32 %v322_v2, %v87_v8  ;;  %v25_v25 = vld [vmem:[%s897_s0 + $0x58] sm:$0xff]  ;;  %v27_v31 = vld [vmem:[%s897_s0 + $0x68] sm:$0xff] }
   0x6   :  { %v159_v22 = vadd.f32 %v322_v2, %v88_v9  ;;  %v26_v26 = vld [vmem:[%s897_s0 + $0x60] sm:$0xff]  ;;  %v161_v28 = vadd.f32 %v322_v2, %v90_v15  ;;  %v162_v29 = vadd.f32 %v322_v2, %v91_v16  ;;  %v93_v30 = vmul.f32 %v317_v1, %v22_v18  ;;  %v28_v32 = vld [vmem:[%s897_s0 + $0x70] sm:$0xff]  ;;  %v29_v33 = vld [vmem:[%s897_s0 + $0x78] sm:$0xff] }
   0x7   :  { %221 = vst.msk [vmem:[%s900_s3] sm:$0xff] %vm220_vm0, %v156_v13  ;;  %v160_v27 = vadd.f32 %v322_v2, %v89_v14  ;;  %222 = vst.msk [vmem:[%s900_s3 + $0x8] sm:$0xff] %vm220_vm0, %v157_v20  ;;  %v163_v34 = vadd.f32 %v322_v2, %v92_v23  ;;  %v94_v35 = vmul.f32 %v317_v1, %v23_v19  ;;  %v30_v38 = vld [vmem:[%s897_s0 + $0x80] sm:$0xff]  ;;  %v31_v43 = vld [vmem:[%s897_s0 + $0x88] sm:$0xff] }
   0x8   :  { %223 = vst.msk [vmem:[%s900_s3 + $0x10] sm:$0xff] %vm220_vm0, %v158_v21  ;;  %224 = vst.msk [vmem:[%s900_s3 + $0x18] sm:$0xff] %vm220_vm0, %v159_v22  ;;  %v95_v36 = vmul.f32 %v317_v1, %v24_v24  ;;  %v96_v37 = vmul.f32 %v317_v1, %v25_v25  ;;  %v164_v39 = vadd.f32 %v322_v2, %v93_v30  ;;  %v32_v44 = vld [vmem:[%s897_s0 + $0x90] sm:$0xff]  ;;  %v33_v45 = vld [vmem:[%s897_s0 + $0x98] sm:$0xff] }
   0x9   :  { %225 = vst.msk [vmem:[%s900_s3 + $0x20] sm:$0xff] %vm220_vm0, %v160_v27  ;;  %226 = vst.msk [vmem:[%s900_s3 + $0x28] sm:$0xff] %vm220_vm0, %v161_v28  ;;  %v97_v40 = vmul.f32 %v317_v1, %v26_v26  ;;  %v98_v41 = vmul.f32 %v317_v1, %v27_v31  ;;  %v99_v42 = vmul.f32 %v317_v1, %v28_v32  ;;  %v34_v50 = vld [vmem:[%s897_s0 + $0xa0] sm:$0xff]  ;;  %v35_v51 = vld [vmem:[%s897_s0 + $0xa8] sm:$0xff] }
   0xa   :  { %227 = vst.msk [vmem:[%s900_s3 + $0x30] sm:$0xff] %vm220_vm0, %v162_v29  ;;  %228 = vst.msk [vmem:[%s900_s3 + $0x38] sm:$0xff] %vm220_vm0, %v163_v34  ;;  %v165_v46 = vadd.f32 %v322_v2, %v94_v35  ;;  %v166_v47 = vadd.f32 %v322_v2, %v95_v36  ;;  %v167_v48 = vadd.f32 %v322_v2, %v96_v37  ;;  %v36_v52 = vld [vmem:[%s897_s0 + $0xb0] sm:$0xff]  ;;  %v37_v57 = vld [vmem:[%s897_s0 + $0xb8] sm:$0xff] }
   0xb   :  { %v100_v49 = vmul.f32 %v317_v1, %v29_v33  ;;  %229 = vst.msk [vmem:[%s900_s3 + $0x40] sm:$0xff] %vm220_vm0, %v164_v39  ;;  %v168_v53 = vadd.f32 %v322_v2, %v97_v40  ;;  %v169_v54 = vadd.f32 %v322_v2, %v98_v41  ;;  %v170_v55 = vadd.f32 %v322_v2, %v99_v42  ;;  %v38_v62 = vld [vmem:[%s897_s0 + $0xc0] sm:$0xff]  ;;  %v39_v5 = vld [vmem:[%s897_s0 + $0xc8] sm:$0xff]  ;;  %v40_v6 = vld [vmem:[%s897_s0 + $0xd0] sm:$0xff] }
   0xc   :  { %v101_v56 = vmul.f32 %v317_v1, %v30_v38  ;;  %230 = vst.msk [vmem:[%s900_s3 + $0x48] sm:$0xff] %vm220_vm0, %v165_v46  ;;  %231 = vst.msk [vmem:[%s900_s3 + $0x50] sm:$0xff] %vm220_vm0, %v166_v47  ;;  %v102_v59 = vmul.f32 %v317_v1, %v31_v43  ;;  %v103_v60 = vmul.f32 %v317_v1, %v32_v44  ;;  %v41_v7 = vld [vmem:[%s897_s0 + $0xd8] sm:$0xff]  ;;  %v42_v12 = vld [vmem:[%s897_s0 + $0xe0] sm:$0xff] }
   0xd   :  { %232 = vst.msk [vmem:[%s900_s3 + $0x58] sm:$0xff] %vm220_vm0, %v167_v48  ;;  %v171_v58 = vadd.f32 %v322_v2, %v100_v49  ;;  %v104_v61 = vmul.f32 %v317_v1, %v33_v45  ;;  %233 = vst.msk [vmem:[%s900_s3 + $0x60] sm:$0xff] %vm220_vm0, %v168_v53  ;;  %v105_v0 = vmul.f32 %v317_v1, %v34_v50  ;;  %v43_v13 = vld [vmem:[%s897_s0 + $0xe8] sm:$0xff]  ;;  %v44_v14 = vld [vmem:[%s897_s0 + $0xf0] sm:$0xff] }
   0xe   :  { %234 = vst.msk [vmem:[%s900_s3 + $0x68] sm:$0xff] %vm220_vm0, %v169_v54  ;;  %235 = vst.msk [vmem:[%s900_s3 + $0x70] sm:$0xff] %vm220_vm0, %v170_v55  ;;  %v172_v63 = vadd.f32 %v322_v2, %v101_v56  ;;  %v106_v3 = vmul.f32 %v317_v1, %v35_v51  ;;  %v107_v4 = vmul.f32 %v317_v1, %v36_v52  ;;  %v45_v19 = vld [vmem:[%s897_s0 + $0xf8] sm:$0xff]  ;;  %v46_v24 = vld [vmem:[%s897_s0 + $0x100] sm:$0xff] }
   0xf   :  { %236 = vst.msk [vmem:[%s900_s3 + $0x78] sm:$0xff] %vm220_vm0, %v171_v58  ;;  %v173_v8 = vadd.f32 %v322_v2, %v102_v59  ;;  %v174_v9 = vadd.f32 %v322_v2, %v103_v60  ;;  %v175_v10 = vadd.f32 %v322_v2, %v104_v61  ;;  %v108_v11 = vmul.f32 %v317_v1, %v37_v57  ;;  %v47_v29 = vld [vmem:[%s897_s0 + $0x108] sm:$0xff]  ;;  %v48_v30 = vld [vmem:[%s897_s0 + $0x110] sm:$0xff]  ;;  %v49_v31 = vld [vmem:[%s897_s0 + $0x118] sm:$0xff] }
  0x10   :  { %237 = vst.msk [vmem:[%s900_s3 + $0x80] sm:$0xff] %vm220_vm0, %v172_v63  ;;  %v176_v15 = vadd.f32 %v322_v2, %v105_v0  ;;  %v177_v16 = vadd.f32 %v322_v2, %v106_v3  ;;  %v178_v17 = vadd.f32 %v322_v2, %v107_v4  ;;  %v109_v18 = vmul.f32 %v317_v1, %v38_v62  ;;  %v50_v36 = vld [vmem:[%s897_s0 + $0x120] sm:$0xff]  ;;  %v51_v37 = vld [vmem:[%s897_s0 + $0x128] sm:$0xff]  ;;  %v52_v38 = vld [vmem:[%s897_s0 + $0x130] sm:$0xff] }
  0x11   :  { %238 = vst.msk [vmem:[%s900_s3 + $0x88] sm:$0xff] %vm220_vm0, %v173_v8  ;;  %239 = vst.msk [vmem:[%s900_s3 + $0x90] sm:$0xff] %vm220_vm0, %v174_v9  ;;  %v179_v20 = vadd.f32 %v322_v2, %v108_v11  ;;  %v110_v21 = vmul.f32 %v317_v1, %v39_v5  ;;  %v111_v22 = vmul.f32 %v317_v1, %v40_v6  ;;  %v53_v43 = vld [vmem:[%s897_s0 + $0x138] sm:$0xff]  ;;  %v54_v48 = vld [vmem:[%s897_s0 + $0x140] sm:$0xff] }
  0x12   :  { %240 = vst.msk [vmem:[%s900_s3 + $0x98] sm:$0xff] %vm220_vm0, %v175_v10  ;;  %v112_v23 = vmul.f32 %v317_v1, %v41_v7  ;;  %241 = vst.msk [vmem:[%s900_s3 + $0xa0] sm:$0xff] %vm220_vm0, %v176_v15  ;;  %v180_v25 = vadd.f32 %v322_v2, %v109_v18  ;;  %v113_v26 = vmul.f32 %v317_v1, %v42_v12  ;;  %v55_v53 = vld [vmem:[%s897_s0 + $0x148] sm:$0xff]  ;;  %v56_v54 = vld [vmem:[%s897_s0 + $0x150] sm:$0xff] }
  0x13   :  { %242 = vst.msk [vmem:[%s900_s3 + $0xa8] sm:$0xff] %vm220_vm0, %v177_v16  ;;  %243 = vst.msk [vmem:[%s900_s3 + $0xb0] sm:$0xff] %vm220_vm0, %v178_v17  ;;  %v114_v27 = vmul.f32 %v317_v1, %v43_v13  ;;  %v115_v28 = vmul.f32 %v317_v1, %v44_v14  ;;  %v181_v32 = vadd.f32 %v322_v2, %v110_v21  ;;  %v57_v55 = vld [vmem:[%s897_s0 + $0x158] sm:$0xff]  ;;  %v58_v60 = vld [vmem:[%s897_s0 + $0x160] sm:$0xff] }
  0x14   :  { %244 = vst.msk [vmem:[%s900_s3 + $0xb8] sm:$0xff] %vm220_vm0, %v179_v20  ;;  %v182_v33 = vadd.f32 %v322_v2, %v111_v22  ;;  %v183_v34 = vadd.f32 %v322_v2, %v112_v23  ;;  %v116_v35 = vmul.f32 %v317_v1, %v45_v19  ;;  %245 = vst.msk [vmem:[%s900_s3 + $0xc0] sm:$0xff] %vm220_vm0, %v180_v25  ;;  %v59_v61 = vld [vmem:[%s897_s0 + $0x168] sm:$0xff]  ;;  %v60_v62 = vld [vmem:[%s897_s0 + $0x170] sm:$0xff] }
  0x15   :  { %v184_v39 = vadd.f32 %v322_v2, %v113_v26  ;;  %v185_v40 = vadd.f32 %v322_v2, %v114_v27  ;;  %v186_v41 = vadd.f32 %v322_v2, %v115_v28  ;;  %v117_v42 = vmul.f32 %v317_v1, %v46_v24  ;;  %246 = vst.msk [vmem:[%s900_s3 + $0xc8] sm:$0xff] %vm220_vm0, %v181_v32  ;;  %v61_v5 = vld [vmem:[%s897_s0 + $0x178] sm:$0xff]  ;;  %v62_v10 = vld [vmem:[%s897_s0 + $0x180] sm:$0xff]  ;;  %v63_v15 = vld [vmem:[%s897_s0 + $0x188] sm:$0xff] }
  0x16   :  { %247 = vst.msk [vmem:[%s900_s3 + $0xd0] sm:$0xff] %vm220_vm0, %v182_v33  ;;  %248 = vst.msk [vmem:[%s900_s3 + $0xd8] sm:$0xff] %vm220_vm0, %v183_v34  ;;  %v187_v44 = vadd.f32 %v322_v2, %v116_v35  ;;  %v118_v45 = vmul.f32 %v317_v1, %v47_v29  ;;  %v119_v46 = vmul.f32 %v317_v1, %v48_v30  ;;  %v64_v16 = vld [vmem:[%s897_s0 + $0x190] sm:$0xff]  ;;  %v65_v17 = vld [vmem:[%s897_s0 + $0x198] sm:$0xff] }
  0x17   :  { %v120_v47 = vmul.f32 %v317_v1, %v49_v31  ;;  %249 = vst.msk [vmem:[%s900_s3 + $0xe0] sm:$0xff] %vm220_vm0, %v184_v39  ;;  %250 = vst.msk [vmem:[%s900_s3 + $0xe8] sm:$0xff] %vm220_vm0, %v185_v40  ;;  %v188_v49 = vadd.f32 %v322_v2, %v117_v42  ;;  %v121_v50 = vmul.f32 %v317_v1, %v50_v36  ;;  %v66_v22 = vld [vmem:[%s897_s0 + $0x1a0] sm:$0xff]  ;;  %v67_v23 = vld [vmem:[%s897_s0 + $0x1a8] sm:$0xff] }
  0x18   :  { %251 = vst.msk [vmem:[%s900_s3 + $0xf0] sm:$0xff] %vm220_vm0, %v186_v41  ;;  %v122_v51 = vmul.f32 %v317_v1, %v51_v37  ;;  %v123_v52 = vmul.f32 %v317_v1, %v52_v38  ;;  %252 = vst.msk [vmem:[%s900_s3 + $0xf8] sm:$0xff] %vm220_vm0, %v187_v44  ;;  %v189_v56 = vadd.f32 %v322_v2, %v118_v45  ;;  %v68_v24 = vld [vmem:[%s897_s0 + $0x1b0] sm:$0xff]  ;;  %v69_v29 = vld [vmem:[%s897_s0 + $0x1b8] sm:$0xff] }
  0x19   :  { %v190_v57 = vadd.f32 %v322_v2, %v119_v46  ;;  %v191_v58 = vadd.f32 %v322_v2, %v120_v47  ;;  %v124_v59 = vmul.f32 %v317_v1, %v53_v43  ;;  %253 = vst.msk [vmem:[%s900_s3 + $0x100] sm:$0xff] %vm220_vm0, %v188_v49  ;;  %v192_v63 = vadd.f32 %v322_v2, %v121_v50  ;;  %v70_v34 = vld [vmem:[%s897_s0 + $0x1c0] sm:$0xff]  ;;  %v71_v39 = vld [vmem:[%s897_s0 + $0x1c8] sm:$0xff]  ;;  %v72_v40 = vld [vmem:[%s897_s0 + $0x1d0] sm:$0xff] }
  0x1a   :  { %v193_v0 = vadd.f32 %v322_v2, %v122_v51  ;;  %v194_v3 = vadd.f32 %v322_v2, %v123_v52  ;;  %v125_v4 = vmul.f32 %v317_v1, %v54_v48  ;;  %254 = vst.msk [vmem:[%s900_s3 + $0x108] sm:$0xff] %vm220_vm0, %v189_v56  ;;  %v126_v7 = vmul.f32 %v317_v1, %v55_v53  ;;  %v73_v41 = vld [vmem:[%s897_s0 + $0x1d8] sm:$0xff]  ;;  %v74_v46 = vld [vmem:[%s897_s0 + $0x1e0] sm:$0xff]  ;;  %v75_v47 = vld [vmem:[%s897_s0 + $0x1e8] sm:$0xff] }
  0x1b   :  { %255 = vst.msk [vmem:[%s900_s3 + $0x110] sm:$0xff] %vm220_vm0, %v190_v57  ;;  %256 = vst.msk [vmem:[%s900_s3 + $0x118] sm:$0xff] %vm220_vm0, %v191_v58  ;;  %v195_v6 = vadd.f32 %v322_v2, %v124_v59  ;;  %v127_v8 = vmul.f32 %v317_v1, %v56_v54  ;;  %v128_v9 = vmul.f32 %v317_v1, %v57_v55  ;;  %v76_v48 = vld [vmem:[%s897_s0 + $0x1f0] sm:$0xff]  ;;  %v77_v53 = vld [vmem:[%s897_s0 + $0x1f8] sm:$0xff] }
  0x1c   :  { %257 = vst.msk [vmem:[%s900_s3 + $0x120] sm:$0xff] %vm220_vm0, %v192_v63  ;;  %258 = vst.msk [vmem:[%s900_s3 + $0x128] sm:$0xff] %vm220_vm0, %v193_v0  ;;  %v196_v11 = vadd.f32 %v322_v2, %v125_v4  ;;  %v129_v12 = vmul.f32 %v317_v1, %v58_v60  ;;  %v130_v13 = vmul.f32 %v317_v1, %v59_v61 }
  0x1d   :  { %259 = vst.msk [vmem:[%s900_s3 + $0x130] sm:$0xff] %vm220_vm0, %v194_v3  ;;  %v131_v14 = vmul.f32 %v317_v1, %v60_v62  ;;  %260 = vst.msk [vmem:[%s900_s3 + $0x138] sm:$0xff] %vm220_vm0, %v195_v6  ;;  %v197_v18 = vadd.f32 %v322_v2, %v126_v7  ;;  %v198_v19 = vadd.f32 %v322_v2, %v127_v8 }
  0x1e   :  { %v199_v20 = vadd.f32 %v322_v2, %v128_v9  ;;  %v132_v21 = vmul.f32 %v317_v1, %v61_v5  ;;  %261 = vst.msk [vmem:[%s900_s3 + $0x140] sm:$0xff] %vm220_vm0, %v196_v11  ;;  %v200_v25 = vadd.f32 %v322_v2, %v129_v12  ;;  %v201_v26 = vadd.f32 %v322_v2, %v130_v13 }
  0x1f   :  { %v202_v27 = vadd.f32 %v322_v2, %v131_v14  ;;  %v133_v28 = vmul.f32 %v317_v1, %v62_v10  ;;  %262 = vst.msk [vmem:[%s900_s3 + $0x148] sm:$0xff] %vm220_vm0, %v197_v18  ;;  %263 = vst.msk [vmem:[%s900_s3 + $0x150] sm:$0xff] %vm220_vm0, %v198_v19  ;;  %v134_v31 = vmul.f32 %v317_v1, %v63_v15 }
  0x20   :  { %264 = vst.msk [vmem:[%s900_s3 + $0x158] sm:$0xff] %vm220_vm0, %v199_v20  ;;  %v203_v30 = vadd.f32 %v322_v2, %v132_v21  ;;  %v135_v32 = vmul.f32 %v317_v1, %v64_v16  ;;  %v136_v33 = vmul.f32 %v317_v1, %v65_v17  ;;  %265 = vst.msk [vmem:[%s900_s3 + $0x160] sm:$0xff] %vm220_vm0, %v200_v25 }
  0x21   :  { %266 = vst.msk [vmem:[%s900_s3 + $0x168] sm:$0xff] %vm220_vm0, %v201_v26  ;;  %267 = vst.msk [vmem:[%s900_s3 + $0x170] sm:$0xff] %vm220_vm0, %v202_v27  ;;  %v204_v35 = vadd.f32 %v322_v2, %v133_v28  ;;  %v137_v36 = vmul.f32 %v317_v1, %v66_v22  ;;  %v138_v37 = vmul.f32 %v317_v1, %v67_v23 }
  0x22   :  { %v139_v38 = vmul.f32 %v317_v1, %v68_v24  ;;  %268 = vst.msk [vmem:[%s900_s3 + $0x178] sm:$0xff] %vm220_vm0, %v203_v30  ;;  %v205_v42 = vadd.f32 %v322_v2, %v134_v31  ;;  %v206_v43 = vadd.f32 %v322_v2, %v135_v32  ;;  %v207_v44 = vadd.f32 %v322_v2, %v136_v33 }
  0x23   :  { %v140_v45 = vmul.f32 %v317_v1, %v69_v29  ;;  %269 = vst.msk [vmem:[%s900_s3 + $0x180] sm:$0xff] %vm220_vm0, %v204_v35  ;;  %v208_v49 = vadd.f32 %v322_v2, %v137_v36  ;;  %v209_v50 = vadd.f32 %v322_v2, %v138_v37  ;;  %v141_v52 = vmul.f32 %v317_v1, %v70_v34 }
  0x24   :  { %v210_v51 = vadd.f32 %v322_v2, %v139_v38  ;;  %270 = vst.msk [vmem:[%s900_s3 + $0x188] sm:$0xff] %vm220_vm0, %v205_v42  ;;  %271 = vst.msk [vmem:[%s900_s3 + $0x190] sm:$0xff] %vm220_vm0, %v206_v43  ;;  %v142_v55 = vmul.f32 %v317_v1, %v71_v39  ;;  %v143_v56 = vmul.f32 %v317_v1, %v72_v40 }
  0x25   :  { %272 = vst.msk [vmem:[%s900_s3 + $0x198] sm:$0xff] %vm220_vm0, %v207_v44  ;;  %v211_v54 = vadd.f32 %v322_v2, %v140_v45  ;;  %v144_v57 = vmul.f32 %v317_v1, %v73_v41  ;;  %273 = vst.msk [vmem:[%s900_s3 + $0x1a0] sm:$0xff] %vm220_vm0, %v208_v49  ;;  %v212_v58 = vadd.f32 %v322_v2, %v141_v52 }
  0x26   :  { %274 = vst.msk [vmem:[%s900_s3 + $0x1a8] sm:$0xff] %vm220_vm0, %v209_v50  ;;  %275 = vst.msk [vmem:[%s900_s3 + $0x1b0] sm:$0xff] %vm220_vm0, %v210_v51  ;;  %v145_v59 = vmul.f32 %v317_v1, %v74_v46  ;;  %v146_v60 = vmul.f32 %v317_v1, %v75_v47  ;;  %v147_v61 = vmul.f32 %v317_v1, %v76_v48 }
  0x27   :  { %276 = vst.msk [vmem:[%s900_s3 + $0x1b8] sm:$0xff] %vm220_vm0, %v211_v54  ;;  %v213_v62 = vadd.f32 %v322_v2, %v142_v55  ;;  %v214_v63 = vadd.f32 %v322_v2, %v143_v56  ;;  %v215_v0 = vadd.f32 %v322_v2, %v144_v57  ;;  %v148_v3 = vmul.f32 %v317_v1, %v77_v53 }
  0x28   :  { %277 = vst.msk [vmem:[%s900_s3 + $0x1c0] sm:$0xff] %vm220_vm0, %v212_v58  ;;  %v216_v4 = vadd.f32 %v322_v2, %v145_v59  ;;  %v217_v5 = vadd.f32 %v322_v2, %v146_v60  ;;  %v218_v6 = vadd.f32 %v322_v2, %v147_v61 }
  0x29   :  { %278 = vst.msk [vmem:[%s900_s3 + $0x1c8] sm:$0xff] %vm220_vm0, %v213_v62  ;;  %279 = vst.msk [vmem:[%s900_s3 + $0x1d0] sm:$0xff] %vm220_vm0, %v214_v63  ;;  %v219_v1 = vadd.f32 %v322_v2, %v148_v3 }
  0x2a   :  { %280 = vst.msk [vmem:[%s900_s3 + $0x1d8] sm:$0xff] %vm220_vm0, %v215_v0  ;;  %281 = vst.msk [vmem:[%s900_s3 + $0x1e0] sm:$0xff] %vm220_vm0, %v216_v4 }
  0x2b   :  { %282 = vst.msk [vmem:[%s900_s3 + $0x1e8] sm:$0xff] %vm220_vm0, %v217_v5  ;;  %283 = vst.msk [vmem:[%s900_s3 + $0x1f0] sm:$0xff] %vm220_vm0, %v218_v6 }
  0x2c   :  { %284 = vst.msk [vmem:[%s900_s3 + $0x1f8] sm:$0xff] %vm220_vm0, %v219_v1 }

// kernel: _lambda_.46
= control target key start
LH: loop header
LB: loop body
LE: loop exit
PB: predicated region body
PF: predicated region fallthrough
CT: control target
= control target key end

     0   :  { %vm14_vm0 = vcmask 57344   ;;  %vm341_vm1 = vcmask 64512   ;;  %v687_v0 = vmov 0.0   ;;  %s1577_s0 = inlined_call_operand.vmem [shape: f32[512,8], index: 0, kind: input, shape index: {}]   ;;  %s1578_s1 = inlined_call_operand.vmem [shape: f32[1,8], index: 1, kind: output, shape index: {0}]   ;;  %s1579_s2 = inlined_call_operand.vmem [shape: f32[1,8], index: 2, kind: output, shape index: {1}]  }
   0x1   :  { %15 = vst.msk [vmem:[%s1578_s1] sm:$0x1] %vm14_vm0, %v687_v0  ;;  %16 = vst.msk [vmem:[%s1579_s2] sm:$0x1] %vm14_vm0, %v687_v0  ;;  %v714_v1 = vld [vmem:[%s1577_s0] sm:$0xff]  ;;  %v719_v2 = vld [vmem:[%s1577_s0 + $0x8] sm:$0xff] }
   0x2   :  { %v724_v3 = vld [vmem:[%s1577_s0 + $0x10] sm:$0xff]  ;;  %v342_v4 = vsel %vm341_vm1, %v714_v1, 0.0  ;;  %v343_v5 = vsel %vm341_vm1, %v719_v2, 0.0  ;;  %v735_v7 = vld [vmem:[%s1577_s0 + $0x18] sm:$0xff]  ;;  %v742_v10 = vld [vmem:[%s1577_s0 + $0x20] sm:$0xff] }
   0x3   :  { %v345_v6 = vsel %vm341_vm1, %v724_v3, 0.0  ;;  %v344_v8 = vadd.f32 %v343_v5, %v342_v4  ;;  %v347_v9 = vsel %vm341_vm1, %v735_v7, 0.0  ;;  %v349_v12 = vsel %vm341_vm1, %v742_v10, 0.0  ;;  %v749_v13 = vld [vmem:[%s1577_s0 + $0x28] sm:$0xff]  ;;  %v756_v16 = vld [vmem:[%s1577_s0 + $0x30] sm:$0xff]  ;;  %v761_v18 = vld [vmem:[%s1577_s0 + $0x38] sm:$0xff] }
   0x4   :  { %v351_v15 = vsel %vm341_vm1, %v749_v13, 0.0  ;;  %v766_v19 = vld [vmem:[%s1577_s0 + $0x40] sm:$0xff]  ;;  %v353_v20 = vsel %vm341_vm1, %v756_v16, 0.0  ;;  %v773_v21 = vld [vmem:[%s1577_s0 + $0x48] sm:$0xff]  ;;  %v778_v22 = vld [vmem:[%s1577_s0 + $0x50] sm:$0xff]  ;;  %v355_v25 = vsel %vm341_vm1, %v761_v18, 0.0 }
   0x5   :  { %v346_v11 = vadd.f32 %v345_v6, %v344_v8  ;;  %v783_v23 = vld [vmem:[%s1577_s0 + $0x58] sm:$0xff]  ;;  %v357_v26 = vsel %vm341_vm1, %v766_v19, 0.0  ;;  %v792_v27 = vld [vmem:[%s1577_s0 + $0x108] sm:$0xff]  ;;  %v797_v28 = vld [vmem:[%s1577_s0 + $0x110] sm:$0xff]  ;;  %v359_v30 = vsel %vm341_vm1, %v773_v21, 0.0  ;;  %v361_v31 = vsel %vm341_vm1, %v778_v22, 0.0 }
   0x6   :  { %v802_v29 = vld [vmem:[%s1577_s0 + $0x118] sm:$0xff]  ;;  %v810_v32 = vsel %vm341_vm1, %v783_v23, 0.0  ;;  %v815_v33 = vld [vmem:[%s1577_s0 + $0x120] sm:$0xff]  ;;  %v820_v34 = vld [vmem:[%s1577_s0 + $0x128] sm:$0xff]  ;;  %v829_v37 = vsel %vm341_vm1, %v792_v27, 0.0  ;;  %v833_v38 = vsel %vm341_vm1, %v797_v28, 0.0 }
   0x7   :  { %v348_v14 = vadd.f32 %v347_v9, %v346_v11  ;;  %v825_v35 = vld [vmem:[%s1577_s0 + $0x130] sm:$0xff]  ;;  %1598 = vst [vmem:[#allocation2_spill] sm:$0xff] %v829_v37  ;;  %1599 = vst [vmem:[#allocation3_spill] sm:$0xff] %v833_v38  ;;  %v837_v39 = vsel %vm341_vm1, %v802_v29, 0.0  ;;  %v842_v40 = vld [vmem:[%s1577_s0 + $0x138] sm:$0xff]  ;;  %v856_v43 = vsel %vm341_vm1, %v815_v33, 0.0  ;;  %v481_v37 = vmul.f32 %v724_v3, %v724_v3 }
   0x8   :  { %1600 = vst [vmem:[#allocation4_spill] sm:$0xff] %v837_v39  ;;  %v847_v41 = vld [vmem:[%s1577_s0 + $0x140] sm:$0xff]  ;;  %v852_v42 = vld [vmem:[%s1577_s0 + $0x148] sm:$0xff]  ;;  %1601 = vst [vmem:[#allocation5_spill] sm:$0xff] %v856_v43  ;;  %v860_v44 = vsel %vm341_vm1, %v820_v34, 0.0  ;;  %v864_v45 = vsel %vm341_vm1, %v825_v35, 0.0 }
   0x9   :  { %v350_v17 = vadd.f32 %v349_v12, %v348_v14  ;;  %1602 = vst [vmem:[#allocation6_spill] sm:$0xff] %v860_v44  ;;  %1603 = vst [vmem:[#allocation7_spill] sm:$0xff] %v864_v45  ;;  %v869_v46 = vld [vmem:[%s1577_s0 + $0x150] sm:$0xff]  ;;  %v874_v47 = vld [vmem:[%s1577_s0 + $0x158] sm:$0xff]  ;;  %v883_v50 = vsel %vm341_vm1, %v842_v40, 0.0  ;;  %v887_v51 = vsel %vm341_vm1, %v847_v41, 0.0 }
   0xa   :  { %v879_v48 = vld [vmem:[%s1577_s0 + $0x160] sm:$0xff]  ;;  %1604 = vst [vmem:[#allocation8_spill] sm:$0xff] %v883_v50  ;;  %1605 = vst [vmem:[#allocation9_spill] sm:$0xff] %v887_v51  ;;  %v891_v52 = vsel %vm341_vm1, %v852_v42, 0.0  ;;  %v896_v53 = vld [vmem:[%s1577_s0 + $0x168] sm:$0xff]  ;;  %v910_v56 = vsel %vm341_vm1, %v869_v46, 0.0 }
   0xb   :  { %v352_v24 = vadd.f32 %v351_v15, %v350_v17  ;;  %1606 = vst [vmem:[#allocation10_spill] sm:$0xff] %v891_v52  ;;  %v901_v54 = vld [vmem:[%s1577_s0 + $0x170] sm:$0xff]  ;;  %v906_v55 = vld [vmem:[%s1577_s0 + $0x178] sm:$0xff]  ;;  %1607 = vst [vmem:[#allocation11_spill] sm:$0xff] %v910_v56  ;;  %v914_v57 = vsel %vm341_vm1, %v874_v47, 0.0  ;;  %v918_v58 = vsel %vm341_vm1, %v879_v48, 0.0 }
   0xc   :  { %1608 = vst [vmem:[#allocation12_spill] sm:$0xff] %v914_v57  ;;  %1609 = vst [vmem:[#allocation13_spill] sm:$0xff] %v918_v58  ;;  %v923_v59 = vld [vmem:[%s1577_s0 + $0x180] sm:$0xff]  ;;  %v928_v60 = vld [vmem:[%s1577_s0 + $0x188] sm:$0xff]  ;;  %v937_v63 = vsel %vm341_vm1, %v896_v53, 0.0  ;;  %v941_v0 = vsel %vm341_vm1, %v901_v54, 0.0 }
   0xd   :  { %v354_v36 = vadd.f32 %v353_v20, %v352_v24  ;;  %v933_v61 = vld [vmem:[%s1577_s0 + $0x190] sm:$0xff]  ;;  %1610 = vst [vmem:[#allocation14_spill] sm:$0xff] %v937_v63  ;;  %1611 = vst [vmem:[#allocation15_spill] sm:$0xff] %v941_v0  ;;  %v945_v4 = vsel %vm341_vm1, %v906_v55, 0.0  ;;  %v950_v5 = vld [vmem:[%s1577_s0 + $0x198] sm:$0xff]  ;;  %v964_v9 = vsel %vm341_vm1, %v923_v59, 0.0 }
   0xe   :  { %1612 = vst [vmem:[#allocation16_spill] sm:$0xff] %v945_v4  ;;  %v955_v6 = vld [vmem:[%s1577_s0 + $0x1a0] sm:$0xff]  ;;  %v960_v8 = vld [vmem:[%s1577_s0 + $0x1a8] sm:$0xff]  ;;  %1613 = vst [vmem:[#allocation17_spill] sm:$0xff] %v964_v9  ;;  %v968_v11 = vsel %vm341_vm1, %v928_v60, 0.0  ;;  %v972_v12 = vsel %vm341_vm1, %v933_v61, 0.0 }
   0xf   :  { %v356_v49 = vadd.f32 %v355_v25, %v354_v36  ;;  %1614 = vst [vmem:[#allocation18_spill] sm:$0xff] %v968_v11  ;;  %1615 = vst [vmem:[#allocation19_spill] sm:$0xff] %v972_v12  ;;  %v977_v14 = vld [vmem:[%s1577_s0 + $0x60] sm:$0xff]  ;;  %v982_v15 = vld [vmem:[%s1577_s0 + $0x1b0] sm:$0xff]  ;;  %v996_v25 = vsel %vm341_vm1, %v950_v5, 0.0  ;;  %v1004_v36 = vsel %vm341_vm1, %v960_v8, 0.0 }
  0x10   :  { %v987_v17 = vld [vmem:[%s1577_s0 + $0x1b8] sm:$0xff]  ;;  %v992_v20 = vld [vmem:[%s1577_s0 + $0x1c0] sm:$0xff]  ;;  %1616 = vst [vmem:[#allocation20_spill] sm:$0xff] %v996_v25  ;;  %1618 = vst [vmem:[#allocation22_spill] sm:$0xff] %v1004_v36 }
  0x11   :  { %v358_v62 = vadd.f32 %v357_v26, %v356_v49  ;;  %v1000_v26 = vsel %vm341_vm1, %v955_v6, 0.0  ;;  %v1009_v49 = vld [vmem:[%s1577_s0 + $0x1c8] sm:$0xff]  ;;  %v1027_v36 = vsel %vm341_vm1, %v987_v17, 0.0  ;;  %v1031_v25 = vsel %vm341_vm1, %v992_v20, 0.0  ;;  %v1036_v12 = vld [vmem:[%s1577_s0 + $0x1e0] sm:$0xff]  ;;  %v1063_v0 = vld [vmem:[%s1577_s0 + $0x1f8] sm:$0xff] }
  0x12   :  { %1617 = vst [vmem:[#allocation21_spill] sm:$0xff] %v1000_v26  ;;  %v1023_v26 = vsel %vm341_vm1, %v982_v15, 0.0  ;;  %1620 = vst [vmem:[#allocation24_spill] sm:$0xff] %v1027_v36  ;;  %v1041_v11 = vld [vmem:[%s1577_s0 + $0x1e8] sm:$0xff]  ;;  %v1050_v9 = vsel %vm341_vm1, %v1009_v49, 0.0  ;;  %v1085_v58 = vsel %vm341_vm1, %v1063_v0, 0.0 }
  0x13   :  { %v360_v24 = vadd.f32 %v359_v30, %v358_v62  ;;  %v1014_v30 = vld [vmem:[%s1577_s0 + $0x1d0] sm:$0xff]  ;;  %v1019_v62 = vld [vmem:[%s1577_s0 + $0x1d8] sm:$0xff]  ;;  %1619 = vst [vmem:[#allocation23_spill] sm:$0xff] %v1023_v26  ;;  %1621 = vst [vmem:[#allocation25_spill] sm:$0xff] %v1031_v25 }
  0x14   :  { %v1046_v26 = vld [vmem:[%s1577_s0 + $0x1f0] sm:$0xff]  ;;  %1623 = vst [vmem:[#allocation27_spill] sm:$0xff] %v1050_v9  ;;  %v1054_v25 = vsel %vm341_vm1, %v1014_v30, 0.0  ;;  %v1058_v4 = vsel %vm341_vm1, %v1019_v62, 0.0  ;;  %1626 = vst [vmem:[#allocation30_spill] sm:$0xff] %v1063_v0  ;;  %v1073_v9 = vsel %vm341_vm1, %v1041_v11, 0.0 }
  0x15   :  { %1622 = vst [vmem:[#allocation26_spill] sm:$0xff] %v1046_v26  ;;  %v362_v36 = vadd.f32 %v361_v31, %v360_v24  ;;  %1624 = vst [vmem:[#allocation28_spill] sm:$0xff] %v1054_v25  ;;  %v365_v31 = vsel %vm341_vm1, %v977_v14, 0.0  ;;  %v1069_v24 = vsel %vm341_vm1, %v1036_v12, 0.0  ;;  %v1077_v25 = vsel %vm341_vm1, %v1046_v26, 0.0  ;;  %v1114_v56 = vld [vmem:[%s1577_s0 + $0x90] sm:$0xff] }
  0x16   :  { %1625 = vst [vmem:[#allocation29_spill] sm:$0xff] %v1058_v4  ;;  %1627 = vst [vmem:[#allocation31_spill] sm:$0xff] %v1069_v24  ;;  %v30_v4 = vld [vmem:[%s1577_s0 + $0x68] sm:$0xff]  ;;  %v1119_v52 = vld [vmem:[%s1577_s0 + $0x98] sm:$0xff] }
  0x17   :  { %1628 = vst [vmem:[#allocation32_spill] sm:$0xff] %v1073_v9  ;;  %1629 = vst [vmem:[#allocation33_spill] sm:$0xff] %v1077_v25  ;;  %v364_v63 = vadd.f32 %v810_v32, %v362_v36  ;;  %v367_v24 = vsel %vm341_vm1, %v30_v4, 0.0  ;;  %v31_v9 = vld [vmem:[%s1577_s0 + $0x70] sm:$0xff]  ;;  %v1094_v25 = vld [vmem:[%s1577_s0 + $0x78] sm:$0xff]  ;;  %v379_v39 = vsel %vm341_vm1, %v1119_v52, 0.0 }
  0x18   :  { %1630 = vst [vmem:[#allocation34_spill] sm:$0xff] %v1085_v58  ;;  %1631 = vst [vmem:[#allocation35_spill] sm:$0xff] %v1094_v25  ;;  %v1099_v32 = vld [vmem:[%s1577_s0 + $0x80] sm:$0xff]  ;;  %v1104_v36 = vld [vmem:[%s1577_s0 + $0x88] sm:$0xff]  ;;  %v369_v58 = vsel %vm341_vm1, %v31_v9, 0.0 }
  0x19   :  { %v366_v57 = vadd.f32 %v365_v31, %v364_v63  ;;  %1632 = vst [vmem:[#allocation36_spill] sm:$0xff] %v1099_v32  ;;  %1633 = vst [vmem:[#allocation37_spill] sm:$0xff] %v1104_v36  ;;  %v479_v63 = vmul.f32 %v714_v1, %v714_v1  ;;  %v480_v31 = vmul.f32 %v719_v2, %v719_v2  ;;  %v1124_v51 = vld [vmem:[%s1577_s0 + $0xa0] sm:$0xff]  ;;  %v371_v1 = vsel %vm341_vm1, %v1094_v25, 0.0  ;;  %v1135_v44 = vld [vmem:[%s1577_s0 + $0xa8] sm:$0xff] }
  0x1a   :  { %1634 = vst [vmem:[#allocation38_spill] sm:$0xff] %v1114_v56  ;;  %1635 = vst [vmem:[#allocation39_spill] sm:$0xff] %v1119_v52  ;;  %v373_v2 = vsel %vm341_vm1, %v1099_v32, 0.0  ;;  %v375_v45 = vsel %vm341_vm1, %v1104_v36, 0.0  ;;  %v1140_v43 = vld [vmem:[%s1577_s0 + $0xb0] sm:$0xff]  ;;  %v381_v38 = vsel %vm341_vm1, %v1124_v51, 0.0  ;;  %v482_v25 = vmul.f32 %v735_v7, %v735_v7 }
  0x1b   :  { %1636 = vst [vmem:[#allocation40_spill] sm:$0xff] %v1124_v51  ;;  %v368_v50 = vadd.f32 %v367_v24, %v366_v57  ;;  %1637 = vst [vmem:[#allocation41_spill] sm:$0xff] %v1135_v44  ;;  %v1145_v57 = vld [vmem:[%s1577_s0 + $0xb8] sm:$0xff]  ;;  %v377_v24 = vsel %vm341_vm1, %v1114_v56, 0.0  ;;  %v1158_v36 = vld [vmem:[%s1577_s0 + $0xc0] sm:$0xff]  ;;  %v383_v51 = vsel %vm341_vm1, %v1135_v44, 0.0 }
  0x1c   :  { %1638 = vst [vmem:[#allocation42_spill] sm:$0xff] %v1140_v43  ;;  %1639 = vst [vmem:[#allocation43_spill] sm:$0xff] %v1145_v57  ;;  %v1163_v32 = vld [vmem:[%s1577_s0 + $0xc8] sm:$0xff]  ;;  %v1168_v52 = vld [vmem:[%s1577_s0 + $0xd0] sm:$0xff]  ;;  %v1174_v3 = vsel %vm341_vm1, %v1140_v43, 0.0 }
  0x1d   :  { %1640 = vst [vmem:[#allocation44_spill] sm:$0xff] %v1158_v36  ;;  %1641 = vst [vmem:[#allocation45_spill] sm:$0xff] %v1163_v32  ;;  %v370_v56 = vadd.f32 %v369_v58, %v368_v50  ;;  %v1181_v0 = vld [vmem:[%s1577_s0 + $0xd8] sm:$0xff]  ;;  %v1186_v26 = vld [vmem:[%s1577_s0 + $0xe0] sm:$0xff]  ;;  %v1190_v50 = vsel %vm341_vm1, %v1145_v57, 0.0  ;;  %v1194_v58 = vsel %vm341_vm1, %v1158_v36, 0.0 }
  0x1e   :  { %1642 = vst [vmem:[#allocation46_spill] sm:$0xff] %v1168_v52  ;;  %1643 = vst [vmem:[#allocation47_spill] sm:$0xff] %v1181_v0  ;;  %v1198_v7 = vsel %vm341_vm1, %v1163_v32, 0.0  ;;  %v1202_v43 = vsel %vm341_vm1, %v1168_v52, 0.0  ;;  %v1207_v44 = vld [vmem:[%s1577_s0 + $0xe8] sm:$0xff]  ;;  %v1212_v57 = vld [vmem:[%s1577_s0 + $0xf0] sm:$0xff]  ;;  %v483_v52 = vmul.f32 %v742_v10, %v742_v10  ;;  %v487_v10 = vmul.f32 %v766_v19, %v766_v19 }
  0x1f   :  { %1644 = vst [vmem:[#allocation48_spill] sm:$0xff] %v1186_v26  ;;  %1645 = vst [vmem:[#allocation49_spill] sm:$0xff] %v1194_v58  ;;  %v372_v36 = vadd.f32 %v371_v1, %v370_v56  ;;  %v1216_v58 = vsel %vm341_vm1, %v1181_v0, 0.0  ;;  %v1220_v32 = vsel %vm341_vm1, %v1186_v26, 0.0  ;;  %v484_v56 = vmul.f32 %v749_v13, %v749_v13 }
  0x20   :  { %1646 = vst [vmem:[#allocation50_spill] sm:$0xff] %v1198_v7  ;;  %1647 = vst [vmem:[#allocation51_spill] sm:$0xff] %v1202_v43  ;;  %v1226_v43 = vsel %vm341_vm1, %v1207_v44, 0.0  ;;  %v1230_v7 = vsel %vm341_vm1, %v1212_v57, 0.0  ;;  %v485_v1 = vmul.f32 %v756_v16, %v756_v16  ;;  %v486_v26 = vmul.f32 %v761_v18, %v761_v18 }
  0x21   :  { %1648 = vst [vmem:[#allocation52_spill] sm:$0xff] %v1207_v44  ;;  %1649 = vst [vmem:[#allocation53_spill] sm:$0xff] %v1212_v57  ;;  %v374_v0 = vadd.f32 %v373_v2, %v372_v36  ;;  %v488_v44 = vmul.f32 %v773_v21, %v773_v21  ;;  %v489_v57 = vmul.f32 %v778_v22, %v778_v22 }
  0x22   :  { %1650 = vst [vmem:[#allocation54_spill] sm:$0xff] %v1230_v7  ;;  %v490_v7 = vmul.f32 %v783_v23, %v783_v23  ;;  %v491_v13 = vmul.f32 %v977_v14, %v977_v14  ;;  %v1248_v16 = vmul.f32 %v30_v4, %v30_v4  ;;  %v1250_v2 = vmul.f32 %v31_v9, %v31_v9 }
  0x23   :  { %v376_v36 = vadd.f32 %v375_v45, %v374_v0  ;;  %v512_v18 = vmul.f32 %v792_v27, %v792_v27  ;;  %v513_v19 = vmul.f32 %v797_v28, %v797_v28  ;;  %v514_v21 = vmul.f32 %v802_v29, %v802_v29 }
  0x24   :  { %v515_v22 = vmul.f32 %v815_v33, %v815_v33  ;;  %v516_v23 = vmul.f32 %v820_v34, %v820_v34  ;;  %v517_v45 = vmul.f32 %v825_v35, %v825_v35  ;;  %v518_v4 = vmul.f32 %v842_v40, %v842_v40 }
  0x25   :  { %v378_v0 = vadd.f32 %v377_v24, %v376_v36  ;;  %v519_v27 = vmul.f32 %v847_v41, %v847_v41  ;;  %v520_v28 = vmul.f32 %v852_v42, %v852_v42  ;;  %v521_v29 = vmul.f32 %v869_v46, %v869_v46 }
  0x26   :  { %v522_v33 = vmul.f32 %v874_v47, %v874_v47  ;;  %v543_v34 = vsel %vm341_vm1, %v479_v63, 0.0  ;;  %v544_v35 = vsel %vm341_vm1, %v480_v31, 0.0  ;;  %v523_v40 = vmul.f32 %v879_v48, %v879_v48 }
  0x27   :  { %v380_v9 = vadd.f32 %v379_v39, %v378_v0  ;;  %v545_v14 = vadd.f32 %v544_v35, %v543_v34  ;;  %v546_v41 = vsel %vm341_vm1, %v481_v37, 0.0  ;;  %v524_v42 = vmul.f32 %v896_v53, %v896_v53  ;;  %v1651_v0 = vld [vmem:[#allocation26_spill] sm:$0xff] }
  0x28   :  { %v525_v46 = vmul.f32 %v901_v54, %v901_v54  ;;  %v526_v47 = vmul.f32 %v906_v55, %v906_v55  ;;  %v548_v63 = vsel %vm341_vm1, %v482_v25, 0.0  ;;  %v527_v39 = vmul.f32 %v923_v59, %v923_v59  ;;  %v1652_v34 = vld [vmem:[#allocation30_spill] sm:$0xff] }
  0x29   :  { %v382_v24 = vadd.f32 %v381_v38, %v380_v9  ;;  %v528_v48 = vmul.f32 %v928_v60, %v928_v60  ;;  %v547_v31 = vadd.f32 %v546_v41, %v545_v14  ;;  %v529_v37 = vmul.f32 %v933_v61, %v933_v61  ;;  %v1653_v41 = vld [vmem:[#allocation49_spill] sm:$0xff] }
  0x2a   :  { %v530_v53 = vmul.f32 %v950_v5, %v950_v5  ;;  %v531_v54 = vmul.f32 %v955_v6, %v955_v6  ;;  %v550_v55 = vsel %vm341_vm1, %v483_v52, 0.0  ;;  %v532_v38 = vmul.f32 %v960_v8, %v960_v8 }
  0x2b   :  { %v384_v25 = vadd.f32 %v383_v51, %v382_v24  ;;  %v533_v59 = vmul.f32 %v982_v15, %v982_v15  ;;  %v549_v60 = vadd.f32 %v548_v63, %v547_v31  ;;  %v534_v36 = vmul.f32 %v987_v17, %v987_v17 }
  0x2c   :  { %v535_v61 = vmul.f32 %v992_v20, %v992_v20  ;;  %v536_v5 = vmul.f32 %v1009_v49, %v1009_v49  ;;  %v552_v6 = vsel %vm341_vm1, %v484_v56, 0.0  ;;  %v537_v52 = vmul.f32 %v1014_v30, %v1014_v30 }
  0x2d   :  { %v386_v51 = vadd.f32 %v1174_v3, %v384_v25  ;;  %v538_v8 = vmul.f32 %v1019_v62, %v1019_v62  ;;  %v551_v15 = vadd.f32 %v550_v55, %v549_v60  ;;  %v539_v17 = vmul.f32 %v1036_v12, %v1036_v12  ;;  %v1655_v25 = vld [vmem:[#allocation51_spill] sm:$0xff] }
  0x2e   :  { %v540_v20 = vmul.f32 %v1041_v11, %v1041_v11  ;;  %v541_v49 = vmul.f32 %v1651_v0, %v1651_v0  ;;  %v554_v56 = vsel %vm341_vm1, %v485_v1, 0.0  ;;  %v542_v30 = vmul.f32 %v1652_v34, %v1652_v34  ;;  %v1657_v34 = vld [vmem:[#allocation54_spill] sm:$0xff] }
  0x2f   :  { %v388_v3 = vadd.f32 %v1190_v50, %v386_v51  ;;  %v553_v35 = vadd.f32 %v552_v6, %v551_v15  ;;  %v556_v62 = vsel %vm341_vm1, %v486_v26, 0.0  ;;  %v558_v9 = vsel %vm341_vm1, %v487_v10, 0.0 }
  0x30   :  { %v560_v12 = vsel %vm341_vm1, %v488_v44, 0.0  ;;  %v562_v14 = vsel %vm341_vm1, %v489_v57, 0.0  ;;  %v564_v11 = vsel %vm341_vm1, %v490_v7, 0.0  ;;  %v566_v1 = vsel %vm341_vm1, %v491_v13, 0.0  ;;  %v1654_v7 = vld [vmem:[#allocation50_spill] sm:$0xff] }
  0x31   :  { %v390_v63 = vadd.f32 %v1653_v41, %v388_v3  ;;  %v555_v24 = vadd.f32 %v554_v56, %v553_v35  ;;  %v1331_v50 = vsel %vm341_vm1, %v512_v18, 0.0  ;;  %v1334_v31 = vsel %vm341_vm1, %v513_v19, 0.0  ;;  %v1656_v56 = vld [vmem:[#allocation35_spill] sm:$0xff] }
  0x32   :  { %v1337_v26 = vsel %vm341_vm1, %v514_v21, 0.0  ;;  %v1340_v44 = vsel %vm341_vm1, %v515_v22, 0.0  ;;  %v1343_v57 = vsel %vm341_vm1, %v516_v23, 0.0  ;;  %v1347_v13 = vsel %vm341_vm1, %v517_v45, 0.0 }
  0x33   :  { %v392_v10 = vadd.f32 %v1654_v7, %v390_v63  ;;  %v557_v55 = vadd.f32 %v556_v62, %v555_v24  ;;  %v1350_v18 = vsel %vm341_vm1, %v518_v4, 0.0  ;;  %v1353_v19 = vsel %vm341_vm1, %v519_v27, 0.0  ;;  %v1658_v62 = vld [vmem:[#allocation36_spill] sm:$0xff] }
  0x34   :  { %v1356_v21 = vsel %vm341_vm1, %v520_v28, 0.0  ;;  %v1359_v22 = vsel %vm341_vm1, %v521_v29, 0.0  ;;  %v1362_v23 = vsel %vm341_vm1, %v522_v33, 0.0  ;;  %v1366_v45 = vsel %vm341_vm1, %v523_v40, 0.0 }
  0x35   :  { %v394_v60 = vadd.f32 %v1655_v25, %v392_v10  ;;  %v559_v6 = vadd.f32 %v558_v9, %v557_v55  ;;  %v1369_v4 = vsel %vm341_vm1, %v524_v42, 0.0  ;;  %v1372_v27 = vsel %vm341_vm1, %v525_v46, 0.0  ;;  %v1660_v10 = vld [vmem:[#allocation38_spill] sm:$0xff] }
  0x36   :  { %v1375_v28 = vsel %vm341_vm1, %v526_v47, 0.0  ;;  %v1378_v29 = vsel %vm341_vm1, %v527_v39, 0.0  ;;  %v1381_v33 = vsel %vm341_vm1, %v528_v48, 0.0  ;;  %v1385_v40 = vsel %vm341_vm1, %v529_v37, 0.0  ;;  %v1661_v25 = vld [vmem:[#allocation2_spill] sm:$0xff] }
  0x37   :  { %v396_v51 = vadd.f32 %v1216_v58, %v394_v60  ;;  %v561_v15 = vadd.f32 %v560_v12, %v559_v6  ;;  %v1388_v42 = vsel %vm341_vm1, %v530_v53, 0.0  ;;  %v1391_v46 = vsel %vm341_vm1, %v531_v54, 0.0 }
  0x38   :  { %v1394_v47 = vsel %vm341_vm1, %v532_v38, 0.0  ;;  %v1397_v39 = vsel %vm341_vm1, %v533_v59, 0.0  ;;  %v1400_v48 = vsel %vm341_vm1, %v534_v36, 0.0  ;;  %v1404_v37 = vsel %vm341_vm1, %v535_v61, 0.0 }
  0x39   :  { %v398_v58 = vadd.f32 %v1220_v32, %v396_v51  ;;  %v563_v0 = vadd.f32 %v562_v14, %v561_v15  ;;  %v1407_v53 = vsel %vm341_vm1, %v536_v5, 0.0  ;;  %v1410_v54 = vsel %vm341_vm1, %v537_v52, 0.0  ;;  %v1424_v32 = vld [vmem:[%s1577_s0 + $0xf8] sm:$0xff]  ;;  %v1662_v51 = vld [vmem:[#allocation39_spill] sm:$0xff] }
  0x3a   :  { %v1413_v38 = vsel %vm341_vm1, %v538_v8, 0.0  ;;  %v1416_v59 = vsel %vm341_vm1, %v539_v17, 0.0  ;;  %v1419_v36 = vsel %vm341_vm1, %v540_v20, 0.0  ;;  %v1428_v52 = vsel %vm341_vm1, %v541_v49, 0.0 }
  0x3b   :  { %v400_v61 = vadd.f32 %v1226_v43, %v398_v58  ;;  %v565_v5 = vadd.f32 %v564_v11, %v563_v0  ;;  %v1431_v8 = vsel %vm341_vm1, %v542_v30, 0.0  ;;  %v403_v17 = vsel %vm341_vm1, %v1424_v32, 0.0  ;;  %v1442_v43 = vld [vmem:[%s1577_s0 + $0x100] sm:$0xff]  ;;  %v1663_v58 = vld [vmem:[#allocation3_spill] sm:$0xff] }
  0x3c   :  { %v494_v20 = vmul.f32 %v1656_v56, %v1656_v56  ;;  %v568_v3 = vsel %vm341_vm1, %v1248_v16, 0.0  ;;  %v405_v30 = vsel %vm341_vm1, %v1442_v43, 0.0  ;;  %v495_v9 = vmul.f32 %v1658_v62, %v1658_v62  ;;  %v1659_v16 = vld [vmem:[#allocation37_spill] sm:$0xff] }
  0x3d   :  { %v402_v49 = vadd.f32 %v1657_v34, %v400_v61  ;;  %v567_v35 = vadd.f32 %v566_v1, %v565_v5  ;;  %v570_v12 = vsel %vm341_vm1, %v1250_v2, 0.0  ;;  %v496_v41 = vmul.f32 %v1659_v16, %v1659_v16  ;;  %v1664_v5 = vld [vmem:[#allocation40_spill] sm:$0xff]  ;;  %v1667_v62 = vld [vmem:[#allocation5_spill] sm:$0xff] }
  0x3e   :  { %v572_v63 = vsel %vm341_vm1, %v494_v20, 0.0  ;;  %v497_v1 = vmul.f32 %v1660_v10, %v1660_v10  ;;  %v574_v55 = vsel %vm341_vm1, %v495_v9, 0.0  ;;  %v498_v2 = vmul.f32 %v1662_v51, %v1662_v51  ;;  %v1665_v20 = vld [vmem:[#allocation4_spill] sm:$0xff] }
  0x3f   :  { %v404_v14 = vadd.f32 %v403_v17, %v402_v49  ;;  %v569_v11 = vadd.f32 %v568_v3, %v567_v35  ;;  %v576_v15 = vsel %vm341_vm1, %v496_v41, 0.0  ;;  %v499_v17 = vmul.f32 %v1664_v5, %v1664_v5  ;;  %v1666_v49 = vld [vmem:[#allocation41_spill] sm:$0xff]  ;;  %v1669_v41 = vld [vmem:[#allocation6_spill] sm:$0xff] }
  0x40   :  { %v578_v56 = vsel %vm341_vm1, %v497_v1, 0.0  ;;  %v500_v35 = vmul.f32 %v1666_v49, %v1666_v49 }
  0x41   :  { %v406_v24 = vadd.f32 %v405_v30, %v404_v14  ;;  %v571_v7 = vadd.f32 %v570_v12, %v569_v11  ;;  %v580_v30 = vsel %vm341_vm1, %v498_v2, 0.0  ;;  %v1668_v14 = vld [vmem:[#allocation42_spill] sm:$0xff]  ;;  %v582_v16 = vsel %vm341_vm1, %v499_v17, 0.0 }
  0x42   :  { %v501_v11 = vmul.f32 %v1668_v14, %v1668_v14  ;;  %v584_v1 = vsel %vm341_vm1, %v500_v35, 0.0 }
  0x43   :  { %v408_v60 = vadd.f32 %v1661_v25, %v406_v24  ;;  %v573_v6 = vadd.f32 %v572_v63, %v571_v7  ;;  %v1670_v7 = vld [vmem:[#allocation43_spill] sm:$0xff] }
  0x44   :  { %v502_v10 = vmul.f32 %v1670_v7, %v1670_v7  ;;  %v586_v2 = vsel %vm341_vm1, %v501_v11, 0.0 }
  0x45   :  { %v410_v0 = vadd.f32 %v1663_v58, %v408_v60  ;;  %v575_v61 = vadd.f32 %v574_v55, %v573_v6  ;;  %v1671_v55 = vld [vmem:[#allocation7_spill] sm:$0xff]  ;;  %v1672_v6 = vld [vmem:[#allocation44_spill] sm:$0xff] }
  0x46   :  { %v503_v51 = vmul.f32 %v1672_v6, %v1672_v6  ;;  %v588_v17 = vsel %vm341_vm1, %v502_v10, 0.0 }
  0x47   :  { %v412_v3 = vadd.f32 %v1665_v20, %v410_v0  ;;  %v577_v34 = vadd.f32 %v576_v15, %v575_v61  ;;  %v1673_v15 = vld [vmem:[#allocation8_spill] sm:$0xff]  ;;  %v1674_v61 = vld [vmem:[#allocation45_spill] sm:$0xff] }
  0x48   :  { %v504_v5 = vmul.f32 %v1674_v61, %v1674_v61  ;;  %v590_v35 = vsel %vm341_vm1, %v503_v51, 0.0 }
  0x49   :  { %v414_v9 = vadd.f32 %v1667_v62, %v412_v3  ;;  %v579_v12 = vadd.f32 %v578_v56, %v577_v34  ;;  %v1675_v56 = vld [vmem:[#allocation9_spill] sm:$0xff]  ;;  %v1676_v34 = vld [vmem:[#allocation46_spill] sm:$0xff] }
  0x4a   :  { %v505_v49 = vmul.f32 %v1676_v34, %v1676_v34  ;;  %v592_v11 = vsel %vm341_vm1, %v504_v5, 0.0 }
  0x4b   :  { %v416_v63 = vadd.f32 %v1669_v41, %v414_v9  ;;  %v581_v24 = vadd.f32 %v580_v30, %v579_v12  ;;  %v1677_v30 = vld [vmem:[#allocation10_spill] sm:$0xff]  ;;  %v1678_v12 = vld [vmem:[#allocation47_spill] sm:$0xff] }
  0x4c   :  { %v506_v14 = vmul.f32 %v1678_v12, %v1678_v12  ;;  %v594_v10 = vsel %vm341_vm1, %v505_v49, 0.0  ;;  %v1686_v49 = vld [vmem:[#allocation15_spill] sm:$0xff]  ;;  %v1687_v12 = vld [vmem:[#allocation16_spill] sm:$0xff] }
  0x4d   :  { %v418_v25 = vadd.f32 %v1671_v55, %v416_v63  ;;  %v583_v60 = vadd.f32 %v582_v16, %v581_v24  ;;  %v1679_v16 = vld [vmem:[#allocation11_spill] sm:$0xff]  ;;  %v1680_v24 = vld [vmem:[#allocation48_spill] sm:$0xff] }
  0x4e   :  { %v507_v7 = vmul.f32 %v1680_v24, %v1680_v24  ;;  %v596_v51 = vsel %vm341_vm1, %v506_v14, 0.0 }
  0x4f   :  { %v420_v58 = vadd.f32 %v1673_v15, %v418_v25  ;;  %v585_v0 = vadd.f32 %v584_v1, %v583_v60  ;;  %v1681_v1 = vld [vmem:[#allocation12_spill] sm:$0xff] }
  0x50   :  { %v1682_v60 = vld [vmem:[#allocation52_spill] sm:$0xff]  ;;  %v598_v5 = vsel %vm341_vm1, %v507_v7, 0.0  ;;  %v1689_v7 = vld [vmem:[#allocation18_spill] sm:$0xff] }
  0x51   :  { %v422_v20 = vadd.f32 %v1675_v56, %v420_v58  ;;  %v587_v3 = vadd.f32 %v586_v2, %v585_v0  ;;  %v508_v6 = vmul.f32 %v1682_v60, %v1682_v60  ;;  %v1683_v2 = vld [vmem:[#allocation13_spill] sm:$0xff] }
  0x52   :  { %v1684_v0 = vld [vmem:[#allocation53_spill] sm:$0xff] }
  0x53   :  { %v424_v62 = vadd.f32 %v1677_v30, %v422_v20  ;;  %v589_v9 = vadd.f32 %v588_v17, %v587_v3  ;;  %v509_v61 = vmul.f32 %v1684_v0, %v1684_v0  ;;  %v1685_v17 = vld [vmem:[#allocation14_spill] sm:$0xff]  ;;  %v510_v3 = vmul.f32 %v1424_v32, %v1424_v32 }
  0x54   :  { %v600_v34 = vsel %vm341_vm1, %v508_v6, 0.0  ;;  %v1691_v6 = vld [vmem:[#allocation20_spill] sm:$0xff]  ;;  %v1693_v0 = vld [vmem:[#allocation22_spill] sm:$0xff] }
  0x55   :  { %v426_v41 = vadd.f32 %v1679_v16, %v424_v62  ;;  %v591_v63 = vadd.f32 %v590_v35, %v589_v9  ;;  %v511_v62 = vmul.f32 %v1442_v43, %v1442_v43  ;;  %v602_v9 = vsel %vm341_vm1, %v509_v61, 0.0 }
  0x56   :  { %v604_v16 = vsel %vm341_vm1, %v510_v3, 0.0  ;;  %v1695_v3 = vld [vmem:[#allocation24_spill] sm:$0xff] }
  0x57   :  { %v428_v55 = vadd.f32 %v1681_v1, %v426_v41  ;;  %v593_v25 = vadd.f32 %v592_v11, %v591_v63  ;;  %v1688_v41 = vld [vmem:[#allocation17_spill] sm:$0xff]  ;;  %v606_v32 = vsel %vm341_vm1, %v511_v62, 0.0  ;;  %v1697_v62 = vld [vmem:[#allocation27_spill] sm:$0xff] }
  0x59   :  { %v430_v15 = vadd.f32 %v1683_v2, %v428_v55  ;;  %v595_v58 = vadd.f32 %v594_v10, %v593_v25  ;;  %v1690_v55 = vld [vmem:[#allocation19_spill] sm:$0xff]  ;;  %v1692_v2 = vld [vmem:[#allocation21_spill] sm:$0xff] }
  0x5b   :  { %v432_v56 = vadd.f32 %v1685_v17, %v430_v15  ;;  %v597_v20 = vadd.f32 %v596_v51, %v595_v58  ;;  %v1694_v17 = vld [vmem:[#allocation23_spill] sm:$0xff] }
  0x5d   :  { %v434_v35 = vadd.f32 %v1686_v49, %v432_v56  ;;  %v599_v30 = vadd.f32 %v598_v5, %v597_v20 }
  0x5f   :  { %v436_v14 = vadd.f32 %v1687_v12, %v434_v35  ;;  %v601_v11 = vadd.f32 %v600_v34, %v599_v30  ;;  %v1696_v35 = vld [vmem:[#allocation25_spill] sm:$0xff]  ;;  %v1698_v12 = vld [vmem:[#allocation28_spill] sm:$0xff] }
  0x61   :  { %v438_v63 = vadd.f32 %v1688_v41, %v436_v14  ;;  %v603_v24 = vadd.f32 %v602_v9, %v601_v11  ;;  %v1699_v11 = vld [vmem:[#allocation29_spill] sm:$0xff]  ;;  %v1700_v41 = vld [vmem:[#allocation31_spill] sm:$0xff] }
  0x63   :  { %v440_v10 = vadd.f32 %v1689_v7, %v438_v63  ;;  %v605_v1 = vadd.f32 %v604_v16, %v603_v24  ;;  %v1701_v24 = vld [vmem:[#allocation32_spill] sm:$0xff]  ;;  %v1702_v7 = vld [vmem:[#allocation33_spill] sm:$0xff] }
  0x65   :  { %v442_v25 = vadd.f32 %v1690_v55, %v440_v10  ;;  %v607_v60 = vadd.f32 %v606_v32, %v605_v1  ;;  %v1703_v1 = vld [vmem:[#allocation34_spill] sm:$0xff] }
  0x67   :  { %v444_v43 = vadd.f32 %v1691_v6, %v442_v25  ;;  %v609_v51 = vadd.f32 %v1331_v50, %v607_v60 }
  0x69   :  { %v446_v15 = vadd.f32 %v1692_v2, %v444_v43  ;;  %v611_v58 = vadd.f32 %v1334_v31, %v609_v51 }
  0x6b   :  { %v448_v61 = vadd.f32 %v1693_v0, %v446_v15  ;;  %v613_v5 = vadd.f32 %v1337_v26, %v611_v58 }
  0x6d   :  { %v450_v56 = vadd.f32 %v1694_v17, %v448_v61  ;;  %v615_v20 = vadd.f32 %v1340_v44, %v613_v5 }
  0x6f   :  { %v452_v34 = vadd.f32 %v1695_v3, %v450_v56  ;;  %v617_v49 = vadd.f32 %v1343_v57, %v615_v20 }
  0x71   :  { %v454_v30 = vadd.f32 %v1696_v35, %v452_v34  ;;  %v619_v50 = vadd.f32 %v1347_v13, %v617_v49 }
  0x73   :  { %v456_v9 = vadd.f32 %v1697_v62, %v454_v30  ;;  %v621_v31 = vadd.f32 %v1350_v18, %v619_v50 }
  0x75   :  { %v458_v14 = vadd.f32 %v1698_v12, %v456_v9  ;;  %v623_v26 = vadd.f32 %v1353_v19, %v621_v31 }
  0x77   :  { %v460_v16 = vadd.f32 %v1699_v11, %v458_v14  ;;  %v625_v44 = vadd.f32 %v1356_v21, %v623_v26 }
  0x79   :  { %v462_v63 = vadd.f32 %v1700_v41, %v460_v16  ;;  %v627_v57 = vadd.f32 %v1359_v22, %v625_v44 }
  0x7b   :  { %v464_v32 = vadd.f32 %v1701_v24, %v462_v63  ;;  %v629_v13 = vadd.f32 %v1362_v23, %v627_v57 }
  0x7d   :  { %v466_v10 = vadd.f32 %v1702_v7, %v464_v32  ;;  %v631_v18 = vadd.f32 %v1366_v45, %v629_v13  ;;  %v340_v45 = vld [vmem:[%s1578_s1] sm:$0x1] }
  0x7f   :  { %v468_v55 = vadd.f32 %v1703_v1, %v466_v10  ;;  %v633_v19 = vadd.f32 %v1369_v4, %v631_v18 }
  0x81   :  { %v469_v25 = vrot.slane %v468_v55, 4  ;;  %v635_v60 = vadd.f32 %v1372_v27, %v633_v19 }
  0x83   :  { %v470_v21 = vadd.f32 %v469_v25, %v468_v55  ;;  %v637_v6 = vadd.f32 %v1375_v28, %v635_v60 }
  0x85   :  { %v471_v43 = vrot.slane %v470_v21, 2  ;;  %v639_v22 = vadd.f32 %v1378_v29, %v637_v6 }
  0x87   :  { %v472_v51 = vadd.f32 %v471_v43, %v470_v21  ;;  %v641_v23 = vadd.f32 %v1381_v33, %v639_v22 }
  0x89   :  { %v473_v2 = vrot.slane %v472_v51, 1  ;;  %v643_v15 = vadd.f32 %v1385_v40, %v641_v23 }
  0x8b   :  { %v474_v4 = vadd.f32 %v473_v2, %v472_v51  ;;  %v645_v58 = vadd.f32 %v1388_v42, %v643_v15 }
  0x8d   :  { %v475_v27 = vadd.f32 %v474_v4, %v340_v45  ;;  %v647_v0 = vadd.f32 %v1391_v46, %v645_v58 }
  0x8f   :  { %477 = vst.msk [vmem:[%s1578_s1] sm:$0x1] %vm14_vm0, %v475_v27  ;;  %v649_v28 = vadd.f32 %v1394_v47, %v647_v0 }
  0x91   :  { %v651_v29 = vadd.f32 %v1397_v39, %v649_v28 }
  0x93   :  { %v653_v33 = vadd.f32 %v1400_v48, %v651_v29 }
  0x95   :  { %v655_v40 = vadd.f32 %v1404_v37, %v653_v33  ;;  %v478_v37 = vld [vmem:[%s1579_s2] sm:$0x1] }
  0x97   :  { %v657_v61 = vadd.f32 %v1407_v53, %v655_v40 }
  0x99   :  { %v659_v42 = vadd.f32 %v1410_v54, %v657_v61 }
  0x9b   :  { %v661_v5 = vadd.f32 %v1413_v38, %v659_v42 }
  0x9d   :  { %v663_v46 = vadd.f32 %v1416_v59, %v661_v5 }
  0x9f   :  { %v665_v17 = vadd.f32 %v1419_v36, %v663_v46 }
  0xa1   :  { %v667_v56 = vadd.f32 %v1428_v52, %v665_v17 }
  0xa3   :  { %v669_v47 = vadd.f32 %v1431_v8, %v667_v56 }
  0xa5   :  { %v670_v20 = vrot.slane %v669_v47, 4 }
  0xa7   :  { %v671_v39 = vadd.f32 %v670_v20, %v669_v47 }
  0xa9   :  { %v672_v3 = vrot.slane %v671_v39, 2 }
  0xab   :  { %v673_v48 = vadd.f32 %v672_v3, %v671_v39 }
  0xad   :  { %v674_v34 = vrot.slane %v673_v48, 1 }
  0xaf   :  { %v675_v53 = vadd.f32 %v674_v34, %v673_v48 }
  0xb1   :  { %v676_v54 = vadd.f32 %v675_v53, %v478_v37 }
  0xb3   :  { %677 = vst.msk [vmem:[%s1579_s2] sm:$0x1] %vm14_vm0, %v676_v54 }

// kernel: _lambda_.48
= control target key start
LH: loop header
LB: loop body
LE: loop exit
PB: predicated region body
PF: predicated region fallthrough
CT: control target
= control target key end

     0   :  { %vm180_vm0 = vcmask 130048   ;;  %s1203_s1 = inlined_call_operand.vmem [shape: bf16[16,128], index: 1, kind: input, shape index: {}]   ;;  %s1204_s0 = inlined_call_operand.vmem [shape: f32[512,16], index: 0, kind: input, shape index: {}]   ;;  %s1205_s2 = inlined_call_operand.vmem [shape: f32[512,128], index: 2, kind: output, shape index: {}]  }
   0x1   :  { %v768_v0 = vld [vmem:[%s1203_s1] sm:$0xff]   ;;  %v13_v2 = vld [vmem:[%s1204_s0 + $0x8] sm:$0xff]  ;;  %v14_v8 = vld [vmem:[%s1204_s0 + $0x10] sm:$0xff] }
   0x2   :  { %v12_v1 = vld [vmem:[%s1204_s0] sm:$0xff]  ;;  %700 = vmatprep.subr.bf16.mxu0 %v768_v0  ;;  %766 = vmatprep.subr.bf16.mxu1 %v768_v0  ;;  %v77_v5 = vmax.f32 %v13_v2, 0.0  ;;  %v45_v6 = vld [vmem:[%s1204_s0 + $0x108] sm:$0xff]  ;;  %v15_v9 = vld [vmem:[%s1204_s0 + $0x18] sm:$0xff]  ;;  %v78_v11 = vmax.f32 %v14_v8, 0.0 }
   0x3   :  { %v44_v3 = vld [vmem:[%s1204_s0 + $0x100] sm:$0xff]  ;;  %v76_v4 = vmax.f32 %v12_v1, 0.0  ;;  %701 = vmatpush3.bf16.msra.mxu0 %v768_v0  ;;  %767 = vmatpush3.bf16.msra.mxu1 %v768_v0  ;;  %v109_v10 = vmax.f32 %v45_v6, 0.0  ;;  %v79_v12 = vmax.f32 %v15_v9, 0.0  ;;  %v46_v13 = vld [vmem:[%s1204_s0 + $0x110] sm:$0xff]  ;;  %v47_v14 = vld [vmem:[%s1204_s0 + $0x118] sm:$0xff] }
   0x4   :  { %v108_v7 = vmax.f32 %v44_v3, 0.0  ;;  %v16_v15 = vld [vmem:[%s1204_s0 + $0x20] sm:$0xff]  ;;  %v110_v17 = vmax.f32 %v46_v13, 0.0  ;;  %v111_v18 = vmax.f32 %v47_v14, 0.0  ;;  %v17_v19 = vld [vmem:[%s1204_s0 + $0x28] sm:$0xff]  ;;  %v18_v27 = vld [vmem:[%s1204_s0 + $0x30] sm:$0xff] }
   0x5   :  { %v140_v16 = vpack.c.bf16 %v77_v5, %v76_v4  ;;  %v80_v20 = vmax.f32 %v16_v15, 0.0  ;;  %v48_v21 = vld [vmem:[%s1204_s0 + $0x120] sm:$0xff]  ;;  %v49_v22 = vld [vmem:[%s1204_s0 + $0x128] sm:$0xff]  ;;  %v141_v24 = vpack.c.bf16 %v79_v12, %v78_v11  ;;  %v81_v25 = vmax.f32 %v17_v19, 0.0  ;;  %v19_v28 = vld [vmem:[%s1204_s0 + $0x38] sm:$0xff] }
   0x6   :  { %v156_v23 = vpack.c.bf16 %v109_v10, %v108_v7  ;;  %v112_v26 = vmax.f32 %v48_v21, 0.0  ;;  %v50_v29 = vld [vmem:[%s1204_s0 + $0x130] sm:$0xff]  ;;  %v157_v30 = vpack.c.bf16 %v111_v18, %v110_v17  ;;  %v113_v31 = vmax.f32 %v49_v22, 0.0  ;;  %v51_v32 = vld [vmem:[%s1204_s0 + $0x138] sm:$0xff]  ;;  %v20_v33 = vld [vmem:[%s1204_s0 + $0x40] sm:$0xff] }
   0x7   :  { %702 = vmatprep.mubr.msk.bf16.mxu0 %vm180_vm0, %v140_v16  ;;  %v21_v34 = vld [vmem:[%s1204_s0 + $0x48] sm:$0xff]  ;;  %v142_v35 = vpack.c.bf16 %v81_v25, %v80_v20  ;;  %v82_v36 = vmax.f32 %v18_v27, 0.0  ;;  %v83_v37 = vmax.f32 %v19_v28, 0.0  ;;  %v114_v38 = vmax.f32 %v50_v29, 0.0  ;;  %v52_v39 = vld [vmem:[%s1204_s0 + $0x140] sm:$0xff]  ;;  %v22_v50 = vld [vmem:[%s1204_s0 + $0x50] sm:$0xff] }
   0x8   :  { %734 = vmatprep.mubr.msk.bf16.mxu1 %vm180_vm0, %v156_v23  ;;  %703 = vmatmul.mubr.msk.bf16.vlgmr.msra.gmra.mxu0 %vm180_vm0, %v141_v24  ;;  %v53_v40 = vld [vmem:[%s1204_s0 + $0x148] sm:$0xff]  ;;  %v158_v41 = vpack.c.bf16 %v113_v31, %v112_v26  ;;  %v115_v42 = vmax.f32 %v51_v32, 0.0  ;;  %v84_v43 = vmax.f32 %v20_v33, 0.0  ;;  %v85_v44 = vmax.f32 %v21_v34, 0.0  ;;  %v23_v51 = vld [vmem:[%s1204_s0 + $0x58] sm:$0xff]  ;;  %v54_v52 = vld [vmem:[%s1204_s0 + $0x150] sm:$0xff] }
   0x9   :  { %735 = vmatmul.mubr.msk.bf16.vlgmr.msra.gmra.mxu1 %vm180_vm0, %v157_v30  ;;  %706 = vmatprep.mubr.msk.bf16.mxu0 %vm180_vm0, %v142_v35  ;;  %v116_v45 = vmax.f32 %v52_v39, 0.0  ;;  %v117_v46 = vmax.f32 %v53_v40, 0.0  ;;  %v143_v47 = vpack.c.bf16 %v83_v37, %v82_v36  ;;  %v55_v54 = vld [vmem:[%s1204_s0 + $0x158] sm:$0xff]  ;;  %v24_v55 = vld [vmem:[%s1204_s0 + $0x60] sm:$0xff]  ;;  %v25_v56 = vld [vmem:[%s1204_s0 + $0x68] sm:$0xff]  ;;  %v86_v59 = vmax.f32 %v22_v50, 0.0 }
   0xa   :  { %738 = vmatprep.mubr.msk.bf16.mxu1 %vm180_vm0, %v158_v41  ;;  %v159_v48 = vpack.c.bf16 %v115_v42, %v114_v38  ;;  %v144_v49 = vpack.c.bf16 %v85_v44, %v84_v43  ;;  %v56_v57 = vld [vmem:[%s1204_s0 + $0x160] sm:$0xff]  ;;  %v57_v58 = vld [vmem:[%s1204_s0 + $0x168] sm:$0xff]  ;;  %v87_v60 = vmax.f32 %v23_v51, 0.0  ;;  %v118_v61 = vmax.f32 %v54_v52, 0.0  ;;  %v26_v6 = vld [vmem:[%s1204_s0 + $0x70] sm:$0xff] }
   0xb   :  { %v160_v53 = vpack.c.bf16 %v117_v46, %v116_v45  ;;  %v119_v62 = vmax.f32 %v55_v54, 0.0  ;;  %v88_v63 = vmax.f32 %v24_v55, 0.0  ;;  %v89_v0 = vmax.f32 %v25_v56, 0.0  ;;  %v27_v7 = vld [vmem:[%s1204_s0 + $0x78] sm:$0xff]  ;;  %v58_v8 = vld [vmem:[%s1204_s0 + $0x170] sm:$0xff]  ;;  %v28_v11 = vld [vmem:[%s1204_s0 + $0x80] sm:$0xff] }
   0xc   :  { %v120_v1 = vmax.f32 %v56_v57, 0.0  ;;  %v121_v2 = vmax.f32 %v57_v58, 0.0  ;;  %v145_v3 = vpack.c.bf16 %v87_v60, %v86_v59  ;;  %v59_v10 = vld [vmem:[%s1204_s0 + $0x178] sm:$0xff]  ;;  %v29_v12 = vld [vmem:[%s1204_s0 + $0x88] sm:$0xff]  ;;  %v60_v13 = vld [vmem:[%s1204_s0 + $0x180] sm:$0xff]  ;;  %v90_v15 = vmax.f32 %v26_v6, 0.0 }
   0xd   :  { %v161_v4 = vpack.c.bf16 %v119_v62, %v118_v61  ;;  %v146_v5 = vpack.c.bf16 %v89_v0, %v88_v63  ;;  %v61_v14 = vld [vmem:[%s1204_s0 + $0x188] sm:$0xff]  ;;  %v91_v16 = vmax.f32 %v27_v7, 0.0  ;;  %v122_v17 = vmax.f32 %v58_v8, 0.0  ;;  %v30_v26 = vld [vmem:[%s1204_s0 + $0x90] sm:$0xff]  ;;  %v31_v27 = vld [vmem:[%s1204_s0 + $0x98] sm:$0xff] }
   0xe   :  { %v162_v9 = vpack.c.bf16 %v121_v2, %v120_v1  ;;  %v123_v18 = vmax.f32 %v59_v10, 0.0  ;;  %v92_v19 = vmax.f32 %v28_v11, 0.0  ;;  %v93_v20 = vmax.f32 %v29_v12, 0.0  ;;  %v62_v28 = vld [vmem:[%s1204_s0 + $0x190] sm:$0xff]  ;;  %v63_v30 = vld [vmem:[%s1204_s0 + $0x198] sm:$0xff]  ;;  %v32_v31 = vld [vmem:[%s1204_s0 + $0xa0] sm:$0xff] }
   0xf   :  { %v124_v21 = vmax.f32 %v60_v13, 0.0  ;;  %v125_v22 = vmax.f32 %v61_v14, 0.0  ;;  %v147_v23 = vpack.c.bf16 %v91_v16, %v90_v15  ;;  %v33_v32 = vld [vmem:[%s1204_s0 + $0xa8] sm:$0xff]  ;;  %v64_v33 = vld [vmem:[%s1204_s0 + $0x1a0] sm:$0xff]  ;;  %v94_v35 = vmax.f32 %v30_v26, 0.0  ;;  %v34_v46 = vld [vmem:[%s1204_s0 + $0xb0] sm:$0xff] }
  0x10   :  { %707 = vmatmul.mubr.msk.bf16.gmra.mxu0 %vm180_vm0, %v143_v47  ;;  %v163_v24 = vpack.c.bf16 %v123_v18, %v122_v17  ;;  %v148_v25 = vpack.c.bf16 %v93_v20, %v92_v19  ;;  %v65_v34 = vld [vmem:[%s1204_s0 + $0x1a8] sm:$0xff]  ;;  %v95_v36 = vmax.f32 %v31_v27, 0.0  ;;  %v126_v37 = vmax.f32 %v62_v28, 0.0  ;;  %v35_v47 = vld [vmem:[%s1204_s0 + $0xb8] sm:$0xff]  ;;  %v36_v51 = vld [vmem:[%s1204_s0 + $0xc0] sm:$0xff] }
  0x11   :  { %739 = vmatmul.mubr.msk.bf16.gmra.mxu1 %vm180_vm0, %v159_v48  ;;  %710 = vmatprep.mubr.msk.bf16.mxu0 %vm180_vm0, %v144_v49  ;;  %v164_v29 = vpack.c.bf16 %v125_v22, %v124_v21  ;;  %v127_v38 = vmax.f32 %v63_v30, 0.0  ;;  %v96_v39 = vmax.f32 %v32_v31, 0.0  ;;  %v97_v40 = vmax.f32 %v33_v32, 0.0  ;;  %v66_v48 = vld [vmem:[%s1204_s0 + $0x1b0] sm:$0xff]  ;;  %v67_v50 = vld [vmem:[%s1204_s0 + $0x1b8] sm:$0xff]  ;;  %v37_v52 = vld [vmem:[%s1204_s0 + $0xc8] sm:$0xff] }
  0x12   :  { %742 = vmatprep.mubr.msk.bf16.mxu1 %vm180_vm0, %v160_v53  ;;  %v128_v41 = vmax.f32 %v64_v33, 0.0  ;;  %v129_v42 = vmax.f32 %v65_v34, 0.0  ;;  %v149_v43 = vpack.c.bf16 %v95_v36, %v94_v35  ;;  %v68_v53 = vld [vmem:[%s1204_s0 + $0x1c0] sm:$0xff]  ;;  %v69_v54 = vld [vmem:[%s1204_s0 + $0x1c8] sm:$0xff]  ;;  %v98_v55 = vmax.f32 %v34_v46, 0.0  ;;  %v38_v2 = vld [vmem:[%s1204_s0 + $0xd0] sm:$0xff] }
  0x13   :  { %v165_v44 = vpack.c.bf16 %v127_v38, %v126_v37  ;;  %v150_v45 = vpack.c.bf16 %v97_v40, %v96_v39  ;;  %v99_v56 = vmax.f32 %v35_v47, 0.0  ;;  %v130_v57 = vmax.f32 %v66_v48, 0.0  ;;  %v71_v6 = vld [vmem:[%s1204_s0 + $0x1d8] sm:$0xff]  ;;  %v40_v7 = vld [vmem:[%s1204_s0 + $0xe0] sm:$0xff]  ;;  %v41_v8 = vld [vmem:[%s1204_s0 + $0xe8] sm:$0xff] }
  0x14   :  { %v166_v49 = vpack.c.bf16 %v129_v42, %v128_v41  ;;  %v131_v58 = vmax.f32 %v67_v50, 0.0  ;;  %v100_v59 = vmax.f32 %v36_v51, 0.0  ;;  %v101_v60 = vmax.f32 %v37_v52, 0.0  ;;  %v73_v10 = vld [vmem:[%s1204_s0 + $0x1e8] sm:$0xff]  ;;  %v42_v22 = vld [vmem:[%s1204_s0 + $0xf0] sm:$0xff]  ;;  %v75_v26 = vld [vmem:[%s1204_s0 + $0x1f8] sm:$0xff] }
  0x15   :  { %v132_v61 = vmax.f32 %v68_v53, 0.0  ;;  %v133_v62 = vmax.f32 %v69_v54, 0.0  ;;  %v151_v63 = vpack.c.bf16 %v99_v56, %v98_v55  ;;  %v102_v11 = vmax.f32 %v38_v2, 0.0 }
  0x16   :  { %v167_v0 = vpack.c.bf16 %v131_v58, %v130_v57  ;;  %v152_v1 = vpack.c.bf16 %v101_v60, %v100_v59  ;;  %v135_v14 = vmax.f32 %v71_v6, 0.0  ;;  %v104_v15 = vmax.f32 %v40_v7, 0.0 }
  0x17   :  { %v105_v16 = vmax.f32 %v41_v8, 0.0  ;;  %v137_v18 = vmax.f32 %v73_v10, 0.0  ;;  %v106_v27 = vmax.f32 %v42_v22, 0.0  ;;  %v139_v30 = vmax.f32 %v75_v26, 0.0 }
  0x18   :  { %711 = vmatmul.mubr.msk.bf16.gmra.mxu0 %vm180_vm0, %v145_v3  ;;  %v39_v3 = vld [vmem:[%s1204_s0 + $0xd8] sm:$0xff] }
  0x19   :  { %743 = vmatmul.mubr.msk.bf16.gmra.mxu1 %vm180_vm0, %v161_v4  ;;  %714 = vmatprep.mubr.msk.bf16.mxu0 %vm180_vm0, %v146_v5  ;;  %v70_v4 = vld [vmem:[%s1204_s0 + $0x1d0] sm:$0xff]  ;;  %v168_v5 = vpack.c.bf16 %v133_v62, %v132_v61  ;;  %v103_v12 = vmax.f32 %v39_v3, 0.0  ;;  %v154_v21 = vpack.c.bf16 %v105_v16, %v104_v15 }
  0x1a   :  { %746 = vmatprep.mubr.msk.bf16.mxu1 %vm180_vm0, %v162_v9  ;;  %v72_v9 = vld [vmem:[%s1204_s0 + $0x1e0] sm:$0xff]  ;;  %v134_v13 = vmax.f32 %v70_v4, 0.0 }
  0x1b   :  { %v136_v17 = vmax.f32 %v72_v9, 0.0  ;;  %v153_v19 = vpack.c.bf16 %v103_v12, %v102_v11 }
  0x1c   :  { %v169_v20 = vpack.c.bf16 %v135_v14, %v134_v13 }
  0x20   :  { %715 = vmatmul.mubr.msk.bf16.gmra.mxu0 %vm180_vm0, %v147_v23  ;;  %v43_v23 = vld [vmem:[%s1204_s0 + $0xf8] sm:$0xff] }
  0x21   :  { %747 = vmatmul.mubr.msk.bf16.gmra.mxu1 %vm180_vm0, %v163_v24  ;;  %718 = vmatprep.mubr.msk.bf16.mxu0 %vm180_vm0, %v148_v25  ;;  %v170_v24 = vpack.c.bf16 %v137_v18, %v136_v17  ;;  %v74_v25 = vld [vmem:[%s1204_s0 + $0x1f0] sm:$0xff]  ;;  %v107_v28 = vmax.f32 %v43_v23, 0.0 }
  0x22   :  { %750 = vmatprep.mubr.msk.bf16.mxu1 %vm180_vm0, %v164_v29  ;;  %v138_v29 = vmax.f32 %v74_v25, 0.0 }
  0x23   :  { %v155_v31 = vpack.c.bf16 %v107_v28, %v106_v27 }
  0x24   :  { %v171_v32 = vpack.c.bf16 %v139_v30, %v138_v29 }
  0x28   :  { %719 = vmatmul.mubr.msk.bf16.gmra.mxu0 %vm180_vm0, %v149_v43 }
  0x29   :  { %751 = vmatmul.mubr.msk.bf16.gmra.mxu1 %vm180_vm0, %v165_v44  ;;  %722 = vmatprep.mubr.msk.bf16.mxu0 %vm180_vm0, %v150_v45 }
  0x2a   :  { %754 = vmatprep.mubr.msk.bf16.mxu1 %vm180_vm0, %v166_v49 }
  0x30   :  { %723 = vmatmul.mubr.msk.bf16.gmra.mxu0 %vm180_vm0, %v151_v63 }
  0x31   :  { %755 = vmatmul.mubr.msk.bf16.gmra.mxu1 %vm180_vm0, %v167_v0  ;;  %726 = vmatprep.mubr.msk.bf16.mxu0 %vm180_vm0, %v152_v1 }
  0x32   :  { %758 = vmatprep.mubr.msk.bf16.mxu1 %vm180_vm0, %v168_v5 }
  0x38   :  { %727 = vmatmul.mubr.msk.bf16.gmra.mxu0 %vm180_vm0, %v153_v19 }
  0x39   :  { %759 = vmatmul.mubr.msk.bf16.gmra.mxu1 %vm180_vm0, %v169_v20  ;;  %730 = vmatprep.mubr.msk.bf16.mxu0 %vm180_vm0, %v154_v21 }
  0x3a   :  { %762 = vmatprep.mubr.msk.bf16.mxu1 %vm180_vm0, %v170_v24 }
  0x40   :  { %731 = vmatmul.mubr.msk.bf16.gmra.mxu0 %vm180_vm0, %v155_v31 }
  0x41   :  { %763 = vmatmul.mubr.msk.bf16.gmra.mxu1 %vm180_vm0, %v171_v32 }
  0xc8   :  { %v704_v33 = vpop.f32.mrf.mxu0 }
  0xc9   :  { %568 = vst [vmem:[%s1205_s2 + $0x10] sm:$0xff] %v704_v33  ;;  %v736_v34 = vpop.f32.mrf.mxu1 }
  0xca   :  { %600 = vst [vmem:[%s1205_s2 + $0x110] sm:$0xff] %v736_v34  ;;  %v311_v35 = vpop.f32.mrf.mxu0 }
  0xcb   :  { %566 = vst [vmem:[%s1205_s2] sm:$0xff] %v311_v35  ;;  %v439_v36 = vpop.f32.mrf.mxu1 }
  0xcc   :  { %598 = vst [vmem:[%s1205_s2 + $0x100] sm:$0xff] %v439_v36  ;;  %v705_v37 = vpop.f32.mrf.mxu0 }
  0xcd   :  { %569 = vst [vmem:[%s1205_s2 + $0x18] sm:$0xff] %v705_v37  ;;  %v737_v38 = vpop.f32.mrf.mxu1 }
  0xce   :  { %601 = vst [vmem:[%s1205_s2 + $0x118] sm:$0xff] %v737_v38  ;;  %v314_v39 = vpop.f32.mrf.mxu0 }
  0xcf   :  { %567 = vst [vmem:[%s1205_s2 + $0x8] sm:$0xff] %v314_v39  ;;  %v442_v40 = vpop.f32.mrf.mxu1 }
  0xd0   :  { %599 = vst [vmem:[%s1205_s2 + $0x108] sm:$0xff] %v442_v40  ;;  %v708_v41 = vpop.f32.mrf.mxu0 }
  0xd1   :  { %572 = vst [vmem:[%s1205_s2 + $0x30] sm:$0xff] %v708_v41  ;;  %v740_v42 = vpop.f32.mrf.mxu1 }
  0xd2   :  { %604 = vst [vmem:[%s1205_s2 + $0x130] sm:$0xff] %v740_v42  ;;  %v327_v43 = vpop.f32.mrf.mxu0 }
  0xd3   :  { %570 = vst [vmem:[%s1205_s2 + $0x20] sm:$0xff] %v327_v43  ;;  %v455_v44 = vpop.f32.mrf.mxu1 }
  0xd4   :  { %602 = vst [vmem:[%s1205_s2 + $0x120] sm:$0xff] %v455_v44  ;;  %v709_v45 = vpop.f32.mrf.mxu0 }
  0xd5   :  { %573 = vst [vmem:[%s1205_s2 + $0x38] sm:$0xff] %v709_v45  ;;  %v741_v46 = vpop.f32.mrf.mxu1 }
  0xd6   :  { %605 = vst [vmem:[%s1205_s2 + $0x138] sm:$0xff] %v741_v46  ;;  %v330_v47 = vpop.f32.mrf.mxu0 }
  0xd7   :  { %571 = vst [vmem:[%s1205_s2 + $0x28] sm:$0xff] %v330_v47  ;;  %v458_v48 = vpop.f32.mrf.mxu1 }
  0xd8   :  { %603 = vst [vmem:[%s1205_s2 + $0x128] sm:$0xff] %v458_v48  ;;  %v712_v49 = vpop.f32.mrf.mxu0 }
  0xd9   :  { %576 = vst [vmem:[%s1205_s2 + $0x50] sm:$0xff] %v712_v49  ;;  %v744_v50 = vpop.f32.mrf.mxu1 }
  0xda   :  { %608 = vst [vmem:[%s1205_s2 + $0x150] sm:$0xff] %v744_v50  ;;  %v343_v51 = vpop.f32.mrf.mxu0 }
  0xdb   :  { %574 = vst [vmem:[%s1205_s2 + $0x40] sm:$0xff] %v343_v51  ;;  %v471_v52 = vpop.f32.mrf.mxu1 }
  0xdc   :  { %606 = vst [vmem:[%s1205_s2 + $0x140] sm:$0xff] %v471_v52  ;;  %v713_v53 = vpop.f32.mrf.mxu0 }
  0xdd   :  { %577 = vst [vmem:[%s1205_s2 + $0x58] sm:$0xff] %v713_v53  ;;  %v745_v54 = vpop.f32.mrf.mxu1 }
  0xde   :  { %609 = vst [vmem:[%s1205_s2 + $0x158] sm:$0xff] %v745_v54  ;;  %v346_v55 = vpop.f32.mrf.mxu0 }
  0xdf   :  { %575 = vst [vmem:[%s1205_s2 + $0x48] sm:$0xff] %v346_v55  ;;  %v474_v56 = vpop.f32.mrf.mxu1 }
  0xe0   :  { %607 = vst [vmem:[%s1205_s2 + $0x148] sm:$0xff] %v474_v56  ;;  %v716_v57 = vpop.f32.mrf.mxu0 }
  0xe1   :  { %580 = vst [vmem:[%s1205_s2 + $0x70] sm:$0xff] %v716_v57  ;;  %v748_v58 = vpop.f32.mrf.mxu1 }
  0xe2   :  { %612 = vst [vmem:[%s1205_s2 + $0x170] sm:$0xff] %v748_v58  ;;  %v359_v59 = vpop.f32.mrf.mxu0 }
  0xe3   :  { %578 = vst [vmem:[%s1205_s2 + $0x60] sm:$0xff] %v359_v59  ;;  %v487_v60 = vpop.f32.mrf.mxu1 }
  0xe4   :  { %610 = vst [vmem:[%s1205_s2 + $0x160] sm:$0xff] %v487_v60  ;;  %v717_v61 = vpop.f32.mrf.mxu0 }
  0xe5   :  { %581 = vst [vmem:[%s1205_s2 + $0x78] sm:$0xff] %v717_v61  ;;  %v749_v62 = vpop.f32.mrf.mxu1 }
  0xe6   :  { %613 = vst [vmem:[%s1205_s2 + $0x178] sm:$0xff] %v749_v62  ;;  %v362_v63 = vpop.f32.mrf.mxu0 }
  0xe7   :  { %579 = vst [vmem:[%s1205_s2 + $0x68] sm:$0xff] %v362_v63  ;;  %v490_v0 = vpop.f32.mrf.mxu1 }
  0xe8   :  { %611 = vst [vmem:[%s1205_s2 + $0x168] sm:$0xff] %v490_v0  ;;  %v720_v1 = vpop.f32.mrf.mxu0 }
  0xe9   :  { %584 = vst [vmem:[%s1205_s2 + $0x90] sm:$0xff] %v720_v1  ;;  %v752_v2 = vpop.f32.mrf.mxu1 }
  0xea   :  { %616 = vst [vmem:[%s1205_s2 + $0x190] sm:$0xff] %v752_v2  ;;  %v375_v3 = vpop.f32.mrf.mxu0 }
  0xeb   :  { %582 = vst [vmem:[%s1205_s2 + $0x80] sm:$0xff] %v375_v3  ;;  %v503_v4 = vpop.f32.mrf.mxu1 }
  0xec   :  { %614 = vst [vmem:[%s1205_s2 + $0x180] sm:$0xff] %v503_v4  ;;  %v721_v5 = vpop.f32.mrf.mxu0 }
  0xed   :  { %585 = vst [vmem:[%s1205_s2 + $0x98] sm:$0xff] %v721_v5  ;;  %v753_v6 = vpop.f32.mrf.mxu1 }
  0xee   :  { %617 = vst [vmem:[%s1205_s2 + $0x198] sm:$0xff] %v753_v6  ;;  %v378_v7 = vpop.f32.mrf.mxu0 }
  0xef   :  { %583 = vst [vmem:[%s1205_s2 + $0x88] sm:$0xff] %v378_v7  ;;  %v506_v8 = vpop.f32.mrf.mxu1 }
  0xf0   :  { %615 = vst [vmem:[%s1205_s2 + $0x188] sm:$0xff] %v506_v8  ;;  %v724_v9 = vpop.f32.mrf.mxu0 }
  0xf1   :  { %588 = vst [vmem:[%s1205_s2 + $0xb0] sm:$0xff] %v724_v9  ;;  %v756_v10 = vpop.f32.mrf.mxu1 }
  0xf2   :  { %620 = vst [vmem:[%s1205_s2 + $0x1b0] sm:$0xff] %v756_v10  ;;  %v391_v11 = vpop.f32.mrf.mxu0 }
  0xf3   :  { %586 = vst [vmem:[%s1205_s2 + $0xa0] sm:$0xff] %v391_v11  ;;  %v519_v12 = vpop.f32.mrf.mxu1 }
  0xf4   :  { %618 = vst [vmem:[%s1205_s2 + $0x1a0] sm:$0xff] %v519_v12  ;;  %v725_v13 = vpop.f32.mrf.mxu0 }
  0xf5   :  { %589 = vst [vmem:[%s1205_s2 + $0xb8] sm:$0xff] %v725_v13  ;;  %v757_v14 = vpop.f32.mrf.mxu1 }
  0xf6   :  { %621 = vst [vmem:[%s1205_s2 + $0x1b8] sm:$0xff] %v757_v14  ;;  %v394_v15 = vpop.f32.mrf.mxu0 }
  0xf7   :  { %587 = vst [vmem:[%s1205_s2 + $0xa8] sm:$0xff] %v394_v15  ;;  %v522_v16 = vpop.f32.mrf.mxu1 }
  0xf8   :  { %619 = vst [vmem:[%s1205_s2 + $0x1a8] sm:$0xff] %v522_v16  ;;  %v728_v17 = vpop.f32.mrf.mxu0 }
  0xf9   :  { %592 = vst [vmem:[%s1205_s2 + $0xd0] sm:$0xff] %v728_v17  ;;  %v760_v18 = vpop.f32.mrf.mxu1 }
  0xfa   :  { %624 = vst [vmem:[%s1205_s2 + $0x1d0] sm:$0xff] %v760_v18  ;;  %v407_v19 = vpop.f32.mrf.mxu0 }
  0xfb   :  { %590 = vst [vmem:[%s1205_s2 + $0xc0] sm:$0xff] %v407_v19  ;;  %v535_v20 = vpop.f32.mrf.mxu1 }
  0xfc   :  { %622 = vst [vmem:[%s1205_s2 + $0x1c0] sm:$0xff] %v535_v20  ;;  %v729_v21 = vpop.f32.mrf.mxu0 }
  0xfd   :  { %593 = vst [vmem:[%s1205_s2 + $0xd8] sm:$0xff] %v729_v21  ;;  %v761_v22 = vpop.f32.mrf.mxu1 }
  0xfe   :  { %625 = vst [vmem:[%s1205_s2 + $0x1d8] sm:$0xff] %v761_v22  ;;  %v410_v23 = vpop.f32.mrf.mxu0 }
  0xff   :  { %591 = vst [vmem:[%s1205_s2 + $0xc8] sm:$0xff] %v410_v23  ;;  %v538_v24 = vpop.f32.mrf.mxu1 }
 0x100   :  { %623 = vst [vmem:[%s1205_s2 + $0x1c8] sm:$0xff] %v538_v24  ;;  %v732_v25 = vpop.f32.mrf.mxu0 }
 0x101   :  { %596 = vst [vmem:[%s1205_s2 + $0xf0] sm:$0xff] %v732_v25  ;;  %v764_v26 = vpop.f32.mrf.mxu1 }
 0x102   :  { %628 = vst [vmem:[%s1205_s2 + $0x1f0] sm:$0xff] %v764_v26  ;;  %v423_v27 = vpop.f32.mrf.mxu0 }
 0x103   :  { %594 = vst [vmem:[%s1205_s2 + $0xe0] sm:$0xff] %v423_v27  ;;  %v551_v28 = vpop.f32.mrf.mxu1 }
 0x104   :  { %626 = vst [vmem:[%s1205_s2 + $0x1e0] sm:$0xff] %v551_v28  ;;  %v733_v29 = vpop.f32.mrf.mxu0 }
 0x105   :  { %597 = vst [vmem:[%s1205_s2 + $0xf8] sm:$0xff] %v733_v29  ;;  %v765_v30 = vpop.f32.mrf.mxu1 }
 0x106   :  { %629 = vst [vmem:[%s1205_s2 + $0x1f8] sm:$0xff] %v765_v30  ;;  %v426_v31 = vpop.f32.mrf.mxu0 }
 0x107   :  { %595 = vst [vmem:[%s1205_s2 + $0xe8] sm:$0xff] %v426_v31  ;;  %v554_v32 = vpop.f32.mrf.mxu1 }
 0x108   :  { %627 = vst [vmem:[%s1205_s2 + $0x1e8] sm:$0xff] %v554_v32 }

// kernel: _lambda_.49
= control target key start
LH: loop header
LB: loop body
LE: loop exit
PB: predicated region body
PF: predicated region fallthrough
CT: control target
= control target key end

     0   :  { %s1022_s9 = smov 0   ;;  %s1831_s0 = inlined_call_operand.vmem [shape: f32[2048,3], index: 0, kind: input, shape index: {}]   ;;  %s1832_s1 = inlined_call_operand.vmem [shape: f32[1,3], index: 1, kind: input, shape index: {}]   ;;  %s1833_s2 = inlined_call_operand.vmem [shape: f32[2048,3], index: 2, kind: output, shape index: {}]  }
   0x1 LB: > { %s723_s10 = sadd.s32 4294967295, %s1005_s9   ;;  %p727_p0 = scmp.ge.s32.totalorder %s1005_s9, 1  ;;  %s1005_s9 = sphi %s1022_s9, %s12_s9  }
   0x2   : > { %p113_p1 = scmp.lt.s32.totalorder %s1005_s9, 3 }
   0x4   : > { %p114_p2 = pnand %p727_p0, %p113_p1 }
   0x6   : > { %117 = sbr.rel (%p114_p2) target bundleno = 165 (0xa5), region = 28 }
   0xb   : > { %s728_s11 = sshll.u32 %s723_s10, 7  ;;  %v1036_v0 = vld [vmem:[%s1832_s1] ss:$0 sm:$0xff]  ;;  %vm538_vm0 = vcmask 23552  }
   0xc   : > { %p136_p3 = scmp.lt.s32.totalorder %s728_s11, 255 }
   0xe   : > { %s1869_s11 = smov (!%p136_p3, %s728_s11), 255 }
   0xf   : > { %s729_s12 = sshll.u32 %s1869_s11, 3 }
  0x10   : > { %s1043_s17 = scalar_lea.vmem %s1831_s0, %s729_s12  ;;  %s1097_s20 = scalar_lea.vmem %s1833_s2, %s729_s12 }
  0x11   : > { %v147_v1 = vld [vmem:[%s1043_s17] sm:$0xff]  ;;  %v148_v2 = vld [vmem:[%s1043_s17 + $0x8] sm:$0xff]  ;;  %v149_v3 = vld [vmem:[%s1043_s17 + $0x10] sm:$0xff] }
  0x12   : > { %v282_v4 = vadd.f32 %v1036_v0, %v147_v1  ;;  %v283_v5 = vadd.f32 %v1036_v0, %v148_v2  ;;  %v284_v6 = vadd.f32 %v1036_v0, %v149_v3  ;;  %v150_v7 = vld [vmem:[%s1043_s17 + $0x18] sm:$0xff]  ;;  %v151_v8 = vld [vmem:[%s1043_s17 + $0x20] sm:$0xff]  ;;  %v152_v9 = vld [vmem:[%s1043_s17 + $0x28] sm:$0xff] }
  0x13   : > { %v285_v10 = vadd.f32 %v1036_v0, %v150_v7  ;;  %v153_v11 = vld [vmem:[%s1043_s17 + $0x30] sm:$0xff]  ;;  %v286_v12 = vadd.f32 %v1036_v0, %v151_v8  ;;  %v154_v13 = vld [vmem:[%s1043_s17 + $0x38] sm:$0xff]  ;;  %v287_v14 = vadd.f32 %v1036_v0, %v152_v9  ;;  %v155_v15 = vld [vmem:[%s1043_s17 + $0x40] sm:$0xff] }
  0x14   : > { %743 = vtanh.f32 %v282_v4  ;;  %v288_v16 = vadd.f32 %v1036_v0, %v153_v11  ;;  %v156_v17 = vld [vmem:[%s1043_s17 + $0x48] sm:$0xff]  ;;  %v289_v18 = vadd.f32 %v1036_v0, %v154_v13  ;;  %v157_v19 = vld [vmem:[%s1043_s17 + $0x50] sm:$0xff]  ;;  %v290_v20 = vadd.f32 %v1036_v0, %v155_v15  ;;  %v158_v21 = vld [vmem:[%s1043_s17 + $0x58] sm:$0xff] }
  0x15   : > { %745 = vtanh.f32 %v283_v5  ;;  %v291_v22 = vadd.f32 %v1036_v0, %v156_v17  ;;  %v159_v23 = vld [vmem:[%s1043_s17 + $0x60] sm:$0xff]  ;;  %v292_v24 = vadd.f32 %v1036_v0, %v157_v19  ;;  %v160_v25 = vld [vmem:[%s1043_s17 + $0x68] sm:$0xff]  ;;  %v161_v26 = vld [vmem:[%s1043_s17 + $0x70] sm:$0xff]  ;;  %v293_v28 = vadd.f32 %v1036_v0, %v158_v21 }
  0x16   : > { %747 = vtanh.f32 %v284_v6  ;;  %v162_v27 = vld [vmem:[%s1043_s17 + $0x78] sm:$0xff]  ;;  %v163_v29 = vld [vmem:[%s1043_s17 + $0x80] sm:$0xff]  ;;  %v164_v30 = vld [vmem:[%s1043_s17 + $0x88] sm:$0xff]  ;;  %v294_v32 = vadd.f32 %v1036_v0, %v159_v23  ;;  %v295_v36 = vadd.f32 %v1036_v0, %v160_v25  ;;  %v296_v37 = vadd.f32 %v1036_v0, %v161_v26 }
  0x17   : > { %749 = vtanh.f32 %v285_v10  ;;  %v165_v31 = vld [vmem:[%s1043_s17 + $0x90] sm:$0xff]  ;;  %v166_v33 = vld [vmem:[%s1043_s17 + $0x98] sm:$0xff]  ;;  %v167_v34 = vld [vmem:[%s1043_s17 + $0xa0] sm:$0xff]  ;;  %v297_v38 = vadd.f32 %v1036_v0, %v162_v27  ;;  %v298_v42 = vadd.f32 %v1036_v0, %v163_v29  ;;  %v299_v43 = vadd.f32 %v1036_v0, %v164_v30 }
  0x18   : > { %751 = vtanh.f32 %v286_v12  ;;  %v168_v35 = vld [vmem:[%s1043_s17 + $0xa8] sm:$0xff]  ;;  %v169_v39 = vld [vmem:[%s1043_s17 + $0xb0] sm:$0xff]  ;;  %v170_v40 = vld [vmem:[%s1043_s17 + $0xb8] sm:$0xff]  ;;  %v300_v44 = vadd.f32 %v1036_v0, %v165_v31  ;;  %v301_v48 = vadd.f32 %v1036_v0, %v166_v33  ;;  %v1101_v49 = vadd.f32 %v1036_v0, %v167_v34 }
  0x19   : > { %753 = vtanh.f32 %v287_v14  ;;  %v171_v41 = vld [vmem:[%s1043_s17 + $0xc0] sm:$0xff]  ;;  %v172_v45 = vld [vmem:[%s1043_s17 + $0xc8] sm:$0xff]  ;;  %v173_v46 = vld [vmem:[%s1043_s17 + $0xd0] sm:$0xff]  ;;  %v1104_v50 = vadd.f32 %v1036_v0, %v168_v35  ;;  %v1110_v54 = vadd.f32 %v1036_v0, %v169_v39  ;;  %v1113_v55 = vadd.f32 %v1036_v0, %v170_v40 }
  0x1a   : > { %755 = vtanh.f32 %v288_v16  ;;  %v174_v47 = vld [vmem:[%s1043_s17 + $0xd8] sm:$0xff]  ;;  %v175_v51 = vld [vmem:[%s1043_s17 + $0xe0] sm:$0xff]  ;;  %v176_v52 = vld [vmem:[%s1043_s17 + $0xe8] sm:$0xff]  ;;  %v1116_v56 = vadd.f32 %v1036_v0, %v171_v41  ;;  %v1122_v61 = vadd.f32 %v1036_v0, %v172_v45  ;;  %v1125_v62 = vadd.f32 %v1036_v0, %v173_v46 }
  0x1b   : > { %757 = vtanh.f32 %v289_v18  ;;  %v177_v53 = vld [vmem:[%s1043_s17 + $0xf0] sm:$0xff]  ;;  %v178_v57 = vld [vmem:[%s1043_s17 + $0xf8] sm:$0xff]  ;;  %v179_v58 = vld [vmem:[%s1043_s17 + $0x100] sm:$0xff]  ;;  %v1128_v63 = vadd.f32 %v1036_v0, %v174_v47  ;;  %v1136_v5 = vadd.f32 %v1036_v0, %v175_v51  ;;  %v1139_v6 = vadd.f32 %v1036_v0, %v176_v52 }
  0x1c   : > { %759 = vtanh.f32 %v290_v20  ;;  %v180_v59 = vld [vmem:[%s1043_s17 + $0x108] sm:$0xff]  ;;  %v181_v1 = vld [vmem:[%s1043_s17 + $0x110] sm:$0xff]  ;;  %v182_v2 = vld [vmem:[%s1043_s17 + $0x118] sm:$0xff]  ;;  %v1142_v7 = vadd.f32 %v1036_v0, %v177_v53  ;;  %v1150_v12 = vadd.f32 %v1036_v0, %v178_v57  ;;  %v1153_v13 = vadd.f32 %v1036_v0, %v179_v58 }
  0x1d   : > { %761 = vtanh.f32 %v291_v22  ;;  %v183_v3 = vld [vmem:[%s1043_s17 + $0x120] sm:$0xff]  ;;  %v184_v8 = vld [vmem:[%s1043_s17 + $0x128] sm:$0xff]  ;;  %v185_v9 = vld [vmem:[%s1043_s17 + $0x130] sm:$0xff]  ;;  %v1156_v14 = vadd.f32 %v1036_v0, %v180_v59  ;;  %v1164_v19 = vadd.f32 %v1036_v0, %v181_v1  ;;  %v1167_v20 = vadd.f32 %v1036_v0, %v182_v2 }
  0x1e   : > { %763 = vtanh.f32 %v292_v24  ;;  %v186_v10 = vld [vmem:[%s1043_s17 + $0x138] sm:$0xff]  ;;  %v187_v15 = vld [vmem:[%s1043_s17 + $0x140] sm:$0xff]  ;;  %v188_v16 = vld [vmem:[%s1043_s17 + $0x148] sm:$0xff]  ;;  %v1170_v21 = vadd.f32 %v1036_v0, %v183_v3  ;;  %v1176_v24 = vadd.f32 %v1036_v0, %v184_v8  ;;  %v1179_v25 = vadd.f32 %v1036_v0, %v185_v9 }
  0x1f   : > { %765 = vtanh.f32 %v293_v28  ;;  %v189_v17 = vld [vmem:[%s1043_s17 + $0x150] sm:$0xff]  ;;  %v190_v22 = vld [vmem:[%s1043_s17 + $0x158] sm:$0xff]  ;;  %v1182_v26 = vadd.f32 %v1036_v0, %v186_v10  ;;  %v1187_v28 = vadd.f32 %v1036_v0, %v187_v15  ;;  %v1190_v29 = vadd.f32 %v1036_v0, %v188_v16  ;;  %v211_v31 = vld [vmem:[%s1043_s17 + $0x200] sm:$0xff] }
  0x20   : > { %767 = vtanh.f32 %v294_v32  ;;  %v1193_v30 = vadd.f32 %v1036_v0, %v189_v17  ;;  %v212_v32 = vld [vmem:[%s1043_s17 + $0x208] sm:$0xff]  ;;  %v1200_v34 = vadd.f32 %v1036_v0, %v190_v22  ;;  %v1203_v35 = vadd.f32 %v1036_v0, %v211_v31  ;;  %v215_v39 = vld [vmem:[%s1043_s17 + $0x220] sm:$0xff]  ;;  %v217_v45 = vld [vmem:[%s1043_s17 + $0x230] sm:$0xff] }
  0x21   : > { %v744_v60 = vpop.eup %743  ;;  %769 = vtanh.f32 %v295_v36  ;;  %v1206_v36 = vadd.f32 %v1036_v0, %v212_v32  ;;  %v218_v46 = vld [vmem:[%s1043_s17 + $0x238] sm:$0xff]  ;;  %v219_v52 = vld [vmem:[%s1043_s17 + $0x240] sm:$0xff]  ;;  %v220_v53 = vld [vmem:[%s1043_s17 + $0x248] sm:$0xff] }
  0x22   : > { %v746_v4 = vpop.eup %745  ;;  %539 = vst.msk [vmem:[%s1097_s20] sm:$0xff] %vm538_vm0, %v744_v60  ;;  %771 = vtanh.f32 %v296_v37  ;;  %v213_v37 = vld [vmem:[%s1043_s17 + $0x210] sm:$0xff]  ;;  %v1236_v51 = vadd.f32 %v1036_v0, %v218_v46  ;;  %v1248_v59 = vadd.f32 %v1036_v0, %v220_v53  ;;  %v222_v1 = vld [vmem:[%s1043_s17 + $0x258] sm:$0xff]  ;;  %v223_v2 = vld [vmem:[%s1043_s17 + $0x260] sm:$0xff] }
  0x23   : > { %v748_v11 = vpop.eup %747  ;;  %540 = vst.msk [vmem:[%s1097_s20 + $0x8] sm:$0xff] %vm538_vm0, %v746_v4  ;;  %773 = vtanh.f32 %v297_v38  ;;  %v214_v38 = vld [vmem:[%s1043_s17 + $0x218] sm:$0xff]  ;;  %v1215_v41 = vadd.f32 %v1036_v0, %v213_v37  ;;  %v221_v57 = vld [vmem:[%s1043_s17 + $0x250] sm:$0xff]  ;;  %v224_v3 = vld [vmem:[%s1043_s17 + $0x268] sm:$0xff]  ;;  %v1263_v8 = vadd.f32 %v1036_v0, %v223_v2 }
  0x24   : > { %v750_v18 = vpop.eup %749  ;;  %541 = vst.msk [vmem:[%s1097_s20 + $0x10] sm:$0xff] %vm538_vm0, %v748_v11  ;;  %775 = vtanh.f32 %v298_v42  ;;  %v1218_v42 = vadd.f32 %v1036_v0, %v214_v38  ;;  %v1251_v60 = vadd.f32 %v1036_v0, %v221_v57  ;;  %v1266_v9 = vadd.f32 %v1036_v0, %v224_v3  ;;  %v225_v10 = vld [vmem:[%s1043_s17 + $0x270] sm:$0xff]  ;;  %v226_v11 = vld [vmem:[%s1043_s17 + $0x278] sm:$0xff]  ;;  %v227_v15 = vld [vmem:[%s1043_s17 + $0x280] sm:$0xff] }
  0x25   : > { %v752_v23 = vpop.eup %751  ;;  %542 = vst.msk [vmem:[%s1097_s20 + $0x18] sm:$0xff] %vm538_vm0, %v750_v18  ;;  %777 = vtanh.f32 %v299_v43  ;;  %v1221_v43 = vadd.f32 %v1036_v0, %v215_v39  ;;  %v1278_v17 = vadd.f32 %v1036_v0, %v226_v11  ;;  %v1281_v18 = vadd.f32 %v1036_v0, %v227_v15  ;;  %v228_v22 = vld [vmem:[%s1043_s17 + $0x288] sm:$0xff]  ;;  %v231_v37 = vld [vmem:[%s1043_s17 + $0x2a0] sm:$0xff]  ;;  %v233_v39 = vld [vmem:[%s1043_s17 + $0x2b0] sm:$0xff] }
  0x26   : > { %v754_v27 = vpop.eup %753  ;;  %543 = vst.msk [vmem:[%s1097_s20 + $0x20] sm:$0xff] %vm538_vm0, %v752_v23  ;;  %779 = vtanh.f32 %v300_v44  ;;  %v216_v44 = vld [vmem:[%s1043_s17 + $0x228] sm:$0xff]  ;;  %v229_v23 = vld [vmem:[%s1043_s17 + $0x290] sm:$0xff]  ;;  %v234_v46 = vld [vmem:[%s1043_s17 + $0x2b8] sm:$0xff] }
  0x27   : > { %v756_v33 = vpop.eup %755  ;;  %544 = vst.msk [vmem:[%s1097_s20 + $0x28] sm:$0xff] %vm538_vm0, %v754_v27  ;;  %781 = vtanh.f32 %v301_v48  ;;  %v1230_v48 = vadd.f32 %v1036_v0, %v216_v44  ;;  %v230_v27 = vld [vmem:[%s1043_s17 + $0x298] sm:$0xff]  ;;  %v1293_v32 = vadd.f32 %v1036_v0, %v229_v23  ;;  %v232_v38 = vld [vmem:[%s1043_s17 + $0x2a8] sm:$0xff]  ;;  %v239_v3 = vld [vmem:[%s1043_s17 + $0x2e0] sm:$0xff] }
  0x28   : > { %v758_v40 = vpop.eup %757  ;;  %545 = vst.msk [vmem:[%s1097_s20 + $0x30] sm:$0xff] %vm538_vm0, %v756_v33  ;;  %783 = vtanh.f32 %v1101_v49  ;;  %v1233_v49 = vadd.f32 %v1036_v0, %v217_v45  ;;  %v1296_v33 = vadd.f32 %v1036_v0, %v230_v27  ;;  %v1308_v44 = vadd.f32 %v1036_v0, %v232_v38  ;;  %v238_v2 = vld [vmem:[%s1043_s17 + $0x2d8] sm:$0xff]  ;;  %v240_v15 = vld [vmem:[%s1043_s17 + $0x2e8] sm:$0xff] }
  0x29   : > { %v760_v47 = vpop.eup %759  ;;  %546 = vst.msk [vmem:[%s1097_s20 + $0x38] sm:$0xff] %vm538_vm0, %v758_v40  ;;  %785 = vtanh.f32 %v1104_v50  ;;  %v1245_v50 = vadd.f32 %v1036_v0, %v219_v52  ;;  %v1311_v45 = vadd.f32 %v1036_v0, %v233_v39  ;;  %v236_v52 = vld [vmem:[%s1043_s17 + $0x2c8] sm:$0xff]  ;;  %v1341_v11 = vadd.f32 %v1036_v0, %v239_v3  ;;  %v245_v39 = vld [vmem:[%s1043_s17 + $0x310] sm:$0xff] }
  0x2a   : > { %v762_v58 = vpop.eup %761  ;;  %547 = vst.msk [vmem:[%s1097_s20 + $0x40] sm:$0xff] %vm538_vm0, %v760_v47  ;;  %787 = vtanh.f32 %v1110_v54  ;;  %v1260_v54 = vadd.f32 %v1036_v0, %v222_v1  ;;  %v235_v47 = vld [vmem:[%s1043_s17 + $0x2c0] sm:$0xff]  ;;  %v237_v1 = vld [vmem:[%s1043_s17 + $0x2d0] sm:$0xff]  ;;  %v244_v38 = vld [vmem:[%s1043_s17 + $0x308] sm:$0xff] }
  0x2b   : > { %v764_v4 = vpop.eup %763  ;;  %548 = vst.msk [vmem:[%s1097_s20 + $0x48] sm:$0xff] %vm538_vm0, %v762_v58  ;;  %789 = vtanh.f32 %v1113_v55  ;;  %v1275_v55 = vadd.f32 %v1036_v0, %v225_v10  ;;  %v1323_v57 = vadd.f32 %v1036_v0, %v235_v47  ;;  %v1326_v58 = vadd.f32 %v1036_v0, %v236_v52  ;;  %v246_v52 = vld [vmem:[%s1043_s17 + $0x318] sm:$0xff] }
  0x2c   : > { %v766_v16 = vpop.eup %765  ;;  %549 = vst.msk [vmem:[%s1097_s20 + $0x50] sm:$0xff] %vm538_vm0, %v764_v4  ;;  %791 = vtanh.f32 %v1116_v56  ;;  %v1290_v56 = vadd.f32 %v1036_v0, %v228_v22  ;;  %v1338_v10 = vadd.f32 %v1036_v0, %v238_v2  ;;  %v242_v22 = vld [vmem:[%s1043_s17 + $0x2f8] sm:$0xff]  ;;  %v1371_v47 = vadd.f32 %v1036_v0, %v245_v39  ;;  %v252_v39 = vld [vmem:[%s1043_s17 + $0x348] sm:$0xff] }
  0x2d   : > { %v768_v31 = vpop.eup %767  ;;  %550 = vst.msk [vmem:[%s1097_s20 + $0x58] sm:$0xff] %vm538_vm0, %v766_v16  ;;  %793 = vtanh.f32 %v1122_v61  ;;  %v1305_v61 = vadd.f32 %v1036_v0, %v231_v37  ;;  %v241_v16 = vld [vmem:[%s1043_s17 + $0x2f0] sm:$0xff]  ;;  %v243_v37 = vld [vmem:[%s1043_s17 + $0x300] sm:$0xff] }
  0x2e   : > { %v770_v40 = vpop.eup %769  ;;  %551 = vst.msk [vmem:[%s1097_s20 + $0x60] sm:$0xff] %vm538_vm0, %v768_v31  ;;  %795 = vtanh.f32 %v1125_v62  ;;  %v1320_v62 = vadd.f32 %v1036_v0, %v234_v46  ;;  %v1353_v27 = vadd.f32 %v1036_v0, %v241_v16  ;;  %v1356_v31 = vadd.f32 %v1036_v0, %v242_v22  ;;  %v250_v16 = vld [vmem:[%s1043_s17 + $0x338] sm:$0xff]  ;;  %v251_v22 = vld [vmem:[%s1043_s17 + $0x340] sm:$0xff] }
  0x2f   : > { %v772_v53 = vpop.eup %771  ;;  %552 = vst.msk [vmem:[%s1097_s20 + $0x68] sm:$0xff] %vm538_vm0, %v770_v40  ;;  %797 = vtanh.f32 %v1128_v63  ;;  %v1335_v63 = vadd.f32 %v1036_v0, %v237_v1  ;;  %v1368_v46 = vadd.f32 %v1036_v0, %v244_v38  ;;  %v248_v1 = vld [vmem:[%s1043_s17 + $0x328] sm:$0xff]  ;;  %v1401_v38 = vadd.f32 %v1036_v0, %v251_v22  ;;  %v257_v22 = vld [vmem:[%s1043_s17 + $0x370] sm:$0xff] }
  0x30   : > { %v774_v4 = vpop.eup %773  ;;  %553 = vst.msk [vmem:[%s1097_s20 + $0x70] sm:$0xff] %vm538_vm0, %v772_v53  ;;  %799 = vtanh.f32 %v1136_v5  ;;  %v1350_v5 = vadd.f32 %v1036_v0, %v240_v15  ;;  %v247_v53 = vld [vmem:[%s1043_s17 + $0x320] sm:$0xff]  ;;  %v249_v15 = vld [vmem:[%s1043_s17 + $0x330] sm:$0xff] }
  0x31   : > { %v776_v23 = vpop.eup %775  ;;  %554 = vst.msk [vmem:[%s1097_s20 + $0x78] sm:$0xff] %vm538_vm0, %v774_v4  ;;  %801 = vtanh.f32 %v1139_v6  ;;  %v1365_v6 = vadd.f32 %v1036_v0, %v243_v37  ;;  %v1383_v3 = vadd.f32 %v1036_v0, %v247_v53  ;;  %v1386_v4 = vadd.f32 %v1036_v0, %v248_v1  ;;  %1834 = vst [vmem:[#allocation2_spill] sm:$0xff] %v1401_v38 }
  0x32   : > { %v778_v40 = vpop.eup %777  ;;  %555 = vst.msk [vmem:[%s1097_s20 + $0x80] sm:$0xff] %vm538_vm0, %v776_v23  ;;  %803 = vtanh.f32 %v1142_v7  ;;  %v1380_v7 = vadd.f32 %v1036_v0, %v246_v52  ;;  %v1398_v37 = vadd.f32 %v1036_v0, %v250_v16  ;;  %v254_v52 = vld [vmem:[%s1043_s17 + $0x358] sm:$0xff]  ;;  %v256_v16 = vld [vmem:[%s1043_s17 + $0x368] sm:$0xff] }
  0x33   : > { %v780_v2 = vpop.eup %779  ;;  %556 = vst.msk [vmem:[%s1097_s20 + $0x88] sm:$0xff] %vm538_vm0, %v778_v40  ;;  %805 = vtanh.f32 %v1150_v12  ;;  %v1395_v12 = vadd.f32 %v1036_v0, %v249_v15  ;;  %v253_v40 = vld [vmem:[%s1043_s17 + $0x350] sm:$0xff]  ;;  %v255_v15 = vld [vmem:[%s1043_s17 + $0x360] sm:$0xff] }
  0x34   : > { %v782_v23 = vpop.eup %781  ;;  %557 = vst.msk [vmem:[%s1097_s20 + $0x90] sm:$0xff] %vm538_vm0, %v780_v2  ;;  %807 = vtanh.f32 %v1153_v13  ;;  %v1410_v13 = vadd.f32 %v1036_v0, %v252_v39  ;;  %v1413_v1 = vadd.f32 %v1036_v0, %v253_v40  ;;  %v1416_v2 = vadd.f32 %v1036_v0, %v254_v52  ;;  %v258_v40 = vld [vmem:[%s1043_s17 + $0x378] sm:$0xff]  ;;  %v259_v52 = vld [vmem:[%s1043_s17 + $0x380] sm:$0xff] }
  0x35   : > { %v784_v53 = vpop.eup %783  ;;  %558 = vst.msk [vmem:[%s1097_s20 + $0x98] sm:$0xff] %vm538_vm0, %v782_v23  ;;  %809 = vtanh.f32 %v1156_v14  ;;  %v1425_v14 = vadd.f32 %v1036_v0, %v255_v15  ;;  %v1428_v23 = vadd.f32 %v1036_v0, %v256_v16  ;;  %v1431_v39 = vadd.f32 %v1036_v0, %v257_v22  ;;  %v261_v22 = vld [vmem:[%s1043_s17 + $0x390] sm:$0xff] }
  0x36   : > { %1835 = vst [vmem:[#allocation3_spill] sm:$0xff] %v1413_v1  ;;  %1836 = vst [vmem:[#allocation4_spill] sm:$0xff] %v1416_v2  ;;  %v786_v38 = vpop.eup %785  ;;  %811 = vtanh.f32 %v1164_v19  ;;  %v260_v2 = vld [vmem:[%s1043_s17 + $0x388] sm:$0xff]  ;;  %v191_v19 = vld [vmem:[%s1043_s17 + $0x160] sm:$0xff]  ;;  %v1444_v15 = vadd.f32 %v1036_v0, %v259_v52 }
  0x37   : > { %559 = vst.msk [vmem:[%s1097_s20 + $0xa0] sm:$0xff] %vm538_vm0, %v784_v53  ;;  %1837 = vst [vmem:[#allocation5_spill] sm:$0xff] %v1428_v23  ;;  %v788_v1 = vpop.eup %787  ;;  %813 = vtanh.f32 %v1167_v20  ;;  %v1441_v53 = vadd.f32 %v1036_v0, %v258_v40  ;;  %v1447_v16 = vadd.f32 %v1036_v0, %v260_v2  ;;  %v263_v23 = vld [vmem:[%s1043_s17 + $0x3a0] sm:$0xff]  ;;  %v192_v20 = vld [vmem:[%s1043_s17 + $0x168] sm:$0xff]  ;;  %v1457_v40 = vadd.f32 %v1036_v0, %v261_v22 }
  0x38   : > { %1838 = vst [vmem:[#allocation6_spill] sm:$0xff] %v1431_v39  ;;  %560 = vst.msk [vmem:[%s1097_s20 + $0xa8] sm:$0xff] %vm538_vm0, %v786_v38  ;;  %v262_v39 = vld [vmem:[%s1043_s17 + $0x398] sm:$0xff]  ;;  %v790_v38 = vpop.eup %789  ;;  %815 = vtanh.f32 %v1170_v21  ;;  %v1463_v2 = vadd.f32 %v1036_v0, %v263_v23  ;;  %v267_v22 = vld [vmem:[%s1043_s17 + $0x3c0] sm:$0xff] }
  0x39   : > { %1839 = vst [vmem:[#allocation7_spill] sm:$0xff] %v1441_v53  ;;  %1840 = vst [vmem:[#allocation8_spill] sm:$0xff] %v1444_v15  ;;  %v1460_v52 = vadd.f32 %v1036_v0, %v262_v39  ;;  %v265_v15 = vld [vmem:[%s1043_s17 + $0x3b0] sm:$0xff]  ;;  %v266_v53 = vld [vmem:[%s1043_s17 + $0x3b8] sm:$0xff]  ;;  %817 = vtanh.f32 %v1176_v24  ;;  %v1487_v24 = vadd.f32 %v1036_v0, %v267_v22 }
  0x3a   : > { %1841 = vst [vmem:[#allocation9_spill] sm:$0xff] %v1447_v16  ;;  %561 = vst.msk [vmem:[%s1097_s20 + $0xb0] sm:$0xff] %vm538_vm0, %v788_v1  ;;  %v264_v16 = vld [vmem:[%s1043_s17 + $0x3a8] sm:$0xff]  ;;  %v792_v1 = vpop.eup %791  ;;  %v1475_v39 = vadd.f32 %v1036_v0, %v265_v15  ;;  %v1478_v23 = vadd.f32 %v1036_v0, %v266_v53  ;;  %819 = vtanh.f32 %v1179_v25  ;;  %v193_v25 = vld [vmem:[%s1043_s17 + $0x170] sm:$0xff] }
  0x3b   : > { %1842 = vst [vmem:[#allocation10_spill] sm:$0xff] %v1457_v40  ;;  %1843 = vst [vmem:[#allocation11_spill] sm:$0xff] %v1460_v52  ;;  %v1472_v21 = vadd.f32 %v1036_v0, %v264_v16  ;;  %v269_v52 = vld [vmem:[%s1043_s17 + $0x3d0] sm:$0xff]  ;;  %v794_v40 = vpop.eup %793  ;;  %v270_v16 = vld [vmem:[%s1043_s17 + $0x3d8] sm:$0xff]  ;;  %821 = vtanh.f32 %v1182_v26  ;;  %v326_v26 = vadd.f32 %v1036_v0, %v191_v19  ;;  %v328_v19 = vadd.f32 %v1036_v0, %v193_v25 }
  0x3c   : > { %1844 = vst [vmem:[#allocation12_spill] sm:$0xff] %v1463_v2  ;;  %562 = vst.msk [vmem:[%s1097_s20 + $0xb8] sm:$0xff] %vm538_vm0, %v790_v38  ;;  %v268_v2 = vld [vmem:[%s1043_s17 + $0x3c8] sm:$0xff]  ;;  %v1493_v53 = vadd.f32 %v1036_v0, %v269_v52  ;;  %v271_v38 = vld [vmem:[%s1043_s17 + $0x3e0] sm:$0xff]  ;;  %823 = vtanh.f32 %v1187_v28 }
  0x3d   : > { %1845 = vst [vmem:[#allocation13_spill] sm:$0xff] %v1475_v39  ;;  %1846 = vst [vmem:[#allocation14_spill] sm:$0xff] %v1478_v23  ;;  %v1490_v15 = vadd.f32 %v1036_v0, %v268_v2  ;;  %v272_v23 = vld [vmem:[%s1043_s17 + $0x3e8] sm:$0xff]  ;;  %v796_v39 = vpop.eup %795  ;;  %v1506_v2 = vadd.f32 %v1036_v0, %v271_v38  ;;  %v273_v22 = vld [vmem:[%s1043_s17 + $0x3f0] sm:$0xff]  ;;  %825 = vtanh.f32 %v1190_v29 }
  0x3e   : > { %563 = vst.msk [vmem:[%s1097_s20 + $0xc0] sm:$0xff] %vm538_vm0, %v792_v1  ;;  %1848 = vst [vmem:[#allocation16_spill] sm:$0xff] %v1493_v53  ;;  %v1503_v1 = vadd.f32 %v1036_v0, %v270_v16  ;;  %v1509_v52 = vadd.f32 %v1036_v0, %v272_v23  ;;  %v274_v53 = vld [vmem:[%s1043_s17 + $0x3f8] sm:$0xff]  ;;  %v1519_v16 = vadd.f32 %v1036_v0, %v273_v22  ;;  %v195_v28 = vld [vmem:[%s1043_s17 + $0x180] sm:$0xff]  ;;  %827 = vtanh.f32 %v1193_v30 }
  0x3f   : > { %1847 = vst [vmem:[#allocation15_spill] sm:$0xff] %v1490_v15  ;;  %564 = vst.msk [vmem:[%s1097_s20 + $0xc8] sm:$0xff] %vm538_vm0, %v794_v40  ;;  %v798_v15 = vpop.eup %797  ;;  %v194_v40 = vld [vmem:[%s1043_s17 + $0x178] sm:$0xff]  ;;  %v1522_v23 = vadd.f32 %v1036_v0, %v274_v53  ;;  %v196_v53 = vld [vmem:[%s1043_s17 + $0x188] sm:$0xff]  ;;  %829 = vtanh.f32 %v1200_v34  ;;  %v330_v30 = vadd.f32 %v1036_v0, %v195_v28 }
  0x40   : > { %1849 = vst [vmem:[#allocation17_spill] sm:$0xff] %v1509_v52  ;;  %565 = vst.msk [vmem:[%s1097_s20 + $0xd0] sm:$0xff] %vm538_vm0, %v796_v39  ;;  %v800_v38 = vpop.eup %799  ;;  %v327_v39 = vadd.f32 %v1036_v0, %v192_v20  ;;  %v329_v29 = vadd.f32 %v1036_v0, %v194_v40  ;;  %v197_v20 = vld [vmem:[%s1043_s17 + $0x190] sm:$0xff]  ;;  %831 = vtanh.f32 %v326_v26  ;;  %v198_v25 = vld [vmem:[%s1043_s17 + $0x198] sm:$0xff]  ;;  %v331_v34 = vadd.f32 %v1036_v0, %v196_v53 }
  0x41   : > { %1850 = vst [vmem:[#allocation18_spill] sm:$0xff] %v1522_v23  ;;  %566 = vst.msk [vmem:[%s1097_s20 + $0xd8] sm:$0xff] %vm538_vm0, %v798_v15  ;;  %v802_v52 = vpop.eup %801  ;;  %v332_v26 = vadd.f32 %v1036_v0, %v197_v20  ;;  %v200_v28 = vld [vmem:[%s1043_s17 + $0x1a8] sm:$0xff]  ;;  %v201_v53 = vld [vmem:[%s1043_s17 + $0x1b0] sm:$0xff] }
  0x42   : > { %567 = vst.msk [vmem:[%s1097_s20 + $0xe0] sm:$0xff] %vm538_vm0, %v800_v38  ;;  %v804_v22 = vpop.eup %803  ;;  %568 = vst.msk [vmem:[%s1097_s20 + $0xe8] sm:$0xff] %vm538_vm0, %v802_v52  ;;  %833 = vtanh.f32 %v327_v39  ;;  %v199_v52 = vld [vmem:[%s1043_s17 + $0x1a0] sm:$0xff]  ;;  %v333_v39 = vadd.f32 %v1036_v0, %v198_v25  ;;  %v202_v20 = vld [vmem:[%s1043_s17 + $0x1b8] sm:$0xff] }
  0x43   : > { %v806_v15 = vpop.eup %805  ;;  %569 = vst.msk [vmem:[%s1097_s20 + $0xf0] sm:$0xff] %vm538_vm0, %v804_v22  ;;  %835 = vtanh.f32 %v328_v19  ;;  %v334_v19 = vadd.f32 %v1036_v0, %v199_v52  ;;  %v203_v25 = vld [vmem:[%s1043_s17 + $0x1c0] sm:$0xff]  ;;  %v204_v52 = vld [vmem:[%s1043_s17 + $0x1c8] sm:$0xff] }
  0x44   : > { %v808_v38 = vpop.eup %807  ;;  %570 = vst.msk [vmem:[%s1097_s20 + $0xf8] sm:$0xff] %vm538_vm0, %v806_v15  ;;  %837 = vtanh.f32 %v329_v29  ;;  %v335_v29 = vadd.f32 %v1036_v0, %v200_v28  ;;  %v205_v28 = vld [vmem:[%s1043_s17 + $0x1d0] sm:$0xff] }
  0x45   : > { %v810_v40 = vpop.eup %809  ;;  %571 = vst.msk [vmem:[%s1097_s20 + $0x100] sm:$0xff] %vm538_vm0, %v808_v38  ;;  %839 = vtanh.f32 %v330_v30  ;;  %v336_v30 = vadd.f32 %v1036_v0, %v201_v53  ;;  %v206_v53 = vld [vmem:[%s1043_s17 + $0x1d8] sm:$0xff] }
  0x46   : > { %v812_v22 = vpop.eup %811  ;;  %572 = vst.msk [vmem:[%s1097_s20 + $0x108] sm:$0xff] %vm538_vm0, %v810_v40  ;;  %841 = vtanh.f32 %v331_v34  ;;  %v337_v34 = vadd.f32 %v1036_v0, %v202_v20  ;;  %v207_v20 = vld [vmem:[%s1043_s17 + $0x1e0] sm:$0xff] }
  0x47   : > { %v814_v15 = vpop.eup %813  ;;  %573 = vst.msk [vmem:[%s1097_s20 + $0x110] sm:$0xff] %vm538_vm0, %v812_v22  ;;  %843 = vtanh.f32 %v332_v26  ;;  %v338_v26 = vadd.f32 %v1036_v0, %v203_v25 }
  0x48   : > { %v816_v38 = vpop.eup %815  ;;  %574 = vst.msk [vmem:[%s1097_s20 + $0x118] sm:$0xff] %vm538_vm0, %v814_v15  ;;  %845 = vtanh.f32 %v333_v39  ;;  %v339_v39 = vadd.f32 %v1036_v0, %v204_v52 }
  0x49   : > { %v818_v40 = vpop.eup %817  ;;  %575 = vst.msk [vmem:[%s1097_s20 + $0x120] sm:$0xff] %vm538_vm0, %v816_v38  ;;  %847 = vtanh.f32 %v334_v19  ;;  %v340_v19 = vadd.f32 %v1036_v0, %v205_v28 }
  0x4a   : > { %v820_v22 = vpop.eup %819  ;;  %576 = vst.msk [vmem:[%s1097_s20 + $0x128] sm:$0xff] %vm538_vm0, %v818_v40  ;;  %849 = vtanh.f32 %v335_v29  ;;  %v209_v29 = vld [vmem:[%s1043_s17 + $0x1f0] sm:$0xff] }
  0x4b   : > { %v822_v15 = vpop.eup %821  ;;  %577 = vst.msk [vmem:[%s1097_s20 + $0x130] sm:$0xff] %vm538_vm0, %v820_v22  ;;  %851 = vtanh.f32 %v336_v30  ;;  %v208_v22 = vld [vmem:[%s1043_s17 + $0x1e8] sm:$0xff]  ;;  %v210_v30 = vld [vmem:[%s1043_s17 + $0x1f8] sm:$0xff] }
  0x4c   : > { %v824_v38 = vpop.eup %823  ;;  %578 = vst.msk [vmem:[%s1097_s20 + $0x138] sm:$0xff] %vm538_vm0, %v822_v15  ;;  %853 = vtanh.f32 %v337_v34  ;;  %v341_v15 = vadd.f32 %v1036_v0, %v206_v53  ;;  %v343_v28 = vadd.f32 %v1036_v0, %v208_v22  ;;  %v344_v53 = vadd.f32 %v1036_v0, %v209_v29 }
  0x4d   : > { %v826_v40 = vpop.eup %825  ;;  %579 = vst.msk [vmem:[%s1097_s20 + $0x140] sm:$0xff] %vm538_vm0, %v824_v38  ;;  %855 = vtanh.f32 %v338_v26  ;;  %v342_v38 = vadd.f32 %v1036_v0, %v207_v20  ;;  %v345_v20 = vadd.f32 %v1036_v0, %v210_v30 }
  0x4e   : > { %v828_v25 = vpop.eup %827  ;;  %580 = vst.msk [vmem:[%s1097_s20 + $0x148] sm:$0xff] %vm538_vm0, %v826_v40  ;;  %857 = vtanh.f32 %v339_v39 }
  0x4f   : > { %v830_v52 = vpop.eup %829  ;;  %581 = vst.msk [vmem:[%s1097_s20 + $0x150] sm:$0xff] %vm538_vm0, %v828_v25  ;;  %859 = vtanh.f32 %v340_v19 }
  0x50   : > { %v832_v23 = vpop.eup %831  ;;  %582 = vst.msk [vmem:[%s1097_s20 + $0x158] sm:$0xff] %vm538_vm0, %v830_v52  ;;  %861 = vtanh.f32 %v341_v15 }
  0x51   : > { %v834_v34 = vpop.eup %833  ;;  %583 = vst.msk [vmem:[%s1097_s20 + $0x160] sm:$0xff] %vm538_vm0, %v832_v23  ;;  %863 = vtanh.f32 %v342_v38 }
  0x52   : > { %v836_v26 = vpop.eup %835  ;;  %584 = vst.msk [vmem:[%s1097_s20 + $0x168] sm:$0xff] %vm538_vm0, %v834_v34  ;;  %865 = vtanh.f32 %v343_v28 }
  0x53   : > { %v838_v40 = vpop.eup %837  ;;  %585 = vst.msk [vmem:[%s1097_s20 + $0x170] sm:$0xff] %vm538_vm0, %v836_v26  ;;  %867 = vtanh.f32 %v344_v53  ;;  %v1855_v53 = vld [vmem:[#allocation6_spill] sm:$0xff] }
  0x54   : > { %v840_v39 = vpop.eup %839  ;;  %586 = vst.msk [vmem:[%s1097_s20 + $0x178] sm:$0xff] %vm538_vm0, %v838_v40  ;;  %869 = vtanh.f32 %v345_v20  ;;  %v1856_v20 = vld [vmem:[#allocation7_spill] sm:$0xff] }
  0x55   : > { %v842_v23 = vpop.eup %841  ;;  %587 = vst.msk [vmem:[%s1097_s20 + $0x180] sm:$0xff] %vm538_vm0, %v840_v39  ;;  %871 = vtanh.f32 %v1203_v35 }
  0x56   : > { %v844_v19 = vpop.eup %843  ;;  %588 = vst.msk [vmem:[%s1097_s20 + $0x188] sm:$0xff] %vm538_vm0, %v842_v23  ;;  %873 = vtanh.f32 %v1206_v36  ;;  %v1858_v23 = vld [vmem:[#allocation9_spill] sm:$0xff] }
  0x57   : > { %v846_v0 = vpop.eup %845  ;;  %589 = vst.msk [vmem:[%s1097_s20 + $0x190] sm:$0xff] %vm538_vm0, %v844_v19  ;;  %875 = vtanh.f32 %v1215_v41 }
  0x58   : > { %v848_v22 = vpop.eup %847  ;;  %590 = vst.msk [vmem:[%s1097_s20 + $0x198] sm:$0xff] %vm538_vm0, %v846_v0  ;;  %877 = vtanh.f32 %v1218_v42  ;;  %v1859_v0 = vld [vmem:[#allocation10_spill] sm:$0xff] }
  0x59   : > { %v850_v25 = vpop.eup %849  ;;  %591 = vst.msk [vmem:[%s1097_s20 + $0x1a0] sm:$0xff] %vm538_vm0, %v848_v22  ;;  %879 = vtanh.f32 %v1221_v43 }
  0x5a   : > { %v852_v15 = vpop.eup %851  ;;  %592 = vst.msk [vmem:[%s1097_s20 + $0x1a8] sm:$0xff] %vm538_vm0, %v850_v25  ;;  %881 = vtanh.f32 %v1230_v48  ;;  %v1860_v25 = vld [vmem:[#allocation11_spill] sm:$0xff] }
  0x5b   : > { %v854_v29 = vpop.eup %853  ;;  %593 = vst.msk [vmem:[%s1097_s20 + $0x1b0] sm:$0xff] %vm538_vm0, %v852_v15  ;;  %883 = vtanh.f32 %v1233_v49 }
  0x5c   : > { %v856_v35 = vpop.eup %855  ;;  %594 = vst.msk [vmem:[%s1097_s20 + $0x1b8] sm:$0xff] %vm538_vm0, %v854_v29  ;;  %885 = vtanh.f32 %v1236_v51  ;;  %v1861_v29 = vld [vmem:[#allocation12_spill] sm:$0xff] }
  0x5d   : > { %v858_v36 = vpop.eup %857  ;;  %595 = vst.msk [vmem:[%s1097_s20 + $0x1c0] sm:$0xff] %vm538_vm0, %v856_v35  ;;  %887 = vtanh.f32 %v1245_v50 }
  0x5e   : > { %v860_v41 = vpop.eup %859  ;;  %596 = vst.msk [vmem:[%s1097_s20 + $0x1c8] sm:$0xff] %vm538_vm0, %v858_v36  ;;  %889 = vtanh.f32 %v1248_v59 }
  0x5f   : > { %v862_v42 = vpop.eup %861  ;;  %597 = vst.msk [vmem:[%s1097_s20 + $0x1d0] sm:$0xff] %vm538_vm0, %v860_v41  ;;  %891 = vtanh.f32 %v1251_v60  ;;  %v1862_v41 = vld [vmem:[#allocation13_spill] sm:$0xff] }
  0x60   : > { %v864_v43 = vpop.eup %863  ;;  %598 = vst.msk [vmem:[%s1097_s20 + $0x1d8] sm:$0xff] %vm538_vm0, %v862_v42  ;;  %893 = vtanh.f32 %v1260_v54 }
  0x61   : > { %v866_v48 = vpop.eup %865  ;;  %599 = vst.msk [vmem:[%s1097_s20 + $0x1e0] sm:$0xff] %vm538_vm0, %v864_v43  ;;  %895 = vtanh.f32 %v1263_v8  ;;  %v1863_v43 = vld [vmem:[#allocation14_spill] sm:$0xff] }
  0x62   : > { %v868_v49 = vpop.eup %867  ;;  %600 = vst.msk [vmem:[%s1097_s20 + $0x1e8] sm:$0xff] %vm538_vm0, %v866_v48  ;;  %897 = vtanh.f32 %v1266_v9 }
  0x63   : > { %v870_v51 = vpop.eup %869  ;;  %601 = vst.msk [vmem:[%s1097_s20 + $0x1f0] sm:$0xff] %vm538_vm0, %v868_v49  ;;  %899 = vtanh.f32 %v1275_v55 }
  0x64   : > { %v872_v50 = vpop.eup %871  ;;  %602 = vst.msk [vmem:[%s1097_s20 + $0x1f8] sm:$0xff] %vm538_vm0, %v870_v51  ;;  %901 = vtanh.f32 %v1278_v17 }
  0x65   : > { %v874_v59 = vpop.eup %873  ;;  %603 = vst.msk [vmem:[%s1097_s20 + $0x200] sm:$0xff] %vm538_vm0, %v872_v50  ;;  %903 = vtanh.f32 %v1281_v18  ;;  %v1865_v50 = vld [vmem:[#allocation16_spill] sm:$0xff] }
  0x66   : > { %v876_v60 = vpop.eup %875  ;;  %604 = vst.msk [vmem:[%s1097_s20 + $0x208] sm:$0xff] %vm538_vm0, %v874_v59  ;;  %905 = vtanh.f32 %v1290_v56 }
  0x67   : > { %v878_v54 = vpop.eup %877  ;;  %605 = vst.msk [vmem:[%s1097_s20 + $0x210] sm:$0xff] %vm538_vm0, %v876_v60  ;;  %907 = vtanh.f32 %v1293_v32 }
  0x68   : > { %v880_v8 = vpop.eup %879  ;;  %606 = vst.msk [vmem:[%s1097_s20 + $0x218] sm:$0xff] %vm538_vm0, %v878_v54  ;;  %909 = vtanh.f32 %v1296_v33  ;;  %v1866_v54 = vld [vmem:[#allocation17_spill] sm:$0xff] }
  0x69   : > { %v882_v9 = vpop.eup %881  ;;  %607 = vst.msk [vmem:[%s1097_s20 + $0x220] sm:$0xff] %vm538_vm0, %v880_v8  ;;  %911 = vtanh.f32 %v1305_v61 }
  0x6a   : > { %v884_v55 = vpop.eup %883  ;;  %608 = vst.msk [vmem:[%s1097_s20 + $0x228] sm:$0xff] %vm538_vm0, %v882_v9  ;;  %913 = vtanh.f32 %v1308_v44  ;;  %v1867_v9 = vld [vmem:[#allocation18_spill] sm:$0xff] }
  0x6b   : > { %v886_v17 = vpop.eup %885  ;;  %609 = vst.msk [vmem:[%s1097_s20 + $0x230] sm:$0xff] %vm538_vm0, %v884_v55  ;;  %915 = vtanh.f32 %v1311_v45 }
  0x6c   : > { %v888_v18 = vpop.eup %887  ;;  %610 = vst.msk [vmem:[%s1097_s20 + $0x238] sm:$0xff] %vm538_vm0, %v886_v17  ;;  %917 = vtanh.f32 %v1320_v62 }
  0x6d   : > { %v890_v56 = vpop.eup %889  ;;  %611 = vst.msk [vmem:[%s1097_s20 + $0x240] sm:$0xff] %vm538_vm0, %v888_v18  ;;  %919 = vtanh.f32 %v1323_v57 }
  0x6e   : > { %v892_v32 = vpop.eup %891  ;;  %612 = vst.msk [vmem:[%s1097_s20 + $0x248] sm:$0xff] %vm538_vm0, %v890_v56  ;;  %921 = vtanh.f32 %v1326_v58 }
  0x6f   : > { %v894_v33 = vpop.eup %893  ;;  %613 = vst.msk [vmem:[%s1097_s20 + $0x250] sm:$0xff] %vm538_vm0, %v892_v32  ;;  %923 = vtanh.f32 %v1335_v63 }
  0x70   : > { %v896_v61 = vpop.eup %895  ;;  %614 = vst.msk [vmem:[%s1097_s20 + $0x258] sm:$0xff] %vm538_vm0, %v894_v33  ;;  %925 = vtanh.f32 %v1338_v10 }
  0x71   : > { %v898_v44 = vpop.eup %897  ;;  %615 = vst.msk [vmem:[%s1097_s20 + $0x260] sm:$0xff] %vm538_vm0, %v896_v61  ;;  %927 = vtanh.f32 %v1341_v11 }
  0x72   : > { %v900_v45 = vpop.eup %899  ;;  %616 = vst.msk [vmem:[%s1097_s20 + $0x268] sm:$0xff] %vm538_vm0, %v898_v44  ;;  %929 = vtanh.f32 %v1350_v5 }
  0x73   : > { %v902_v62 = vpop.eup %901  ;;  %617 = vst.msk [vmem:[%s1097_s20 + $0x270] sm:$0xff] %vm538_vm0, %v900_v45  ;;  %931 = vtanh.f32 %v1353_v27 }
  0x74   : > { %v904_v57 = vpop.eup %903  ;;  %618 = vst.msk [vmem:[%s1097_s20 + $0x278] sm:$0xff] %vm538_vm0, %v902_v62  ;;  %933 = vtanh.f32 %v1356_v31 }
  0x75   : > { %v906_v58 = vpop.eup %905  ;;  %619 = vst.msk [vmem:[%s1097_s20 + $0x280] sm:$0xff] %vm538_vm0, %v904_v57  ;;  %935 = vtanh.f32 %v1365_v6 }
  0x76   : > { %v908_v63 = vpop.eup %907  ;;  %620 = vst.msk [vmem:[%s1097_s20 + $0x288] sm:$0xff] %vm538_vm0, %v906_v58  ;;  %937 = vtanh.f32 %v1368_v46 }
  0x77   : > { %v910_v10 = vpop.eup %909  ;;  %621 = vst.msk [vmem:[%s1097_s20 + $0x290] sm:$0xff] %vm538_vm0, %v908_v63  ;;  %939 = vtanh.f32 %v1371_v47 }
  0x78   : > { %v912_v11 = vpop.eup %911  ;;  %622 = vst.msk [vmem:[%s1097_s20 + $0x298] sm:$0xff] %vm538_vm0, %v910_v10  ;;  %941 = vtanh.f32 %v1380_v7 }
  0x79   : > { %v914_v5 = vpop.eup %913  ;;  %623 = vst.msk [vmem:[%s1097_s20 + $0x2a0] sm:$0xff] %vm538_vm0, %v912_v11  ;;  %943 = vtanh.f32 %v1383_v3  ;;  %v1851_v3 = vld [vmem:[#allocation2_spill] sm:$0xff] }
  0x7a   : > { %v916_v27 = vpop.eup %915  ;;  %624 = vst.msk [vmem:[%s1097_s20 + $0x2a8] sm:$0xff] %vm538_vm0, %v914_v5  ;;  %945 = vtanh.f32 %v1386_v4 }
  0x7b   : > { %v918_v31 = vpop.eup %917  ;;  %625 = vst.msk [vmem:[%s1097_s20 + $0x2b0] sm:$0xff] %vm538_vm0, %v916_v27  ;;  %947 = vtanh.f32 %v1395_v12  ;;  %v1852_v12 = vld [vmem:[#allocation3_spill] sm:$0xff] }
  0x7c   : > { %v920_v6 = vpop.eup %919  ;;  %626 = vst.msk [vmem:[%s1097_s20 + $0x2b8] sm:$0xff] %vm538_vm0, %v918_v31  ;;  %949 = vtanh.f32 %v1398_v37  ;;  %v1853_v37 = vld [vmem:[#allocation4_spill] sm:$0xff] }
  0x7d   : > { %v922_v46 = vpop.eup %921  ;;  %627 = vst.msk [vmem:[%s1097_s20 + $0x2c0] sm:$0xff] %vm538_vm0, %v920_v6  ;;  %951 = vtanh.f32 %v1851_v3 }
  0x7e   : > { %v924_v47 = vpop.eup %923  ;;  %628 = vst.msk [vmem:[%s1097_s20 + $0x2c8] sm:$0xff] %vm538_vm0, %v922_v46  ;;  %953 = vtanh.f32 %v1410_v13  ;;  %v1854_v13 = vld [vmem:[#allocation5_spill] sm:$0xff] }
  0x7f   : > { %v926_v7 = vpop.eup %925  ;;  %629 = vst.msk [vmem:[%s1097_s20 + $0x2d0] sm:$0xff] %vm538_vm0, %v924_v47  ;;  %955 = vtanh.f32 %v1852_v12 }
  0x80   : > { %v928_v52 = vpop.eup %927  ;;  %630 = vst.msk [vmem:[%s1097_s20 + $0x2d8] sm:$0xff] %vm538_vm0, %v926_v7  ;;  %957 = vtanh.f32 %v1853_v37 }
  0x81   : > { %v930_v4 = vpop.eup %929  ;;  %631 = vst.msk [vmem:[%s1097_s20 + $0x2e0] sm:$0xff] %vm538_vm0, %v928_v52  ;;  %959 = vtanh.f32 %v1425_v14  ;;  %v1857_v14 = vld [vmem:[#allocation8_spill] sm:$0xff] }
  0x82   : > { %v932_v38 = vpop.eup %931  ;;  %632 = vst.msk [vmem:[%s1097_s20 + $0x2e8] sm:$0xff] %vm538_vm0, %v930_v4  ;;  %961 = vtanh.f32 %v1854_v13 }
  0x83   : > { %v934_v30 = vpop.eup %933  ;;  %633 = vst.msk [vmem:[%s1097_s20 + $0x2f0] sm:$0xff] %vm538_vm0, %v932_v38  ;;  %963 = vtanh.f32 %v1855_v53 }
  0x84   : > { %v936_v28 = vpop.eup %935  ;;  %634 = vst.msk [vmem:[%s1097_s20 + $0x2f8] sm:$0xff] %vm538_vm0, %v934_v30  ;;  %965 = vtanh.f32 %v1856_v20 }
  0x85   : > { %v938_v34 = vpop.eup %937  ;;  %635 = vst.msk [vmem:[%s1097_s20 + $0x300] sm:$0xff] %vm538_vm0, %v936_v28  ;;  %967 = vtanh.f32 %v1857_v14 }
  0x86   : > { %v940_v26 = vpop.eup %939  ;;  %636 = vst.msk [vmem:[%s1097_s20 + $0x308] sm:$0xff] %vm538_vm0, %v938_v34  ;;  %969 = vtanh.f32 %v1858_v23 }
  0x87   : > { %v942_v40 = vpop.eup %941  ;;  %637 = vst.msk [vmem:[%s1097_s20 + $0x310] sm:$0xff] %vm538_vm0, %v940_v26  ;;  %971 = vtanh.f32 %v1859_v0 }
  0x88   : > { %v944_v39 = vpop.eup %943  ;;  %638 = vst.msk [vmem:[%s1097_s20 + $0x318] sm:$0xff] %vm538_vm0, %v942_v40  ;;  %973 = vtanh.f32 %v1860_v25 }
  0x89   : > { %v946_v19 = vpop.eup %945  ;;  %639 = vst.msk [vmem:[%s1097_s20 + $0x320] sm:$0xff] %vm538_vm0, %v944_v39  ;;  %975 = vtanh.f32 %v1861_v29 }
  0x8a   : > { %v948_v22 = vpop.eup %947  ;;  %640 = vst.msk [vmem:[%s1097_s20 + $0x328] sm:$0xff] %vm538_vm0, %v946_v19  ;;  %977 = vtanh.f32 %v1472_v21  ;;  %v1864_v21 = vld [vmem:[#allocation15_spill] sm:$0xff] }
  0x8b   : > { %v950_v15 = vpop.eup %949  ;;  %641 = vst.msk [vmem:[%s1097_s20 + $0x330] sm:$0xff] %vm538_vm0, %v948_v22  ;;  %979 = vtanh.f32 %v1862_v41 }
  0x8c   : > { %v952_v35 = vpop.eup %951  ;;  %642 = vst.msk [vmem:[%s1097_s20 + $0x338] sm:$0xff] %vm538_vm0, %v950_v15  ;;  %981 = vtanh.f32 %v1863_v43 }
  0x8d   : > { %v954_v36 = vpop.eup %953  ;;  %643 = vst.msk [vmem:[%s1097_s20 + $0x340] sm:$0xff] %vm538_vm0, %v952_v35  ;;  %983 = vtanh.f32 %v1487_v24 }
  0x8e   : > { %v956_v42 = vpop.eup %955  ;;  %644 = vst.msk [vmem:[%s1097_s20 + $0x348] sm:$0xff] %vm538_vm0, %v954_v36  ;;  %985 = vtanh.f32 %v1864_v21 }
  0x8f   : > { %v958_v48 = vpop.eup %957  ;;  %645 = vst.msk [vmem:[%s1097_s20 + $0x350] sm:$0xff] %vm538_vm0, %v956_v42  ;;  %987 = vtanh.f32 %v1865_v50 }
  0x90   : > { %v960_v49 = vpop.eup %959  ;;  %646 = vst.msk [vmem:[%s1097_s20 + $0x358] sm:$0xff] %vm538_vm0, %v958_v48  ;;  %989 = vtanh.f32 %v1503_v1 }
  0x91   : > { %v962_v51 = vpop.eup %961  ;;  %647 = vst.msk [vmem:[%s1097_s20 + $0x360] sm:$0xff] %vm538_vm0, %v960_v49  ;;  %991 = vtanh.f32 %v1506_v2 }
  0x92   : > { %v964_v59 = vpop.eup %963  ;;  %648 = vst.msk [vmem:[%s1097_s20 + $0x368] sm:$0xff] %vm538_vm0, %v962_v51  ;;  %993 = vtanh.f32 %v1866_v54 }
  0x93   : > { %v966_v24 = vpop.eup %965  ;;  %649 = vst.msk [vmem:[%s1097_s20 + $0x370] sm:$0xff] %vm538_vm0, %v964_v59  ;;  %995 = vtanh.f32 %v1519_v16 }
  0x94   : > { %v968_v60 = vpop.eup %967  ;;  %650 = vst.msk [vmem:[%s1097_s20 + $0x378] sm:$0xff] %vm538_vm0, %v966_v24  ;;  %997 = vtanh.f32 %v1867_v9 }
  0x95   : > { %v970_v8 = vpop.eup %969  ;;  %651 = vst.msk [vmem:[%s1097_s20 + $0x380] sm:$0xff] %vm538_vm0, %v968_v60 }
  0x96   : > { %v972_v1 = vpop.eup %971  ;;  %652 = vst.msk [vmem:[%s1097_s20 + $0x388] sm:$0xff] %vm538_vm0, %v970_v8 }
  0x97   : > { %v974_v2 = vpop.eup %973  ;;  %653 = vst.msk [vmem:[%s1097_s20 + $0x390] sm:$0xff] %vm538_vm0, %v972_v1 }
  0x98   : > { %v976_v55 = vpop.eup %975  ;;  %654 = vst.msk [vmem:[%s1097_s20 + $0x398] sm:$0xff] %vm538_vm0, %v974_v2 }
  0x99   : > { %v978_v17 = vpop.eup %977  ;;  %655 = vst.msk [vmem:[%s1097_s20 + $0x3a0] sm:$0xff] %vm538_vm0, %v976_v55 }
  0x9a   : > { %v980_v16 = vpop.eup %979  ;;  %656 = vst.msk [vmem:[%s1097_s20 + $0x3a8] sm:$0xff] %vm538_vm0, %v978_v17 }
  0x9b   : > { %v982_v18 = vpop.eup %981  ;;  %657 = vst.msk [vmem:[%s1097_s20 + $0x3b0] sm:$0xff] %vm538_vm0, %v980_v16 }
  0x9c   : > { %v984_v56 = vpop.eup %983  ;;  %658 = vst.msk [vmem:[%s1097_s20 + $0x3b8] sm:$0xff] %vm538_vm0, %v982_v18 }
  0x9d   : > { %v986_v32 = vpop.eup %985  ;;  %659 = vst.msk [vmem:[%s1097_s20 + $0x3c0] sm:$0xff] %vm538_vm0, %v984_v56 }
  0x9e   : > { %v988_v33 = vpop.eup %987  ;;  %660 = vst.msk [vmem:[%s1097_s20 + $0x3c8] sm:$0xff] %vm538_vm0, %v986_v32 }
  0x9f   : > { %v990_v61 = vpop.eup %989  ;;  %661 = vst.msk [vmem:[%s1097_s20 + $0x3d0] sm:$0xff] %vm538_vm0, %v988_v33 }
  0xa0   : > { %v992_v44 = vpop.eup %991  ;;  %662 = vst.msk [vmem:[%s1097_s20 + $0x3d8] sm:$0xff] %vm538_vm0, %v990_v61 }
  0xa1   : > { %v994_v45 = vpop.eup %993  ;;  %663 = vst.msk [vmem:[%s1097_s20 + $0x3e0] sm:$0xff] %vm538_vm0, %v992_v44 }
  0xa2   : > { %v996_v62 = vpop.eup %995  ;;  %664 = vst.msk [vmem:[%s1097_s20 + $0x3e8] sm:$0xff] %vm538_vm0, %v994_v45 }
  0xa3   : > { %v998_v57 = vpop.eup %997  ;;  %665 = vst.msk [vmem:[%s1097_s20 + $0x3f0] sm:$0xff] %vm538_vm0, %v996_v62 }
  0xa4   : > { %666 = vst.msk [vmem:[%s1097_s20 + $0x3f8] sm:$0xff] %vm538_vm0, %v998_v57 }
  0xa5 PF: > { %s12_s9 = sadd.s32 1, %s1005_s9  }
  0xa6   : > { %p9_p4 = scmp.ge.s32.totalorder %s12_s9, 4  }
  0xa8   :  { %11 = sbr.rel (!%p9_p4) target bundleno = 1 (0x1), region = 58 }

</bundles_post_ra>
